<compile_context>
chip_gen: v7x
topology: tpu7x:2x2x1
jax: 0.10.0
libtpu: 0.0.40
codegen_flags: <defaults>
</compile_context>

<pallas_src>
import jax
import jax.numpy as jnp
from jax.experimental import pallas as pl
from jax.experimental.pallas import tpu as pltpu

EPS = 1e-5       # torch.nn.GroupNorm default
GROUPS = 32      # as in the module


# ----------------------------- in-kernel helpers -----------------------------

def _silu(x):
    # x * sigmoid(x); sigmoid via a single bounded EUP transcendental (tanh).
    return x * (0.5 * jnp.tanh(0.5 * x) + 0.5)


def _group_norm(x3d, gamma, beta, m, m_t, inv_cnt, ew_dtype):
    """Per-sample GroupNorm.  x3d: (B, H*W, C) f32; gamma/beta: (1,1,C);
    m: (C, G) one-hot channel->group; m_t: (G, C).  Stats always in f32;
    normalize/affine output in ew_dtype (bf16 on v6e/v7x, f32 on v5e).
    On v5e these tiny M=B stat matmuls interleave with the MRF; acceptable here
    (v7x MRB makes it moot)."""
    s = jnp.sum(x3d, axis=1)                                              # (B, C)
    q = jnp.sum(x3d * x3d, axis=1)                                        # (B, C)
    gmean = jnp.dot(s, m, preferred_element_type=jnp.float32) * inv_cnt   # (B, G)
    gsq = jnp.dot(q, m, preferred_element_type=jnp.float32) * inv_cnt     # (B, G)
    gvar = jnp.maximum(gsq - gmean * gmean, 0.0)                          # cancellation guard
    ginv = jax.lax.rsqrt(gvar + EPS)                                      # (B, G)
    mean_c = jnp.dot(gmean, m_t, preferred_element_type=jnp.float32)      # (B, C)
    inv_c = jnp.dot(ginv, m_t, preferred_element_type=jnp.float32)        # (B, C)
    xn = (x3d - mean_c[:, None, :]) * inv_c[:, None, :]
    return xn.astype(ew_dtype) * gamma.astype(ew_dtype) + beta.astype(ew_dtype)


def _store_padded(pad_ref, interior_bf16, B, H, W, C):
    """Write the activation into the interior of a persistent (B, H+2, W+2, C) bf16 halo
    scratch; zero only the halo edges (no full zeros() fill, no dynamic_update_slice copy).
    Halo is re-zeroed every step so the kernel stays correct under megacore grid sharding."""
    zrow = jnp.zeros((B, 1, W + 2, C), jnp.bfloat16)
    pad_ref[:, pl.ds(0, 1), :, :] = zrow
    pad_ref[:, pl.ds(H + 1, 1), :, :] = zrow
    zcol = jnp.zeros((B, H, 1, C), jnp.bfloat16)
    pad_ref[:, pl.ds(1, H), pl.ds(0, 1), :] = zcol
    pad_ref[:, pl.ds(1, H), pl.ds(W + 1, 1), :] = zcol
    pad_ref[:, pl.ds(1, H), pl.ds(1, W), :] = interior_bf16


def _conv3x3(pad_ref, w_ref, bias, B, H, W, Cin):
    """3x3 conv (padding=1) from the halo scratch.  w_ref: (3, 3*Cin, Cout) bf16.
    im2col along W only -> 3 MXU matmuls with K = 3*Cin and M = B*H*W.
    Returns (B*H*W, Cout) f32; conv bias folded into the first tap (no zeros init)."""
    slab = jnp.concatenate(
        [pad_ref[:, :, pl.ds(dw, W), :] for dw in range(3)], axis=-1)     # (B, H+2, W, 3*Cin)
    acc = None
    for dh in range(3):
        lhs = slab[:, dh:dh + H].reshape(B * H * W, 3 * Cin)
        contrib = jnp.dot(lhs, w_ref[dh], preferred_element_type=jnp.float32)
        acc = contrib + bias if acc is None else acc + contrib
    return acc


# --------------------------------- the kernel --------------------------------

def _make_kernel(B, H, W, Cin, Cout, use_res_conv, ew_dtype):
    inv_cnt1 = 1.0 / float(H * W * (Cin // GROUPS))
    inv_cnt2 = 1.0 / float(H * W * (Cout // GROUPS))

    def kernel(x_ref, m1_ref, m1t_ref, g1_ref, be1_ref, w1_ref, cb1_ref,
               m2_ref, m2t_ref, g2_ref, be2_ref, w2_ref, cb2_ref, *rest):
        if use_res_conv:
            wr_ref, br_ref, o_ref, pad1_ref, pad2_ref = rest
        else:
            o_ref, pad1_ref, pad2_ref = rest

        x_bf = x_ref[...]                                                 # (B,H,W,Cin) bf16
        x3 = x_bf.astype(jnp.float32).reshape(B, H * W, Cin)

        g1 = g1_ref[...].reshape(1, 1, Cin)
        b1 = be1_ref[...].reshape(1, 1, Cin)
        h = _group_norm(x3, g1, b1, m1_ref[...], m1t_ref[...], inv_cnt1, ew_dtype)
        h = _silu(h)
        _store_padded(pad1_ref, h.reshape(B, H, W, Cin).astype(jnp.bfloat16), B, H, W, Cin)
        h = _conv3x3(pad1_ref, w1_ref, cb1_ref[...], B, H, W, Cin)        # (BHW, Cout) f32

        g2 = g2_ref[...].reshape(1, 1, Cout)
        b2 = be2_ref[...].reshape(1, 1, Cout)
        h = _group_norm(h.reshape(B, H * W, Cout), g2, b2,
                        m2_ref[...], m2t_ref[...], inv_cnt2, ew_dtype)
        h = _silu(h)
        _store_padded(pad2_ref, h.reshape(B, H, W, Cout).astype(jnp.bfloat16), B, H, W, Cout)
        h = _conv3x3(pad2_ref, w2_ref, cb2_ref[...], B, H, W, Cout)       # (BHW, Cout) f32

        # Residual: the bf16 VMEM-resident x block is read once, straight into the matmul.
        x2 = x_bf.reshape(B * H * W, Cin)
        if use_res_conv:
            res = jnp.dot(x2, wr_ref[...], preferred_element_type=jnp.float32) + br_ref[...]
        else:
            res = x2.astype(jnp.float32)

        o_ref[...] = (h + res).reshape(B, H, W, Cout).astype(o_ref.dtype)

    return kernel


# --------------------------------- the wrapper --------------------------------

def _group_matrices(c):
    """One-hot channel->group membership (C, G) and its transpose (G, C), f32."""
    m = (jnp.arange(c)[:, None] // (c // GROUPS) == jnp.arange(GROUPS)[None, :])
    m = m.astype(jnp.float32)
    return m, m.T


def vae_residual_block(x_nchw, params, *, batch_tile=None,
                       elementwise_dtype=jnp.float32,   # bf16 recommended on v6e/v7x
                       out_dtype=jnp.bfloat16):
    n, cin, h, w = x_nchw.shape
    cout = params["w1"].shape[-1]
    assert cin % GROUPS == 0 and cout % GROUPS == 0
    use_res_conv = cin != cout

    # bf16 activation DMA; f32 only inside the kernel for stats/accumulation.
    # NOTE: in a full NHWC model these boundary transposes disappear; kept only because the
    # public API (and the reference) are PyTorch-style NCHW.
    x_nhwc = jnp.transpose(x_nchw, (0, 2, 3, 1)).astype(jnp.bfloat16)

    # Fold samples into one grid step until M = batch_tile*H*W fills the MXU (>= 256 rows).
    if batch_tile is None:
        target = max(1, -(-256 // (h * w)))      # ceil(256 / (H*W))
        batch_tile = 1
        for b in range(1, min(n, target) + 1):
            if n % b == 0:
                batch_tile = b
    assert n % batch_tile == 0
    steps = n // batch_tile

    m1, m1t = _group_matrices(cin)
    m2, m2t = _group_matrices(cout)

    # MXU operands in bf16 (f32 accumulation in-kernel); conv weights reshaped to
    # (3, 3*Cin, Cout) so each dh tap contracts K = 3*Cin in one matmul.
    w1 = params["w1"].astype(jnp.bfloat16).reshape(3, 3 * cin, cout)
    w2 = params["w2"].astype(jnp.bfloat16).reshape(3, 3 * cout, cout)

    kernel = _make_kernel(batch_tile, h, w, cin, cout, use_res_conv, elementwise_dtype)

    # Constants (weights, norm params, biases, group matrices): whole-array VMEM residents
    # -> single DMA, no per-grid-step pipelining / double-buffered weight copies.
    vmem_const = pl.BlockSpec(memory_space=pltpu.MemorySpace.VMEM)
    in_specs = [
        pl.BlockSpec((batch_tile, h, w, cin), lambda i: (i, 0, 0, 0)),    # x, B_tile samples
        vmem_const, vmem_const,                                           # m1, m1t
        vmem_const, vmem_const,                                           # gamma1, beta1
        vmem_const, vmem_const,                                           # w1 (bf16), conv1 bias
        vmem_const, vmem_const,                                           # m2, m2t
        vmem_const, vmem_const,                                           # gamma2, beta2
        vmem_const, vmem_const,                                           # w2 (bf16), conv2 bias
    ]
    inputs = [x_nhwc, m1, m1t, params["gamma1"], params["beta1"], w1, params["cb1"],
              m2, m2t, params["gamma2"], params["beta2"], w2, params["cb2"]]
    if use_res_conv:
        in_specs += [vmem_const, vmem_const]                              # wr (bf16), br
        inputs += [params["wr"].astype(jnp.bfloat16), params["br"]]

    scratch_shapes = [
        pltpu.VMEM((batch_tile, h + 2, w + 2, cin), jnp.bfloat16),        # conv1 halo scratch
        pltpu.VMEM((batch_tile, h + 2, w + 2, cout), jnp.bfloat16),       # conv2 halo scratch
    ]

    # VMEM budget: double-buffered bf16 x/out blocks + resident bf16 weights + halo scratches
    # + in-kernel temps, 2x headroom, clamped to the actual chip's VMEM (v7x has only 64 MiB).
    cmax = max(cin, cout)
    bt = batch_tile
    est = (2 * 2 * bt * h * w * (cin + cout)                          # x/out blocks (2 bufs, bf16)
           + 2 * (9 * cin * cout + 9 * cout * cout + cin * cout)      # bf16 weights
           + 2 * bt * (h + 2) * (w + 2) * (cin + cout)                # bf16 halo scratches
           + 2 * bt * (h + 2) * w * 3 * cmax                          # bf16 slab
           + 4 * 4 * bt * h * w * cmax)                               # f32 temps / accumulators
    try:
        vmem_cap = int(0.85 * pltpu.get_tpu_info().vmem_capacity_bytes)
    except Exception:
        vmem_cap = 64 * 1024 * 1024                                   # safe on every generation
    vmem_limit = int(min(max(2 * est, 32 * 1024 * 1024), vmem_cap))

    # Advisory cost for XLA's scheduler around the custom call.
    flops = 2 * n * h * w * (9 * cin * cout + 9 * cout * cout
                             + (cin * cout if use_res_conv else 0))
    transcendentals = n * h * w * (cin + cout)                        # one tanh per SiLU element
    out_bytes = n * h * w * cout * jnp.dtype(out_dtype).itemsize
    bytes_accessed = int(sum(int(a.size) * a.dtype.itemsize for a in inputs) + out_bytes)

    out = pl.pallas_call(
        kernel,
        grid=(steps,),
        in_specs=in_specs,
        out_specs=pl.BlockSpec((batch_tile, h, w, cout), lambda i: (i, 0, 0, 0)),
        out_shape=jax.ShapeDtypeStruct((n, h, w, cout), out_dtype),
        scratch_shapes=scratch_shapes,
        compiler_params=pltpu.CompilerParams(
            dimension_semantics=("parallel",),
            vmem_limit_bytes=vmem_limit),
        cost_estimate=pl.CostEstimate(flops=int(flops),
                                      transcendentals=int(transcendentals),
                                      bytes_accessed=bytes_accessed),
    )(*inputs)

    return jnp.transpose(out, (0, 3, 1, 2))   # back to NCHW


# ---------------------------- pure-JAX reference ------------------------------

def reference(x_nchw, params):
    def gn(x, gamma, beta):
        nb, c, hh, ww = x.shape
        xg = x.reshape(nb, GROUPS, (c // GROUPS) * hh * ww)
        mean = xg.mean(-1, keepdims=True)
        var = xg.var(-1, keepdims=True)
        xn = ((xg - mean) / jnp.sqrt(var + EPS)).reshape(nb, c, hh, ww)
        return xn * gamma.reshape(1, c, 1, 1) + beta.reshape(1, c, 1, 1)

    def conv(x, w_hwio, b, pad):
        y = jax.lax.conv_general_dilated(
            x, w_hwio, window_strides=(1, 1), padding=pad,
            dimension_numbers=("NCHW", "HWIO", "NCHW"))
        return y + b.reshape(1, -1, 1, 1)

    h = gn(x_nchw, params["gamma1"], params["beta1"])
    h = jax.nn.silu(h)
    h = conv(h, params["w1"], params["cb1"], ((1, 1), (1, 1)))
    h = gn(h, params["gamma2"], params["beta2"])
    h = jax.nn.silu(h)
    h = conv(h, params["w2"], params["cb2"], ((1, 1), (1, 1)))
    if "wr" in params:
        res = conv(x_nchw, params["wr"][None, None], params["br"], ((0, 0), (0, 0)))
    else:
        res = x_nchw
    return h + res


# ------------------------------------ main ------------------------------------

def init_params(key, cin, cout):
    ks = jax.random.split(key, 12)
    p = {
        "gamma1": 1.0 + 0.05 * jax.random.normal(ks[0], (1, cin), jnp.float32),
        "beta1": 0.05 * jax.random.normal(ks[1], (1, cin), jnp.float32),
        "w1": 0.05 * jax.random.normal(ks[2], (3, 3, cin, cout), jnp.float32),
        "cb1": 0.05 * jax.random.normal(ks[3], (1, cout), jnp.float32),
        "gamma2": 1.0 + 0.05 * jax.random.normal(ks[4], (1, cout), jnp.float32),
        "beta2": 0.05 * jax.random.normal(ks[5], (1, cout), jnp.float32),
        "w2": 0.05 * jax.random.normal(ks[6], (3, 3, cout, cout), jnp.float32),
        "cb2": 0.05 * jax.random.normal(ks[7], (1, cout), jnp.float32),
    }
    if cin != cout:
        p["wr"] = 0.05 * jax.random.normal(ks[8], (cin, cout), jnp.float32)
        p["br"] = 0.05 * jax.random.normal(ks[9], (1, cout), jnp.float32)
    return p


if __name__ == "__main__":
    # GroupNorm(32, C) requires C % 32 == 0; exercise both residual paths
    # (1x1-conv when Cin != Cout, identity when Cin == Cout).
    key = jax.random.PRNGKey(0)
    for (CIN, COUT) in ((32, 64), (64, 64)):
        N, H, W = 2, 8, 8
        key, kx, kp = jax.random.split(key, 3)
        x = jax.random.normal(kx, (N, CIN, H, W), jnp.float32)
        params = init_params(kp, CIN, COUT)

        out = jax.block_until_ready(vae_residual_block(x, params)).astype(jnp.float32)
        ref = jax.block_until_ready(reference(x, params))

        assert out.shape == (N, COUT, H, W)
        # bf16 activations / weights / output vs f32 reference -> loosened tolerance.
        assert jnp.allclose(out, ref, rtol=5e-2, atol=5e-2), (
            float(jnp.max(jnp.abs(out - ref))))
    print("KERNEL_OK")
</pallas_src>

<mosaic_0001>
module attributes {stable_mosaic.version = 11 : i64} {
  func.func @kernel(%arg0: i32, %arg1: memref<2x8x8x32xbf16, #tpu.memory_space<vmem>>, %arg2: memref<32x32xf32, #tpu.memory_space<vmem>>, %arg3: memref<32x32xf32, #tpu.memory_space<vmem>>, %arg4: memref<1x32xf32, #tpu.memory_space<vmem>>, %arg5: memref<1x32xf32, #tpu.memory_space<vmem>>, %arg6: memref<3x96x64xbf16, #tpu.memory_space<vmem>>, %arg7: memref<1x64xf32, #tpu.memory_space<vmem>>, %arg8: memref<64x32xf32, #tpu.memory_space<vmem>>, %arg9: memref<32x64xf32, #tpu.memory_space<vmem>>, %arg10: memref<1x64xf32, #tpu.memory_space<vmem>>, %arg11: memref<1x64xf32, #tpu.memory_space<vmem>>, %arg12: memref<3x192x64xbf16, #tpu.memory_space<vmem>>, %arg13: memref<1x64xf32, #tpu.memory_space<vmem>>, %arg14: memref<32x64xbf16, #tpu.memory_space<vmem>>, %arg15: memref<1x64xf32, #tpu.memory_space<vmem>>, %arg16: memref<2x8x8x64xbf16, #tpu.memory_space<vmem>>, %arg17: memref<2x10x10x32xbf16, #tpu.memory_space<vmem>>, %arg18: memref<2x10x10x64xbf16, #tpu.memory_space<vmem>>) attributes {dimension_semantics = [#tpu.dimension_semantics<parallel>], iteration_bounds = array<i64: 1>, scalar_prefetch = 0 : i64, scratch_operands = 2 : i64, tpu.core_type = #tpu.core_type<tc>, window_params = [{transform_indices = @transform_0, window_bounds = array<i64: 2, 8, 8, 32>}, {pipeline_mode = #tpu.pipeline_mode<synchronous>, transform_indices = @transform_1, window_bounds = array<i64: 32, 32>}, {pipeline_mode = #tpu.pipeline_mode<synchronous>, transform_indices = @transform_2, window_bounds = array<i64: 32, 32>}, {pipeline_mode = #tpu.pipeline_mode<synchronous>, transform_indices = @transform_3, window_bounds = array<i64: 1, 32>}, {pipeline_mode = #tpu.pipeline_mode<synchronous>, transform_indices = @transform_4, window_bounds = array<i64: 1, 32>}, {pipeline_mode = #tpu.pipeline_mode<synchronous>, transform_indices = @transform_5, window_bounds = array<i64: 3, 96, 64>}, {pipeline_mode = #tpu.pipeline_mode<synchronous>, transform_indices = @transform_6, window_bounds = array<i64: 1, 64>}, {pipeline_mode = #tpu.pipeline_mode<synchronous>, transform_indices = @transform_7, window_bounds = array<i64: 64, 32>}, {pipeline_mode = #tpu.pipeline_mode<synchronous>, transform_indices = @transform_8, window_bounds = array<i64: 32, 64>}, {pipeline_mode = #tpu.pipeline_mode<synchronous>, transform_indices = @transform_9, window_bounds = array<i64: 1, 64>}, {pipeline_mode = #tpu.pipeline_mode<synchronous>, transform_indices = @transform_10, window_bounds = array<i64: 1, 64>}, {pipeline_mode = #tpu.pipeline_mode<synchronous>, transform_indices = @transform_11, window_bounds = array<i64: 3, 192, 64>}, {pipeline_mode = #tpu.pipeline_mode<synchronous>, transform_indices = @transform_12, window_bounds = array<i64: 1, 64>}, {pipeline_mode = #tpu.pipeline_mode<synchronous>, transform_indices = @transform_13, window_bounds = array<i64: 32, 64>}, {pipeline_mode = #tpu.pipeline_mode<synchronous>, transform_indices = @transform_14, window_bounds = array<i64: 1, 64>}, {transform_indices = @transform_15, window_bounds = array<i64: 2, 8, 8, 64>}]} {
    %c0 = arith.constant 0 : index
    %c0_0 = arith.constant 0 : index
    %c0_1 = arith.constant 0 : index
    %c0_2 = arith.constant 0 : index
    %0 = vector.load %arg1[%c0, %c0_0, %c0_1, %c0_2] : memref<2x8x8x32xbf16, #tpu.memory_space<vmem>>, vector<2x8x8x32xbf16>
    %1 = arith.extf %0 : vector<2x8x8x32xbf16> to vector<2x8x8x32xf32>
    %2 = vector.shape_cast %1 : vector<2x8x8x32xf32> to vector<2x64x32xf32>
    %c0_3 = arith.constant 0 : index
    %c0_4 = arith.constant 0 : index
    %3 = vector.load %arg4[%c0_3, %c0_4] : memref<1x32xf32, #tpu.memory_space<vmem>>, vector<1x32xf32>
    %4 = vector.shape_cast %3 : vector<1x32xf32> to vector<1x1x32xf32>
    %c0_5 = arith.constant 0 : index
    %c0_6 = arith.constant 0 : index
    %5 = vector.load %arg5[%c0_5, %c0_6] : memref<1x32xf32, #tpu.memory_space<vmem>>, vector<1x32xf32>
    %6 = vector.shape_cast %5 : vector<1x32xf32> to vector<1x1x32xf32>
    %c0_7 = arith.constant 0 : index
    %c0_8 = arith.constant 0 : index
    %7 = vector.load %arg2[%c0_7, %c0_8] : memref<32x32xf32, #tpu.memory_space<vmem>>, vector<32x32xf32>
    %c0_9 = arith.constant 0 : index
    %c0_10 = arith.constant 0 : index
    %8 = vector.load %arg3[%c0_9, %c0_10] : memref<32x32xf32, #tpu.memory_space<vmem>>, vector<32x32xf32>
    %cst = arith.constant dense<0.000000e+00> : vector<2x32xf32>
    %9 = vector.multi_reduction <add>, %2, %cst [1] : vector<2x64x32xf32> to vector<2x32xf32>
    %10 = arith.mulf %2, %2 : vector<2x64x32xf32>
    %cst_11 = arith.constant dense<0.000000e+00> : vector<2x32xf32>
    %11 = vector.multi_reduction <add>, %10, %cst_11 [1] : vector<2x64x32xf32> to vector<2x32xf32>
    %cst_12 = arith.constant dense<0.000000e+00> : vector<2x32xf32>
    %12 = tpu.matmul %9, %7, %cst_12 {dimension_numbers = #tpu.dot_dimension_numbers<[1], [0], [0], [1], [0, 0, 1, 1], [], []>} : vector<2x32xf32>, vector<32x32xf32>, vector<2x32xf32> -> vector<2x32xf32>
    %cst_13 = arith.constant 1.562500e-02 : f32
    %13 = vector.broadcast %cst_13 : f32 to vector<2x32xf32>
    %14 = arith.mulf %12, %13 : vector<2x32xf32>
    %cst_14 = arith.constant dense<0.000000e+00> : vector<2x32xf32>
    %15 = tpu.matmul %11, %7, %cst_14 {dimension_numbers = #tpu.dot_dimension_numbers<[1], [0], [0], [1], [0, 0, 1, 1], [], []>} : vector<2x32xf32>, vector<32x32xf32>, vector<2x32xf32> -> vector<2x32xf32>
    %cst_15 = arith.constant 1.562500e-02 : f32
    %16 = vector.broadcast %cst_15 : f32 to vector<2x32xf32>
    %17 = arith.mulf %15, %16 : vector<2x32xf32>
    %18 = arith.mulf %14, %14 : vector<2x32xf32>
    %19 = arith.subf %17, %18 : vector<2x32xf32>
    %cst_16 = arith.constant 0.000000e+00 : f32
    %20 = vector.broadcast %cst_16 : f32 to vector<2x32xf32>
    %21 = arith.maximumf %19, %20 : vector<2x32xf32>
    %cst_17 = arith.constant 9.99999974E-6 : f32
    %22 = vector.broadcast %cst_17 : f32 to vector<2x32xf32>
    %23 = arith.addf %21, %22 : vector<2x32xf32>
    %24 = math.rsqrt %23 : vector<2x32xf32>
    %cst_18 = arith.constant dense<0.000000e+00> : vector<2x32xf32>
    %25 = tpu.matmul %14, %8, %cst_18 {dimension_numbers = #tpu.dot_dimension_numbers<[1], [0], [0], [1], [0, 0, 1, 1], [], []>} : vector<2x32xf32>, vector<32x32xf32>, vector<2x32xf32> -> vector<2x32xf32>
    %cst_19 = arith.constant dense<0.000000e+00> : vector<2x32xf32>
    %26 = tpu.matmul %24, %8, %cst_19 {dimension_numbers = #tpu.dot_dimension_numbers<[1], [0], [0], [1], [0, 0, 1, 1], [], []>} : vector<2x32xf32>, vector<32x32xf32>, vector<2x32xf32> -> vector<2x32xf32>
    %27 = vector.shape_cast %25 : vector<2x32xf32> to vector<2x1x32xf32>
    %28 = vector.broadcast %27 : vector<2x1x32xf32> to vector<2x64x32xf32>
    %29 = arith.subf %2, %28 : vector<2x64x32xf32>
    %30 = vector.shape_cast %26 : vector<2x32xf32> to vector<2x1x32xf32>
    %31 = vector.broadcast %30 : vector<2x1x32xf32> to vector<2x64x32xf32>
    %32 = arith.mulf %29, %31 : vector<2x64x32xf32>
    %33 = vector.broadcast %4 : vector<1x1x32xf32> to vector<2x64x32xf32>
    %34 = arith.mulf %32, %33 : vector<2x64x32xf32>
    %35 = vector.broadcast %6 : vector<1x1x32xf32> to vector<2x64x32xf32>
    %36 = arith.addf %34, %35 : vector<2x64x32xf32>
    %cst_20 = arith.constant 5.000000e-01 : f32
    %37 = vector.broadcast %cst_20 : f32 to vector<2x64x32xf32>
    %38 = arith.mulf %37, %36 : vector<2x64x32xf32>
    %39 = math.tanh %38 : vector<2x64x32xf32>
    %cst_21 = arith.constant 5.000000e-01 : f32
    %40 = vector.broadcast %cst_21 : f32 to vector<2x64x32xf32>
    %41 = arith.mulf %40, %39 : vector<2x64x32xf32>
    %cst_22 = arith.constant 5.000000e-01 : f32
    %42 = vector.broadcast %cst_22 : f32 to vector<2x64x32xf32>
    %43 = arith.addf %41, %42 : vector<2x64x32xf32>
    %44 = arith.mulf %36, %43 : vector<2x64x32xf32>
    %45 = vector.shape_cast %44 : vector<2x64x32xf32> to vector<2x8x8x32xf32>
    %46 = arith.truncf %45 : vector<2x8x8x32xf32> to vector<2x8x8x32xbf16>
    %cst_23 = arith.constant 0.000000e+00 : bf16
    %47 = vector.broadcast %cst_23 : bf16 to vector<2x1x10x32xbf16>
    %c0_24 = arith.constant 0 : index
    %c0_25 = arith.constant 0 : index
    %c0_26 = arith.constant 0 : index
    %c0_27 = arith.constant 0 : index
    %48 = vector.load %arg17[%c0_24, %c0_25, %c0_26, %c0_27] : memref<2x10x10x32xbf16, #tpu.memory_space<vmem>>, vector<2x1x10x32xbf16>
    tpu.vector_store %arg17[%c0_24, %c0_25, %c0_26, %c0_27], %47 {strides = array<i32>} : memref<2x10x10x32xbf16, #tpu.memory_space<vmem>>, vector<2x1x10x32xbf16>,
    %c0_28 = arith.constant 0 : index
    %c9 = arith.constant 9 : index
    %c0_29 = arith.constant 0 : index
    %c0_30 = arith.constant 0 : index
    %49 = vector.load %arg17[%c0_28, %c9, %c0_29, %c0_30] : memref<2x10x10x32xbf16, #tpu.memory_space<vmem>>, vector<2x1x10x32xbf16>
    tpu.vector_store %arg17[%c0_28, %c9, %c0_29, %c0_30], %47 {strides = array<i32>} : memref<2x10x10x32xbf16, #tpu.memory_space<vmem>>, vector<2x1x10x32xbf16>,
    %cst_31 = arith.constant 0.000000e+00 : bf16
    %50 = vector.broadcast %cst_31 : bf16 to vector<2x8x1x32xbf16>
    %c0_32 = arith.constant 0 : index
    %c1 = arith.constant 1 : index
    %c0_33 = arith.constant 0 : index
    %c0_34 = arith.constant 0 : index
    %51 = vector.load %arg17[%c0_32, %c1, %c0_33, %c0_34] : memref<2x10x10x32xbf16, #tpu.memory_space<vmem>>, vector<2x8x1x32xbf16>
    tpu.vector_store %arg17[%c0_32, %c1, %c0_33, %c0_34], %50 {strides = array<i32>} : memref<2x10x10x32xbf16, #tpu.memory_space<vmem>>, vector<2x8x1x32xbf16>,
    %c0_35 = arith.constant 0 : index
    %c1_36 = arith.constant 1 : index
    %c9_37 = arith.constant 9 : index
    %c0_38 = arith.constant 0 : index
    %52 = vector.load %arg17[%c0_35, %c1_36, %c9_37, %c0_38] : memref<2x10x10x32xbf16, #tpu.memory_space<vmem>>, vector<2x8x1x32xbf16>
    tpu.vector_store %arg17[%c0_35, %c1_36, %c9_37, %c0_38], %50 {strides = array<i32>} : memref<2x10x10x32xbf16, #tpu.memory_space<vmem>>, vector<2x8x1x32xbf16>,
    %c0_39 = arith.constant 0 : index
    %c1_40 = arith.constant 1 : index
    %c1_41 = arith.constant 1 : index
    %c0_42 = arith.constant 0 : index
    %53 = vector.load %arg17[%c0_39, %c1_40, %c1_41, %c0_42] : memref<2x10x10x32xbf16, #tpu.memory_space<vmem>>, vector<2x8x8x32xbf16>
    tpu.vector_store %arg17[%c0_39, %c1_40, %c1_41, %c0_42], %46 {strides = array<i32>} : memref<2x10x10x32xbf16, #tpu.memory_space<vmem>>, vector<2x8x8x32xbf16>,
    %c0_43 = arith.constant 0 : index
    %c0_44 = arith.constant 0 : index
    %54 = vector.load %arg7[%c0_43, %c0_44] : memref<1x64xf32, #tpu.memory_space<vmem>>, vector<1x64xf32>
    %c0_45 = arith.constant 0 : index
    %c0_46 = arith.constant 0 : index
    %c0_47 = arith.constant 0 : index
    %c0_48 = arith.constant 0 : index
    %55 = vector.load %arg17[%c0_45, %c0_46, %c0_47, %c0_48] : memref<2x10x10x32xbf16, #tpu.memory_space<vmem>>, vector<2x10x8x32xbf16>
    %c0_49 = arith.constant 0 : index
    %c0_50 = arith.constant 0 : index
    %c1_51 = arith.constant 1 : index
    %c0_52 = arith.constant 0 : index
    %56 = vector.load %arg17[%c0_49, %c0_50, %c1_51, %c0_52] : memref<2x10x10x32xbf16, #tpu.memory_space<vmem>>, vector<2x10x8x32xbf16>
    %c0_53 = arith.constant 0 : index
    %c0_54 = arith.constant 0 : index
    %c2 = arith.constant 2 : index
    %c0_55 = arith.constant 0 : index
    %57 = vector.load %arg17[%c0_53, %c0_54, %c2, %c0_55] : memref<2x10x10x32xbf16, #tpu.memory_space<vmem>>, vector<2x10x8x32xbf16>
    %58 = tpu.concatenate %55, %56, %57 in 3 : vector<2x10x8x32xbf16>, vector<2x10x8x32xbf16>, vector<2x10x8x32xbf16> -> vector<2x10x8x96xbf16>
    %59 = vector.extract_strided_slice %58 {offsets = [0, 0, 0, 0], sizes = [2, 8, 8, 96], strides = [1, 1, 1, 1]} : vector<2x10x8x96xbf16> to vector<2x8x8x96xbf16>
    %60 = vector.shape_cast %59 : vector<2x8x8x96xbf16> to vector<128x96xbf16>
    %c0_56 = arith.constant 0 : index
    %c0_57 = arith.constant 0 : index
    %c0_58 = arith.constant 0 : index
    %61 = vector.load %arg6[%c0_56, %c0_57, %c0_58] : memref<3x96x64xbf16, #tpu.memory_space<vmem>>, vector<1x96x64xbf16>
    %62 = vector.shape_cast %61 : vector<1x96x64xbf16> to vector<96x64xbf16>
    %cst_59 = arith.constant dense<0.000000e+00> : vector<128x64xf32>
    %63 = tpu.matmul %60, %62, %cst_59 {dimension_numbers = #tpu.dot_dimension_numbers<[1], [0], [0], [1], [0, 0, 1, 1], [], []>} : vector<128x96xbf16>, vector<96x64xbf16>, vector<128x64xf32> -> vector<128x64xf32>
    %64 = vector.broadcast %54 : vector<1x64xf32> to vector<128x64xf32>
    %65 = arith.addf %63, %64 : vector<128x64xf32>
    %66 = vector.extract_strided_slice %58 {offsets = [0, 1, 0, 0], sizes = [2, 8, 8, 96], strides = [1, 1, 1, 1]} : vector<2x10x8x96xbf16> to vector<2x8x8x96xbf16>
    %67 = vector.shape_cast %66 : vector<2x8x8x96xbf16> to vector<128x96xbf16>
    %c1_60 = arith.constant 1 : index
    %c0_61 = arith.constant 0 : index
    %c0_62 = arith.constant 0 : index
    %68 = vector.load %arg6[%c1_60, %c0_61, %c0_62] : memref<3x96x64xbf16, #tpu.memory_space<vmem>>, vector<1x96x64xbf16>
    %69 = vector.shape_cast %68 : vector<1x96x64xbf16> to vector<96x64xbf16>
    %cst_63 = arith.constant dense<0.000000e+00> : vector<128x64xf32>
    %70 = tpu.matmul %67, %69, %cst_63 {dimension_numbers = #tpu.dot_dimension_numbers<[1], [0], [0], [1], [0, 0, 1, 1], [], []>} : vector<128x96xbf16>, vector<96x64xbf16>, vector<128x64xf32> -> vector<128x64xf32>
    %71 = arith.addf %65, %70 : vector<128x64xf32>
    %72 = vector.extract_strided_slice %58 {offsets = [0, 2, 0, 0], sizes = [2, 8, 8, 96], strides = [1, 1, 1, 1]} : vector<2x10x8x96xbf16> to vector<2x8x8x96xbf16>
    %73 = vector.shape_cast %72 : vector<2x8x8x96xbf16> to vector<128x96xbf16>
    %c2_64 = arith.constant 2 : index
    %c0_65 = arith.constant 0 : index
    %c0_66 = arith.constant 0 : index
    %74 = vector.load %arg6[%c2_64, %c0_65, %c0_66] : memref<3x96x64xbf16, #tpu.memory_space<vmem>>, vector<1x96x64xbf16>
    %75 = vector.shape_cast %74 : vector<1x96x64xbf16> to vector<96x64xbf16>
    %cst_67 = arith.constant dense<0.000000e+00> : vector<128x64xf32>
    %76 = tpu.matmul %73, %75, %cst_67 {dimension_numbers = #tpu.dot_dimension_numbers<[1], [0], [0], [1], [0, 0, 1, 1], [], []>} : vector<128x96xbf16>, vector<96x64xbf16>, vector<128x64xf32> -> vector<128x64xf32>
    %77 = arith.addf %71, %76 : vector<128x64xf32>
    %c0_68 = arith.constant 0 : index
    %c0_69 = arith.constant 0 : index
    %78 = vector.load %arg10[%c0_68, %c0_69] : memref<1x64xf32, #tpu.memory_space<vmem>>, vector<1x64xf32>
    %79 = vector.shape_cast %78 : vector<1x64xf32> to vector<1x1x64xf32>
    %c0_70 = arith.constant 0 : index
    %c0_71 = arith.constant 0 : index
    %80 = vector.load %arg11[%c0_70, %c0_71] : memref<1x64xf32, #tpu.memory_space<vmem>>, vector<1x64xf32>
    %81 = vector.shape_cast %80 : vector<1x64xf32> to vector<1x1x64xf32>
    %82 = vector.shape_cast %77 : vector<128x64xf32> to vector<2x64x64xf32>
    %c0_72 = arith.constant 0 : index
    %c0_73 = arith.constant 0 : index
    %83 = vector.load %arg8[%c0_72, %c0_73] : memref<64x32xf32, #tpu.memory_space<vmem>>, vector<64x32xf32>
    %c0_74 = arith.constant 0 : index
    %c0_75 = arith.constant 0 : index
    %84 = vector.load %arg9[%c0_74, %c0_75] : memref<32x64xf32, #tpu.memory_space<vmem>>, vector<32x64xf32>
    %cst_76 = arith.constant dense<0.000000e+00> : vector<2x64xf32>
    %85 = vector.multi_reduction <add>, %82, %cst_76 [1] : vector<2x64x64xf32> to vector<2x64xf32>
    %86 = arith.mulf %82, %82 : vector<2x64x64xf32>
    %cst_77 = arith.constant dense<0.000000e+00> : vector<2x64xf32>
    %87 = vector.multi_reduction <add>, %86, %cst_77 [1] : vector<2x64x64xf32> to vector<2x64xf32>
    %cst_78 = arith.constant dense<0.000000e+00> : vector<2x32xf32>
    %88 = tpu.matmul %85, %83, %cst_78 {dimension_numbers = #tpu.dot_dimension_numbers<[1], [0], [0], [1], [0, 0, 1, 1], [], []>} : vector<2x64xf32>, vector<64x32xf32>, vector<2x32xf32> -> vector<2x32xf32>
    %cst_79 = arith.constant 7.812500e-03 : f32
    %89 = vector.broadcast %cst_79 : f32 to vector<2x32xf32>
    %90 = arith.mulf %88, %89 : vector<2x32xf32>
    %cst_80 = arith.constant dense<0.000000e+00> : vector<2x32xf32>
    %91 = tpu.matmul %87, %83, %cst_80 {dimension_numbers = #tpu.dot_dimension_numbers<[1], [0], [0], [1], [0, 0, 1, 1], [], []>} : vector<2x64xf32>, vector<64x32xf32>, vector<2x32xf32> -> vector<2x32xf32>
    %cst_81 = arith.constant 7.812500e-03 : f32
    %92 = vector.broadcast %cst_81 : f32 to vector<2x32xf32>
    %93 = arith.mulf %91, %92 : vector<2x32xf32>
    %94 = arith.mulf %90, %90 : vector<2x32xf32>
    %95 = arith.subf %93, %94 : vector<2x32xf32>
    %cst_82 = arith.constant 0.000000e+00 : f32
    %96 = vector.broadcast %cst_82 : f32 to vector<2x32xf32>
    %97 = arith.maximumf %95, %96 : vector<2x32xf32>
    %cst_83 = arith.constant 9.99999974E-6 : f32
    %98 = vector.broadcast %cst_83 : f32 to vector<2x32xf32>
    %99 = arith.addf %97, %98 : vector<2x32xf32>
    %100 = math.rsqrt %99 : vector<2x32xf32>
    %cst_84 = arith.constant dense<0.000000e+00> : vector<2x64xf32>
    %101 = tpu.matmul %90, %84, %cst_84 {dimension_numbers = #tpu.dot_dimension_numbers<[1], [0], [0], [1], [0, 0, 1, 1], [], []>} : vector<2x32xf32>, vector<32x64xf32>, vector<2x64xf32> -> vector<2x64xf32>
    %cst_85 = arith.constant dense<0.000000e+00> : vector<2x64xf32>
    %102 = tpu.matmul %100, %84, %cst_85 {dimension_numbers = #tpu.dot_dimension_numbers<[1], [0], [0], [1], [0, 0, 1, 1], [], []>} : vector<2x32xf32>, vector<32x64xf32>, vector<2x64xf32> -> vector<2x64xf32>
    %103 = vector.shape_cast %101 : vector<2x64xf32> to vector<2x1x64xf32>
    %104 = vector.broadcast %103 : vector<2x1x64xf32> to vector<2x64x64xf32>
    %105 = arith.subf %82, %104 : vector<2x64x64xf32>
    %106 = vector.shape_cast %102 : vector<2x64xf32> to vector<2x1x64xf32>
    %107 = vector.broadcast %106 : vector<2x1x64xf32> to vector<2x64x64xf32>
    %108 = arith.mulf %105, %107 : vector<2x64x64xf32>
    %109 = vector.broadcast %79 : vector<1x1x64xf32> to vector<2x64x64xf32>
    %110 = arith.mulf %108, %109 : vector<2x64x64xf32>
    %111 = vector.broadcast %81 : vector<1x1x64xf32> to vector<2x64x64xf32>
    %112 = arith.addf %110, %111 : vector<2x64x64xf32>
    %cst_86 = arith.constant 5.000000e-01 : f32
    %113 = vector.broadcast %cst_86 : f32 to vector<2x64x64xf32>
    %114 = arith.mulf %113, %112 : vector<2x64x64xf32>
    %115 = math.tanh %114 : vector<2x64x64xf32>
    %cst_87 = arith.constant 5.000000e-01 : f32
    %116 = vector.broadcast %cst_87 : f32 to vector<2x64x64xf32>
    %117 = arith.mulf %116, %115 : vector<2x64x64xf32>
    %cst_88 = arith.constant 5.000000e-01 : f32
    %118 = vector.broadcast %cst_88 : f32 to vector<2x64x64xf32>
    %119 = arith.addf %117, %118 : vector<2x64x64xf32>
    %120 = arith.mulf %112, %119 : vector<2x64x64xf32>
    %121 = vector.shape_cast %120 : vector<2x64x64xf32> to vector<2x8x8x64xf32>
    %122 = arith.truncf %121 : vector<2x8x8x64xf32> to vector<2x8x8x64xbf16>
    %cst_89 = arith.constant 0.000000e+00 : bf16
    %123 = vector.broadcast %cst_89 : bf16 to vector<2x1x10x64xbf16>
    %c0_90 = arith.constant 0 : index
    %c0_91 = arith.constant 0 : index
    %c0_92 = arith.constant 0 : index
    %c0_93 = arith.constant 0 : index
    %124 = vector.load %arg18[%c0_90, %c0_91, %c0_92, %c0_93] : memref<2x10x10x64xbf16, #tpu.memory_space<vmem>>, vector<2x1x10x64xbf16>
    tpu.vector_store %arg18[%c0_90, %c0_91, %c0_92, %c0_93], %123 {strides = array<i32>} : memref<2x10x10x64xbf16, #tpu.memory_space<vmem>>, vector<2x1x10x64xbf16>,
    %c0_94 = arith.constant 0 : index
    %c9_95 = arith.constant 9 : index
    %c0_96 = arith.constant 0 : index
    %c0_97 = arith.constant 0 : index
    %125 = vector.load %arg18[%c0_94, %c9_95, %c0_96, %c0_97] : memref<2x10x10x64xbf16, #tpu.memory_space<vmem>>, vector<2x1x10x64xbf16>
    tpu.vector_store %arg18[%c0_94, %c9_95, %c0_96, %c0_97], %123 {strides = array<i32>} : memref<2x10x10x64xbf16, #tpu.memory_space<vmem>>, vector<2x1x10x64xbf16>,
    %cst_98 = arith.constant 0.000000e+00 : bf16
    %126 = vector.broadcast %cst_98 : bf16 to vector<2x8x1x64xbf16>
    %c0_99 = arith.constant 0 : index
    %c1_100 = arith.constant 1 : index
    %c0_101 = arith.constant 0 : index
    %c0_102 = arith.constant 0 : index
    %127 = vector.load %arg18[%c0_99, %c1_100, %c0_101, %c0_102] : memref<2x10x10x64xbf16, #tpu.memory_space<vmem>>, vector<2x8x1x64xbf16>
    tpu.vector_store %arg18[%c0_99, %c1_100, %c0_101, %c0_102], %126 {strides = array<i32>} : memref<2x10x10x64xbf16, #tpu.memory_space<vmem>>, vector<2x8x1x64xbf16>,
    %c0_103 = arith.constant 0 : index
    %c1_104 = arith.constant 1 : index
    %c9_105 = arith.constant 9 : index
    %c0_106 = arith.constant 0 : index
    %128 = vector.load %arg18[%c0_103, %c1_104, %c9_105, %c0_106] : memref<2x10x10x64xbf16, #tpu.memory_space<vmem>>, vector<2x8x1x64xbf16>
    tpu.vector_store %arg18[%c0_103, %c1_104, %c9_105, %c0_106], %126 {strides = array<i32>} : memref<2x10x10x64xbf16, #tpu.memory_space<vmem>>, vector<2x8x1x64xbf16>,
    %c0_107 = arith.constant 0 : index
    %c1_108 = arith.constant 1 : index
    %c1_109 = arith.constant 1 : index
    %c0_110 = arith.constant 0 : index
    %129 = vector.load %arg18[%c0_107, %c1_108, %c1_109, %c0_110] : memref<2x10x10x64xbf16, #tpu.memory_space<vmem>>, vector<2x8x8x64xbf16>
    tpu.vector_store %arg18[%c0_107, %c1_108, %c1_109, %c0_110], %122 {strides = array<i32>} : memref<2x10x10x64xbf16, #tpu.memory_space<vmem>>, vector<2x8x8x64xbf16>,
    %c0_111 = arith.constant 0 : index
    %c0_112 = arith.constant 0 : index
    %130 = vector.load %arg13[%c0_111, %c0_112] : memref<1x64xf32, #tpu.memory_space<vmem>>, vector<1x64xf32>
    %c0_113 = arith.constant 0 : index
    %c0_114 = arith.constant 0 : index
    %c0_115 = arith.constant 0 : index
    %c0_116 = arith.constant 0 : index
    %131 = vector.load %arg18[%c0_113, %c0_114, %c0_115, %c0_116] : memref<2x10x10x64xbf16, #tpu.memory_space<vmem>>, vector<2x10x8x64xbf16>
    %c0_117 = arith.constant 0 : index
    %c0_118 = arith.constant 0 : index
    %c1_119 = arith.constant 1 : index
    %c0_120 = arith.constant 0 : index
    %132 = vector.load %arg18[%c0_117, %c0_118, %c1_119, %c0_120] : memref<2x10x10x64xbf16, #tpu.memory_space<vmem>>, vector<2x10x8x64xbf16>
    %c0_121 = arith.constant 0 : index
    %c0_122 = arith.constant 0 : index
    %c2_123 = arith.constant 2 : index
    %c0_124 = arith.constant 0 : index
    %133 = vector.load %arg18[%c0_121, %c0_122, %c2_123, %c0_124] : memref<2x10x10x64xbf16, #tpu.memory_space<vmem>>, vector<2x10x8x64xbf16>
    %134 = tpu.concatenate %131, %132, %133 in 3 : vector<2x10x8x64xbf16>, vector<2x10x8x64xbf16>, vector<2x10x8x64xbf16> -> vector<2x10x8x192xbf16>
    %135 = vector.extract_strided_slice %134 {offsets = [0, 0, 0, 0], sizes = [2, 8, 8, 192], strides = [1, 1, 1, 1]} : vector<2x10x8x192xbf16> to vector<2x8x8x192xbf16>
    %136 = vector.shape_cast %135 : vector<2x8x8x192xbf16> to vector<128x192xbf16>
    %c0_125 = arith.constant 0 : index
    %c0_126 = arith.constant 0 : index
    %c0_127 = arith.constant 0 : index
    %137 = vector.load %arg12[%c0_125, %c0_126, %c0_127] : memref<3x192x64xbf16, #tpu.memory_space<vmem>>, vector<1x192x64xbf16>
    %138 = vector.shape_cast %137 : vector<1x192x64xbf16> to vector<192x64xbf16>
    %cst_128 = arith.constant dense<0.000000e+00> : vector<128x64xf32>
    %139 = tpu.matmul %136, %138, %cst_128 {dimension_numbers = #tpu.dot_dimension_numbers<[1], [0], [0], [1], [0, 0, 1, 1], [], []>} : vector<128x192xbf16>, vector<192x64xbf16>, vector<128x64xf32> -> vector<128x64xf32>
    %140 = vector.broadcast %130 : vector<1x64xf32> to vector<128x64xf32>
    %141 = arith.addf %139, %140 : vector<128x64xf32>
    %142 = vector.extract_strided_slice %134 {offsets = [0, 1, 0, 0], sizes = [2, 8, 8, 192], strides = [1, 1, 1, 1]} : vector<2x10x8x192xbf16> to vector<2x8x8x192xbf16>
    %143 = vector.shape_cast %142 : vector<2x8x8x192xbf16> to vector<128x192xbf16>
    %c1_129 = arith.constant 1 : index
    %c0_130 = arith.constant 0 : index
    %c0_131 = arith.constant 0 : index
    %144 = vector.load %arg12[%c1_129, %c0_130, %c0_131] : memref<3x192x64xbf16, #tpu.memory_space<vmem>>, vector<1x192x64xbf16>
    %145 = vector.shape_cast %144 : vector<1x192x64xbf16> to vector<192x64xbf16>
    %cst_132 = arith.constant dense<0.000000e+00> : vector<128x64xf32>
    %146 = tpu.matmul %143, %145, %cst_132 {dimension_numbers = #tpu.dot_dimension_numbers<[1], [0], [0], [1], [0, 0, 1, 1], [], []>} : vector<128x192xbf16>, vector<192x64xbf16>, vector<128x64xf32> -> vector<128x64xf32>
    %147 = arith.addf %141, %146 : vector<128x64xf32>
    %148 = vector.extract_strided_slice %134 {offsets = [0, 2, 0, 0], sizes = [2, 8, 8, 192], strides = [1, 1, 1, 1]} : vector<2x10x8x192xbf16> to vector<2x8x8x192xbf16>
    %149 = vector.shape_cast %148 : vector<2x8x8x192xbf16> to vector<128x192xbf16>
    %c2_133 = arith.constant 2 : index
    %c0_134 = arith.constant 0 : index
    %c0_135 = arith.constant 0 : index
    %150 = vector.load %arg12[%c2_133, %c0_134, %c0_135] : memref<3x192x64xbf16, #tpu.memory_space<vmem>>, vector<1x192x64xbf16>
    %151 = vector.shape_cast %150 : vector<1x192x64xbf16> to vector<192x64xbf16>
    %cst_136 = arith.constant dense<0.000000e+00> : vector<128x64xf32>
    %152 = tpu.matmul %149, %151, %cst_136 {dimension_numbers = #tpu.dot_dimension_numbers<[1], [0], [0], [1], [0, 0, 1, 1], [], []>} : vector<128x192xbf16>, vector<192x64xbf16>, vector<128x64xf32> -> vector<128x64xf32>
    %153 = arith.addf %147, %152 : vector<128x64xf32>
    %154 = vector.shape_cast %0 : vector<2x8x8x32xbf16> to vector<128x32xbf16>
    %c0_137 = arith.constant 0 : index
    %c0_138 = arith.constant 0 : index
    %155 = vector.load %arg14[%c0_137, %c0_138] : memref<32x64xbf16, #tpu.memory_space<vmem>>, vector<32x64xbf16>
    %cst_139 = arith.constant dense<0.000000e+00> : vector<128x64xf32>
    %156 = tpu.matmul %154, %155, %cst_139 {dimension_numbers = #tpu.dot_dimension_numbers<[1], [0], [0], [1], [0, 0, 1, 1], [], []>} : vector<128x32xbf16>, vector<32x64xbf16>, vector<128x64xf32> -> vector<128x64xf32>
    %c0_140 = arith.constant 0 : index
    %c0_141 = arith.constant 0 : index
    %157 = vector.load %arg15[%c0_140, %c0_141] : memref<1x64xf32, #tpu.memory_space<vmem>>, vector<1x64xf32>
    %158 = vector.broadcast %157 : vector<1x64xf32> to vector<128x64xf32>
    %159 = arith.addf %156, %158 : vector<128x64xf32>
    %160 = arith.addf %153, %159 : vector<128x64xf32>
    %161 = vector.shape_cast %160 : vector<128x64xf32> to vector<2x8x8x64xf32>
    %162 = arith.truncf %161 : vector<2x8x8x64xf32> to vector<2x8x8x64xbf16>
    %c0_142 = arith.constant 0 : index
    %c0_143 = arith.constant 0 : index
    %c0_144 = arith.constant 0 : index
    %c0_145 = arith.constant 0 : index
    %163 = vector.load %arg16[%c0_142, %c0_143, %c0_144, %c0_145] : memref<2x8x8x64xbf16, #tpu.memory_space<vmem>>, vector<2x8x8x64xbf16>
    tpu.vector_store %arg16[%c0_142, %c0_143, %c0_144, %c0_145], %162 {strides = array<i32>} : memref<2x8x8x64xbf16, #tpu.memory_space<vmem>>, vector<2x8x8x64xbf16>,
    return
  }
  func.func @transform_0(%arg0: i32) -> (i32, i32, i32, i32) {
    %c0_i32 = arith.constant 0 : i32
    %c0_i32_0 = arith.constant 0 : i32
    %c0_i32_1 = arith.constant 0 : i32
    %c0_i32_2 = arith.constant 0 : i32
    return %arg0, %c0_i32, %c0_i32_0, %c0_i32_1 : i32, i32, i32, i32
  }
  func.func @transform_1(%arg0: i32) -> (i32, i32) {
    %c0_i32 = arith.constant 0 : i32
    %c0_i32_0 = arith.constant 0 : i32
    %c0_i32_1 = arith.constant 0 : i32
    return %c0_i32, %c0_i32_0 : i32, i32
  }
  func.func @transform_2(%arg0: i32) -> (i32, i32) {
    %c0_i32 = arith.constant 0 : i32
    %c0_i32_0 = arith.constant 0 : i32
    %c0_i32_1 = arith.constant 0 : i32
    return %c0_i32, %c0_i32_0 : i32, i32
  }
  func.func @transform_3(%arg0: i32) -> (i32, i32) {
    %c0_i32 = arith.constant 0 : i32
    %c0_i32_0 = arith.constant 0 : i32
    %c0_i32_1 = arith.constant 0 : i32
    return %c0_i32, %c0_i32_0 : i32, i32
  }
  func.func @transform_4(%arg0: i32) -> (i32, i32) {
    %c0_i32 = arith.constant 0 : i32
    %c0_i32_0 = arith.constant 0 : i32
    %c0_i32_1 = arith.constant 0 : i32
    return %c0_i32, %c0_i32_0 : i32, i32
  }
  func.func @transform_5(%arg0: i32) -> (i32, i32, i32) {
    %c0_i32 = arith.constant 0 : i32
    %c0_i32_0 = arith.constant 0 : i32
    %c0_i32_1 = arith.constant 0 : i32
    %c0_i32_2 = arith.constant 0 : i32
    return %c0_i32, %c0_i32_0, %c0_i32_1 : i32, i32, i32
  }
  func.func @transform_6(%arg0: i32) -> (i32, i32) {
    %c0_i32 = arith.constant 0 : i32
    %c0_i32_0 = arith.constant 0 : i32
    %c0_i32_1 = arith.constant 0 : i32
    return %c0_i32, %c0_i32_0 : i32, i32
  }
  func.func @transform_7(%arg0: i32) -> (i32, i32) {
    %c0_i32 = arith.constant 0 : i32
    %c0_i32_0 = arith.constant 0 : i32
    %c0_i32_1 = arith.constant 0 : i32
    return %c0_i32, %c0_i32_0 : i32, i32
  }
  func.func @transform_8(%arg0: i32) -> (i32, i32) {
    %c0_i32 = arith.constant 0 : i32
    %c0_i32_0 = arith.constant 0 : i32
    %c0_i32_1 = arith.constant 0 : i32
    return %c0_i32, %c0_i32_0 : i32, i32
  }
  func.func @transform_9(%arg0: i32) -> (i32, i32) {
    %c0_i32 = arith.constant 0 : i32
    %c0_i32_0 = arith.constant 0 : i32
    %c0_i32_1 = arith.constant 0 : i32
    return %c0_i32, %c0_i32_0 : i32, i32
  }
  func.func @transform_10(%arg0: i32) -> (i32, i32) {
    %c0_i32 = arith.constant 0 : i32
    %c0_i32_0 = arith.constant 0 : i32
    %c0_i32_1 = arith.constant 0 : i32
    return %c0_i32, %c0_i32_0 : i32, i32
  }
  func.func @transform_11(%arg0: i32) -> (i32, i32, i32) {
    %c0_i32 = arith.constant 0 : i32
    %c0_i32_0 = arith.constant 0 : i32
    %c0_i32_1 = arith.constant 0 : i32
    %c0_i32_2 = arith.constant 0 : i32
    return %c0_i32, %c0_i32_0, %c0_i32_1 : i32, i32, i32
  }
  func.func @transform_12(%arg0: i32) -> (i32, i32) {
    %c0_i32 = arith.constant 0 : i32
    %c0_i32_0 = arith.constant 0 : i32
    %c0_i32_1 = arith.constant 0 : i32
    return %c0_i32, %c0_i32_0 : i32, i32
  }
  func.func @transform_13(%arg0: i32) -> (i32, i32) {
    %c0_i32 = arith.constant 0 : i32
    %c0_i32_0 = arith.constant 0 : i32
    %c0_i32_1 = arith.constant 0 : i32
    return %c0_i32, %c0_i32_0 : i32, i32
  }
  func.func @transform_14(%arg0: i32) -> (i32, i32) {
    %c0_i32 = arith.constant 0 : i32
    %c0_i32_0 = arith.constant 0 : i32
    %c0_i32_1 = arith.constant 0 : i32
    return %c0_i32, %c0_i32_0 : i32, i32
  }
  func.func @transform_15(%arg0: i32) -> (i32, i32, i32, i32) {
    %c0_i32 = arith.constant 0 : i32
    %c0_i32_0 = arith.constant 0 : i32
    %c0_i32_1 = arith.constant 0 : i32
    %c0_i32_2 = arith.constant 0 : i32
    return %arg0, %c0_i32, %c0_i32_0, %c0_i32_1 : i32, i32, i32, i32
  }
}

</mosaic_0001>

<bundles_post_ra>
// kernel: tpu_custom_call.1
= control target key start
LH: loop header
LB: loop body
LE: loop exit
PB: predicated region body
PF: predicated region fallthrough
CT: control target
= control target key end

     0   :  { %v6035_v3 = vmov 0.0|0.0   ;;  %vm94_vm0 = vcmask 261120   ;;  %vm6036_vm1 = vmmov 0   ;;  %v6037_v9 = vmov 0.0   ;;  %s8402_s0 = inlined_call_operand.vmem [shape: bf16[2,8,8,32], index: 0, kind: input, shape index: {}]   ;;  %s8403_s1 = inlined_call_operand.vmem [shape: f32[32,32], index: 1, kind: input, shape index: {}]   ;;  %s8404_s2 = inlined_call_operand.vmem [shape: f32[32,32], index: 2, kind: input, shape index: {}]   ;;  %s8405_s3 = inlined_call_operand.vmem [shape: f32[1,32], index: 3, kind: input, shape index: {}]   ;;  %s8406_s4 = inlined_call_operand.vmem [shape: f32[1,32], index: 4, kind: input, shape index: {}]   ;;  %s8407_s5 = inlined_call_operand.vmem [shape: bf16[3,96,64], index: 5, kind: input, shape index: {}]   ;;  %s8408_s6 = inlined_call_operand.vmem [shape: f32[1,64], index: 6, kind: input, shape index: {}]   ;;  %s8409_s7 = inlined_call_operand.vmem [shape: f32[64,32], index: 7, kind: input, shape index: {}]   ;;  %s8410_s8 = inlined_call_operand.vmem [shape: f32[32,64], index: 8, kind: input, shape index: {}]   ;;  %s8411_s9 = inlined_call_operand.vmem [shape: f32[1,64], index: 9, kind: input, shape index: {}]   ;;  %s8412_s10 = inlined_call_operand.vmem [shape: f32[1,64], index: 10, kind: input, shape index: {}]   ;;  %s8413_s11 = inlined_call_operand.vmem [shape: bf16[3,192,64], index: 11, kind: input, shape index: {}]   ;;  %s8414_s12 = inlined_call_operand.vmem [shape: f32[1,64], index: 12, kind: input, shape index: {}]   ;;  %s8415_s13 = inlined_call_operand.vmem [shape: bf16[32,64], index: 13, kind: input, shape index: {}]   ;;  %s8416_s14 = inlined_call_operand.vmem [shape: f32[1,64], index: 14, kind: input, shape index: {}]   ;;  %s8417_s15 = inlined_call_operand.hbm [shape: bf16[2,8,8,64], index: 15, kind: output, shape index: {}]  }
   0x1   :  { %v86_v0 = vld [vmem:[%s8403_s1] sm:$0xff]  ;;  %v87_v1 = vld [vmem:[%s8403_s1 + $0x8] sm:$0xff]  ;;  %v88_v2 = vld [vmem:[%s8403_s1 + $0x10] sm:$0xff]  ;;  %5607 = vmatprep.subr.bf16.mxu0 %v6035_v3  ;;  %5613 = vmatprep.subr.bf16.mxu1 %v6035_v3  ;;  %vm197_vm2 = vcmask 1041409  }
   0x2   :  { %v5608_v4 = vpack.c.bf16 %v87_v1, %v86_v0  ;;  %v89_v5 = vld [vmem:[%s8403_s1 + $0x18] sm:$0xff]  ;;  %v52_v6 = vld [vmem:[%s8402_s0] sm:$0xff]   ;;  %v54_v7 = vld [vmem:[%s8402_s0 + $0x8] sm:$0xff]   ;;  %5407 = vmatprep.mubr.msk.f32.mxu0 %vm6036_vm1, %v6037_v9  ;;  %5418 = vmatprep.mubr.msk.f32.mxu1 %vm6036_vm1, %v6037_v9 }
   0x3   :  { %v5611_v8 = vpack.c.bf16 %v89_v5, %v88_v2  ;;  %v56_v10 = vld [vmem:[%s8402_s0 + $0x10] sm:$0xff]   ;;  %v58_v11 = vld [vmem:[%s8402_s0 + $0x18] sm:$0xff]   ;;  %v60_v12 = vld [vmem:[%s8402_s0 + $0x20] sm:$0xff]   ;;  %v6155_v13 = vunpack.c.l.bf16 %v52_v6  ;;  %v6157_v14 = vunpack.c.h.bf16 %v52_v6  ;;  %v6159_v15 = vunpack.c.l.bf16 %v54_v7 }
   0x4   :  { %5609 = vmatpush3.bf16.msra.mxu0 %v5608_v4  ;;  %5615 = vmatpush3.bf16.msra.mxu1 %v5608_v4  ;;  %v62_v16 = vld [vmem:[%s8402_s0 + $0x28] sm:$0xff]   ;;  %v64_v17 = vld [vmem:[%s8402_s0 + $0x30] sm:$0xff]   ;;  %v66_v18 = vld [vmem:[%s8402_s0 + $0x38] sm:$0xff]   ;;  %v6172_v19 = vunpack.c.h.bf16 %v54_v7  ;;  %v6174_v20 = vunpack.c.l.bf16 %v56_v10  ;;  %v6176_v21 = vunpack.c.h.bf16 %v56_v10  ;;  %v6178_v22 = vunpack.c.l.bf16 %v58_v11 }
   0x5   :  { %5610 = vmatprep.subr.bf16.mxu0 %v6035_v3  ;;  %5616 = vmatprep.subr.bf16.mxu1 %v6035_v3  ;;  %v6182_v23 = vunpack.c.h.bf16 %v58_v11  ;;  %v6184_v24 = vunpack.c.l.bf16 %v60_v12  ;;  %v6186_v25 = vunpack.c.h.bf16 %v60_v12  ;;  %v6188_v26 = vunpack.c.l.bf16 %v62_v16 }
   0x6   :  { %v6190_v27 = vunpack.c.h.bf16 %v62_v16  ;;  %v6192_v28 = vunpack.c.l.bf16 %v64_v17  ;;  %v6194_v29 = vunpack.c.h.bf16 %v64_v17  ;;  %v6196_v30 = vunpack.c.l.bf16 %v66_v18 }
   0x7   :  { %v6198_v31 = vunpack.c.h.bf16 %v66_v18  ;;  %v95_v32 = vsel %vm94_vm0, %v6155_v13, 0.0  ;;  %v96_v33 = vsel %vm94_vm0, %v6157_v14, 0.0  ;;  %v98_v34 = vsel %vm94_vm0, %v6159_v15, 0.0 }
   0x8   :  { %5612 = vmatpush3.bf16.msra.mxu0 %v5611_v8  ;;  %5618 = vmatpush3.bf16.msra.mxu1 %v5611_v8  ;;  %v97_v35 = vadd.f32 %v96_v33, %v95_v32  ;;  %v100_v36 = vsel %vm94_vm0, %v6172_v19, 0.0  ;;  %v102_v37 = vsel %vm94_vm0, %v6174_v20, 0.0  ;;  %v104_v38 = vsel %vm94_vm0, %v6176_v21, 0.0 }
   0x9   :  { %v106_v39 = vsel %vm94_vm0, %v6178_v22, 0.0  ;;  %v108_v40 = vsel %vm94_vm0, %v6182_v23, 0.0  ;;  %v116_v41 = vsel %vm94_vm0, %v6184_v24, 0.0  ;;  %v117_v42 = vsel %vm94_vm0, %v6186_v25, 0.0  ;;  %5619 = vmatprep.subr.bf16.mxu0 %v6035_v3  ;;  %5625 = vmatprep.subr.bf16.mxu1 %v6035_v3 }
   0xa   :  { %v99_v43 = vadd.f32 %v98_v34, %v97_v35  ;;  %v118_v44 = vadd.f32 %v117_v42, %v116_v41  ;;  %v119_v45 = vsel %vm94_vm0, %v6188_v26, 0.0  ;;  %v121_v46 = vsel %vm94_vm0, %v6190_v27, 0.0 }
   0xb   :  { %v123_v47 = vsel %vm94_vm0, %v6192_v28, 0.0  ;;  %v125_v48 = vsel %vm94_vm0, %v6194_v29, 0.0  ;;  %v127_v49 = vsel %vm94_vm0, %v6196_v30, 0.0  ;;  %v129_v50 = vsel %vm94_vm0, %v6198_v31, 0.0 }
   0xc   :  { %v101_v51 = vadd.f32 %v100_v36, %v99_v43  ;;  %v120_v52 = vadd.f32 %v119_v45, %v118_v44  ;;  %v137_v53 = vmul.f32 %v6155_v13, %v6155_v13  ;;  %v138_v54 = vmul.f32 %v6157_v14, %v6157_v14 }
   0xd   :  { %v139_v55 = vmul.f32 %v6159_v15, %v6159_v15  ;;  %v140_v56 = vmul.f32 %v6172_v19, %v6172_v19  ;;  %v141_v57 = vmul.f32 %v6174_v20, %v6174_v20  ;;  %v142_v58 = vmul.f32 %v6176_v21, %v6176_v21 }
   0xe   :  { %v103_v59 = vadd.f32 %v102_v37, %v101_v51  ;;  %v122_v60 = vadd.f32 %v121_v46, %v120_v52  ;;  %v143_v61 = vmul.f32 %v6178_v22, %v6178_v22  ;;  %v144_v62 = vmul.f32 %v6182_v23, %v6182_v23 }
   0xf   :  { %v145_v63 = vmul.f32 %v6184_v24, %v6184_v24  ;;  %v146_v0 = vmul.f32 %v6186_v25, %v6186_v25  ;;  %v147_v1 = vmul.f32 %v6188_v26, %v6188_v26  ;;  %v148_v2 = vmul.f32 %v6190_v27, %v6190_v27 }
  0x10   :  { %v105_v4 = vadd.f32 %v104_v38, %v103_v59  ;;  %v124_v5 = vadd.f32 %v123_v47, %v122_v60  ;;  %v149_v6 = vmul.f32 %v6192_v28, %v6192_v28  ;;  %v150_v7 = vmul.f32 %v6194_v29, %v6194_v29 }
  0x11   :  { %v151_v8 = vmul.f32 %v6196_v30, %v6196_v30  ;;  %v152_v10 = vmul.f32 %v6198_v31, %v6198_v31  ;;  %v153_v11 = vsel %vm94_vm0, %v137_v53, 0.0  ;;  %v154_v12 = vsel %vm94_vm0, %v138_v54, 0.0 }
  0x12   :  { %v107_v16 = vadd.f32 %v106_v39, %v105_v4  ;;  %v126_v17 = vadd.f32 %v125_v48, %v124_v5  ;;  %v155_v18 = vadd.f32 %v154_v12, %v153_v11  ;;  %v156_v32 = vsel %vm94_vm0, %v139_v55, 0.0 }
  0x13   :  { %v158_v33 = vsel %vm94_vm0, %v140_v56, 0.0  ;;  %v160_v34 = vsel %vm94_vm0, %v141_v57, 0.0  ;;  %v162_v35 = vsel %vm94_vm0, %v142_v58, 0.0  ;;  %v164_v36 = vsel %vm94_vm0, %v143_v61, 0.0 }
  0x14   :  { %v109_v37 = vadd.f32 %v108_v40, %v107_v16  ;;  %v128_v38 = vadd.f32 %v127_v49, %v126_v17  ;;  %v157_v41 = vadd.f32 %v156_v32, %v155_v18  ;;  %v166_v42 = vsel %vm94_vm0, %v144_v62, 0.0 }
  0x15   :  { %v174_v43 = vsel %vm94_vm0, %v145_v63, 0.0  ;;  %v175_v39 = vsel %vm94_vm0, %v146_v0, 0.0  ;;  %v177_v44 = vsel %vm94_vm0, %v147_v1, 0.0  ;;  %v179_v45 = vsel %vm94_vm0, %v148_v2, 0.0  ;;  %v90_v1 = vld [vmem:[%s8404_s2] sm:$0xff] }
  0x16   :  { %v110_v46 = vrot.slane %v109_v37, 4  ;;  %v130_v47 = vadd.f32 %v129_v50, %v128_v38  ;;  %v159_v48 = vadd.f32 %v158_v33, %v157_v41  ;;  %v176_v51 = vadd.f32 %v175_v39, %v174_v43 }
  0x17   :  { %v181_v52 = vsel %vm94_vm0, %v149_v6, 0.0  ;;  %v183_v40 = vsel %vm94_vm0, %v150_v7, 0.0  ;;  %v185_v49 = vsel %vm94_vm0, %v151_v8, 0.0  ;;  %v187_v53 = vsel %vm94_vm0, %v152_v10, 0.0  ;;  %v91_v7 = vld [vmem:[%s8404_s2 + $0x8] sm:$0xff] }
  0x18   :  { %v111_v54 = vadd.f32 %v110_v46, %v109_v37  ;;  %v131_v55 = vrot.slane %v130_v47, 4  ;;  %v161_v56 = vadd.f32 %v160_v34, %v159_v48  ;;  %v178_v57 = vadd.f32 %v177_v44, %v176_v51 }
  0x19   :  { %v5620_v32 = vpack.c.bf16 %v91_v7, %v90_v1 }
  0x1a   :  { %v112_v58 = vrot.slane %v111_v54, 2  ;;  %v132_v59 = vadd.f32 %v131_v55, %v130_v47  ;;  %v163_v60 = vadd.f32 %v162_v35, %v161_v56  ;;  %v180_v61 = vadd.f32 %v179_v45, %v178_v57 }
  0x1c   :  { %v113_v50 = vadd.f32 %v112_v58, %v111_v54  ;;  %v133_v62 = vrot.slane %v132_v59, 2  ;;  %v165_v63 = vadd.f32 %v164_v36, %v163_v60  ;;  %v182_v0 = vadd.f32 %v181_v52, %v180_v61 }
  0x1e   :  { %v114_v2 = vrot.slane %v113_v50, 1  ;;  %v134_v4 = vadd.f32 %v133_v62, %v132_v59  ;;  %v167_v5 = vadd.f32 %v166_v42, %v165_v63  ;;  %v184_v6 = vadd.f32 %v183_v40, %v182_v0 }
  0x20   :  { %v115_v8 = vadd.f32 %v114_v2, %v113_v50  ;;  %v135_v10 = vrot.slane %v134_v4, 1  ;;  %v168_v11 = vrot.slane %v167_v5, 4  ;;  %v186_v12 = vadd.f32 %v185_v49, %v184_v6 }
  0x22   :  { %v136_v16 = vadd.f32 %v135_v10, %v134_v4  ;;  %v169_v17 = vadd.f32 %v168_v11, %v167_v5  ;;  %v188_v18 = vadd.f32 %v187_v53, %v186_v12 }
  0x24   :  { %v198_v33 = vsel %vm197_vm2, %v136_v16, %v115_v8  ;;  %v170_v34 = vrot.slane %v169_v17, 2  ;;  %v189_v35 = vrot.slane %v188_v18, 4 }
  0x25   :  { %5408 = vmatmul.mubr.msk.f32.vlgmr.msra.gmra.mrb[0].mxu0 %vm94_vm0, %v198_v33 }
  0x26   :  { %v171_v36 = vadd.f32 %v170_v34, %v169_v17  ;;  %v190_v37 = vadd.f32 %v189_v35, %v188_v18  ;;  %5621 = vmatpush3.bf16.msra.mxu0 %v5620_v32  ;;  %5429 = vmatprep.mubr.msk.f32.mxu0 %vm6036_vm1, %v6037_v9 }
  0x27   :  { %5622 = vmatprep.subr.bf16.mxu0 %v6035_v3 }
  0x28   :  { %v172_v38 = vrot.slane %v171_v36, 1  ;;  %v191_v41 = vrot.slane %v190_v37, 2 }
  0x2a   :  { %v192_v42 = vadd.f32 %v191_v41, %v190_v37  ;;  %v173_v43 = vadd.f32 %v172_v38, %v171_v36 }
  0x2c   :  { %v193_v39 = vrot.slane %v192_v42, 1 }
  0x2e   :  { %v194_v44 = vadd.f32 %v193_v39, %v192_v42 }
  0x30   :  { %v274_v45 = vsel %vm197_vm2, %v194_v44, %v173_v43 }
  0x31   :  { %5419 = vmatmul.mubr.msk.f32.vlgmr.msra.gmra.mrb[0].mxu1 %vm94_vm0, %v274_v45 }
  0x32   :  { %5627 = vmatpush3.bf16.msra.mxu1 %v5620_v32  ;;  %5440 = vmatprep.mubr.msk.f32.mxu1 %vm6036_vm1, %v6037_v9 }
  0x33   :  { %5628 = vmatprep.subr.bf16.mxu1 %v6035_v3 }
  0x34   :  { %20 = vsyncpa [#allocation5], 0  ;;  %v92_v46 = vld [vmem:[%s8404_s2 + $0x10] sm:$0xff]  ;;  %v93_v47 = vld [vmem:[%s8404_s2 + $0x18] sm:$0xff]  ;;  %vm737_vm3 = vcmask 257024   ;;  %vm739_vm4 = vcmask 253952  }
  0x35   :  { %v5623_v48 = vpack.c.bf16 %v93_v47, %v92_v46  ;;  %v8418_v60 = vmov 0   ;;  %vm750_vm5 = vsmask.f32 256  ;;  %vm800_vm6 = vsmask.f32 7938  ;;  %s6039_s2 = smov 64  }
  0x36   :  { %738 = vst.msk [vmem:[#allocation2] sm:$0xf] %vm737_vm3, %v8418_v60  ;;  %741 = vst.msk [vmem:[#allocation2 + $0x50] sm:$0xf] %vm737_vm3, %v8418_v60  ;;  %v755_v50 = vld [vmem:[#allocation2 + $0x10] sm:$0x1] }
  0x37   :  { %5624 = vmatpush3.bf16.msra.mxu0 %v5623_v48  ;;  %5630 = vmatpush3.bf16.msra.mxu1 %v5623_v48  ;;  %740 = vst.msk [vmem:[#allocation2 + $0x4] sm:$0x1] %vm739_vm4, %v8418_v60  ;;  %742 = vst.msk [vmem:[#allocation2 + $0x54] sm:$0x1] %vm739_vm4, %v8418_v60  ;;  %v805_v62 = vld [vmem:[#allocation2 + $0x14] sm:$0x1] }
  0x38   :  { %5631 = vmatprep.subr.bf16.mxu1 %v6035_v3  ;;  %744 = vst.msk [vmem:[#allocation2 + $0x48] sm:$0xf] %vm737_vm3, %v8418_v60  ;;  %746 = vst.msk [vmem:[#allocation2 + $0x98] sm:$0xf] %vm737_vm3, %v8418_v60  ;;  %v752_v1 = vld [vmem:[#allocation2 + $0x8] sm:$0x1] }
  0x39   :  { %745 = vst.msk [vmem:[#allocation2 + $0x4c] sm:$0x1] %vm739_vm4, %v8418_v60  ;;  %747 = vst.msk [vmem:[#allocation2 + $0x9c] sm:$0x1] %vm739_vm4, %v8418_v60  ;;  %v802_v2 = vld [vmem:[#allocation2 + $0xc] sm:$0x1] }
  0x3a   :  { %vm6327_vm7 = vmand %vm739_vm4, %vm750_vm5  ;;  %v761_v11 = vld [vmem:[#allocation2 + $0x20] sm:$0x1]  ;;  %v811_v12 = vld [vmem:[#allocation2 + $0x24] sm:$0x1]  ;;  %vm2961_vm9 = vcmask 519168   ;;  %s6040_s18 = smov 32  }
  0x3b   :  { %vm6333_vm8 = vmand %vm739_vm4, %vm800_vm6  ;;  %v756_v0 = vsel %vm6327_vm7, 0, %v755_v50  ;;  %v753_v7 = vsel %vm6327_vm7, 0, %v752_v1  ;;  %v762_v16 = vsel %vm6327_vm7, 0, %v761_v11  ;;  %v758_v18 = vld [vmem:[#allocation2 + $0x18] sm:$0x1]  ;;  %vm1677_vm11 = vcmask 523264  }
  0x3c   :  { %757 = vst [vmem:[#allocation2 + $0x10] sm:$0x1] %v756_v0  ;;  %v806_v6 = vsel %vm6333_vm8, 0, %v805_v62  ;;  %754 = vst [vmem:[#allocation2 + $0x8] sm:$0x1] %v753_v7  ;;  %v803_v10 = vsel %vm6333_vm8, 0, %v802_v2 }
  0x3d   :  { %v1197_v5 = vld [vmem:[#allocation2] sm:$0xe]  ;;  %807 = vst [vmem:[#allocation2 + $0x14] sm:$0x1] %v806_v6  ;;  %804 = vst [vmem:[#allocation2 + $0xc] sm:$0x1] %v803_v10 }
  0x3e   :  { %v1177_v4 = vld [vmem:[#allocation2 + $0x4] sm:$0x1]  ;;  %v812_v17 = vsel %vm6333_vm8, 0, %v811_v12  ;;  %v808_v32 = vld [vmem:[#allocation2 + $0x1c] sm:$0x1]  ;;  %v759_v34 = vsel %vm6327_vm7, 0, %v758_v18  ;;  %vm6586_vm10 = vmand %vm737_vm3, %vm800_vm6 }
  0x3f   :  { %v4936_v8 = vcombine.low %v1197_v5, %v1177_v4  ;;  %763 = vst [vmem:[#allocation2 + $0x20] sm:$0x1] %v762_v16  ;;  %813 = vst [vmem:[#allocation2 + $0x24] sm:$0x1] %v812_v17  ;;  %v809_v35 = vsel %vm6333_vm8, 0, %v808_v32  ;;  %vm1812_vm12 = vcmask 785408  }
  0x40   :  { %v767_v36 = vld [vmem:[#allocation2 + $0x30] sm:$0x1]  ;;  %v1157_v37 = vld [vmem:[#allocation2] sm:$0xf]  ;;  %v1187_v38 = vld [vmem:[#allocation2 + $0x54] sm:$0x1] }
  0x41   :  { %v1557_v33 = vrot.slane %v4936_v8, 1  ;;  %760 = vst [vmem:[#allocation2 + $0x18] sm:$0x1] %v759_v34  ;;  %810 = vst [vmem:[#allocation2 + $0x1c] sm:$0x1] %v809_v35  ;;  %v768_v41 = vsel %vm6327_vm7, 0, %v767_v36  ;;  %v4916_v42 = vcombine.low %v1157_v37, %v1177_v4 }
  0x42   :  { %v1207_v43 = vld [vmem:[#allocation2 + $0x50] sm:$0xe]  ;;  %769 = vst [vmem:[#allocation2 + $0x30] sm:$0x1] %v768_v41  ;;  %v817_v39 = vld [vmem:[#allocation2 + $0x34] sm:$0x1] }
  0x43   :  { %1577 = vrot.lane.b32.xlu0 %v1557_v33, %s6039_s2  ;;  %v764_v44 = vld [vmem:[#allocation2 + $0x28] sm:$0x1]  ;;  %v4946_v45 = vcombine.low %v1207_v43, %v1187_v38  ;;  %v818_v46 = vsel %vm6333_vm8, 0, %v817_v39  ;;  %v814_v48 = vld [vmem:[#allocation2 + $0x2c] sm:$0x1]  ;;  %vm2963_vm13 = vcmask 516096  }
  0x44   :  { %v765_v47 = vsel %vm6327_vm7, 0, %v764_v44  ;;  %819 = vst [vmem:[#allocation2 + $0x34] sm:$0x1] %v818_v46  ;;  %2962 = vst.msk [vmem:[#allocation3] sm:$0xf] %vm2961_vm9, %v8418_v60 }
  0x45   :  { %766 = vst [vmem:[#allocation2 + $0x28] sm:$0x1] %v765_v47  ;;  %2965 = vst.msk [vmem:[#allocation3 + $0x50] sm:$0xf] %vm2961_vm9, %v8418_v60  ;;  %v820_v62 = vld [vmem:[#allocation2 + $0x3c] sm:$0x1] }
  0x46   :  { %2968 = vst.msk [vmem:[#allocation3 + $0x48] sm:$0xf] %vm2961_vm9, %v8418_v60  ;;  %2970 = vst.msk [vmem:[#allocation3 + $0x98] sm:$0xf] %vm2961_vm9, %v8418_v60  ;;  %v821_v1 = vsel %vm6333_vm8, 0, %v820_v62 }
  0x47   :  { %v779_v2 = vld [vmem:[#allocation2 + $0x60] sm:$0x1]  ;;  %822 = vst [vmem:[#allocation2 + $0x3c] sm:$0x1] %v821_v1  ;;  %v829_v5 = vld [vmem:[#allocation2 + $0x64] sm:$0x1]  ;;  %vm7263_vm14 = vmand %vm2963_vm13, %vm750_vm5 }
  0x48   :  { %v780_v4 = vsel %vm6327_vm7, 0, %v779_v2  ;;  %v776_v6 = vld [vmem:[#allocation2 + $0x58] sm:$0x1]  ;;  %v830_v8 = vsel %vm6333_vm8, 0, %v829_v5  ;;  %v826_v11 = vld [vmem:[#allocation2 + $0x5c] sm:$0x1]  ;;  %vm7273_vm15 = vmand %vm2963_vm13, %vm800_vm6 }
  0x49   :  { %781 = vst [vmem:[#allocation2 + $0x60] sm:$0x1] %v780_v4  ;;  %v777_v10 = vsel %vm6327_vm7, 0, %v776_v6  ;;  %831 = vst [vmem:[#allocation2 + $0x64] sm:$0x1] %v830_v8  ;;  %v827_v17 = vsel %vm6333_vm8, 0, %v826_v11 }
  0x4a   :  { %778 = vst [vmem:[#allocation2 + $0x58] sm:$0x1] %v777_v10  ;;  %v782_v12 = vld [vmem:[#allocation2 + $0x68] sm:$0x1]  ;;  %v832_v16 = vld [vmem:[#allocation2 + $0x6c] sm:$0x1] }
  0x4b   :  { %v783_v18 = vsel %vm6327_vm7, 0, %v782_v12  ;;  %v833_v32 = vsel %vm6333_vm8, 0, %v832_v16  ;;  %828 = vst [vmem:[#allocation2 + $0x5c] sm:$0x1] %v827_v17  ;;  %v785_v33 = vld [vmem:[#allocation2 + $0x70] sm:$0x1] }
  0x4c   :  { %784 = vst [vmem:[#allocation2 + $0x68] sm:$0x1] %v783_v18  ;;  %834 = vst [vmem:[#allocation2 + $0x6c] sm:$0x1] %v833_v32  ;;  %v835_v34 = vld [vmem:[#allocation2 + $0x74] sm:$0x1] }
  0x4d   :  { %v786_v35 = vsel %vm6327_vm7, 0, %v785_v33  ;;  %v836_v36 = vsel %vm6333_vm8, 0, %v835_v34  ;;  %v788_v37 = vld [vmem:[#allocation2 + $0x78] sm:$0x1]  ;;  %v773_v43 = vld [vmem:[#allocation2 + $0x40] sm:$0x1] }
  0x4e   :  { %787 = vst [vmem:[#allocation2 + $0x70] sm:$0x1] %v786_v35  ;;  %837 = vst [vmem:[#allocation2 + $0x74] sm:$0x1] %v836_v36  ;;  %v789_v41 = vsel %vm6327_vm7, 0, %v788_v37  ;;  %v774_v47 = vsel %vm6327_vm7, 0, %v773_v43 }
  0x4f   :  { %790 = vst [vmem:[#allocation2 + $0x78] sm:$0x1] %v789_v41  ;;  %v823_v39 = vld [vmem:[#allocation2 + $0x44] sm:$0x1]  ;;  %v791_v44 = vld [vmem:[#allocation2 + $0x80] sm:$0x1] }
  0x50   :  { %v841_v46 = vld [vmem:[#allocation2 + $0x84] sm:$0x1]  ;;  %775 = vst [vmem:[#allocation2 + $0x40] sm:$0x1] %v774_v47  ;;  %2964 = vst.msk [vmem:[#allocation3 + $0x4] sm:$0x1] %vm2963_vm13, %v8418_v60 }
  0x51   :  { %2966 = vst.msk [vmem:[#allocation3 + $0x54] sm:$0x1] %vm2963_vm13, %v8418_v60  ;;  %2969 = vst.msk [vmem:[#allocation3 + $0x4c] sm:$0x1] %vm2963_vm13, %v8418_v60 }
  0x52   :  { %2971 = vst.msk [vmem:[#allocation3 + $0x9c] sm:$0x1] %vm2963_vm13, %v8418_v60 }
  0xf8   :  { %v267_v51 = vpop.f32.mrb[0].mxu0 }
  0xf9   :  { %v271_v52 = vmul.f32 0.015625, %v267_v51  ;;  %v5409_v40 = vpop.f32.mrb[1].mxu0  ;;  %v770_v51 = vld [vmem:[#allocation2 + $0x38] sm:$0x1] }
  0xfa   :  { %v1167_v40 = vld [vmem:[#allocation2 + $0x50] sm:$0xf] }
  0xfb   :  { %5430 = vmatmul.mubr.msk.f32.vlgmr.msra.gmra.mrb[2].mxu0 %vm94_vm0, %v271_v52  ;;  %v348_v49 = vmul.f32 %v271_v52, %v271_v52  ;;  %v1320_v52 = vshll.u32 %v4916_v42, 16 }
 0x104   :  { %v343_v53 = vpop.f32.mrb[0].mxu1 }
 0x105   :  { %v347_v54 = vmul.f32 0.015625, %v343_v53  ;;  %v5420_v55 = vpop.f32.mrb[1].mxu1  ;;  %v4926_v53 = vcombine.low %v1167_v40, %v1187_v38  ;;  %v838_v38 = vld [vmem:[#allocation2 + $0x7c] sm:$0x1]  ;;  %v847_v40 = vld [vmem:[#allocation2 + $0x94] sm:$0x1] }
 0x106   :  { %v815_v55 = vsel %vm6333_vm8, 0, %v814_v48  ;;  %v824_v48 = vsel %vm6333_vm8, 0, %v823_v39 }
 0x107   :  { %v349_v56 = vsub.f32 %v347_v54, %v348_v49  ;;  %v1318_v49 = vshrl.u32 %v4916_v42, 16  ;;  %v1567_v54 = vrot.slane %v4946_v45, 1  ;;  %816 = vst [vmem:[#allocation2 + $0x2c] sm:$0x1] %v815_v55  ;;  %v839_v42 = vsel %vm6333_vm8, 0, %v838_v38 }
 0x108   :  { %840 = vst [vmem:[#allocation2 + $0x7c] sm:$0x1] %v839_v42  ;;  %v792_v45 = vsel %vm6327_vm7, 0, %v791_v44  ;;  %825 = vst [vmem:[#allocation2 + $0x44] sm:$0x1] %v824_v48 }
 0x109   :  { %v350_v57 = vmax.f32 %v349_v56, 0.0  ;;  %v1322_v56 = vrot.slane %v1320_v52, 1  ;;  %1597 = vrot.lane.b32.xlu0 %v1567_v54, %s6039_s2  ;;  %793 = vst [vmem:[#allocation2 + $0x80] sm:$0x1] %v792_v45  ;;  %v797_v52 = vld [vmem:[#allocation2 + $0x90] sm:$0x1] }
 0x10a   :  { %v794_v54 = vld [vmem:[#allocation2 + $0x88] sm:$0x1]  ;;  %v844_v55 = vld [vmem:[#allocation2 + $0x8c] sm:$0x1] }
 0x10b   :  { %v351_v58 = vadd.f32 1e-05, %v350_v57  ;;  %v771_v57 = vsel %vm6327_vm7, 0, %v770_v51  ;;  %v1323_v50 = vor.u32 %v1322_v56, %v1318_v49  ;;  %v842_v51 = vsel %vm6333_vm8, 0, %v841_v46 }
 0x10c   :  { %772 = vst [vmem:[#allocation2 + $0x38] sm:$0x1] %v771_v57  ;;  %843 = vst [vmem:[#allocation2 + $0x84] sm:$0x1] %v842_v51  ;;  %v798_v49 = vsel %vm6327_vm7, 0, %v797_v52  ;;  %v795_v56 = vsel %vm6327_vm7, 0, %v794_v54 }
 0x10d   :  { %5930 = vrsqrt.f32 %v351_v58  ;;  %v1388_v58 = vshrl.u32 %v4926_v53, 16  ;;  %1457 = vrot.lane.b32.xlu0 %v1323_v50, %s6040_s18  ;;  %799 = vst [vmem:[#allocation2 + $0x90] sm:$0x1] %v798_v49  ;;  %v845_v57 = vsel %vm6333_vm8, 0, %v844_v55  ;;  %796 = vst [vmem:[#allocation2 + $0x88] sm:$0x1] %v795_v56 }
 0x10e   :  { %846 = vst [vmem:[#allocation2 + $0x8c] sm:$0x1] %v845_v57  ;;  %v6041_v50 = vmov 1966171168   ;;  %v4899_v55 = vld [vmem:[%s8406_s4] ss:$0 sm:$0xff] }
 0x10f   :  { %v501_v62 = vunpack.c.l.s4 %v6041_v50 }
 0x111   :  { %v502_v1 = vunpack.c.0.s8 %v501_v62 }
 0x117   :  { %v5931_v59 = vpop.eup %5930 }
 0x118   :  { %5441 = vmatmul.mubr.msk.f32.vlgmr.msra.gmra.mrb[2].mxu1 %vm94_vm0, %v5931_v59  ;;  %v1390_v59 = vshll.u32 %v4926_v53, 16  ;;  %v848_v53 = vsel %vm6333_vm8, 0, %v847_v40 }
 0x119   :  { %5543 = vmatprep.mubr.msk.f32.mxu1 %vm6036_vm1, %v6037_v9  ;;  %849 = vst [vmem:[#allocation2 + $0x94] sm:$0x1] %v848_v53 }
 0x11a   :  { %v1392_v0 = vrot.slane %v1390_v59, 1 }
 0x11c   :  { %v1393_v7 = vor.u32 %v1392_v0, %v1388_v58  ;;  %v503_v0 = vlaneseq }
 0x11e   :  { %1477 = vrot.lane.b32.xlu0 %v1393_v7, %s6040_s18  ;;  %v504_v2 = vshrl.u32 %v503_v0, 7 }
 0x120   :  { %v6413_v4 = vsub.s32 %v502_v1, %v504_v2  ;;  %v6417_v8 = vsub.s32 0, %v504_v2 }
 0x1ce   :  { %v422_v58 = vpop.f32.mrb[2].mxu0 }
 0x1cf   :  { %v5431_v59 = vpop.f32.mrb[3].mxu0  ;;  %v506_v5 = vrot.slane %v422_v58, %v6413_v4 }
 0x1d1   :  { %v507_v6 = vcombine.high %v506_v5, %v506_v5  ;;  %v514_v7 = vrot.slane %v506_v5, %v6413_v4 }
 0x1d3   :  { %v521_v63 = vrot.slane %v507_v6, %v6413_v4  ;;  %v525_v10 = vrot.slane %v514_v7, %v6417_v8 }
 0x1d5   :  { %v529_v11 = vrot.slane %v521_v63, %v6417_v8  ;;  %v532_v18 = vsub.f32 %v6155_v13, %v525_v10  ;;  %v533_v32 = vsub.f32 %v6157_v14, %v525_v10  ;;  %v534_v33 = vsub.f32 %v6159_v15, %v525_v10 }
 0x1d6   :  { %v535_v34 = vsub.f32 %v6172_v19, %v525_v10  ;;  %v536_v35 = vsub.f32 %v6174_v20, %v525_v10  ;;  %v537_v36 = vsub.f32 %v6176_v21, %v525_v10  ;;  %v538_v41 = vsub.f32 %v6178_v22, %v525_v10 }
 0x1d7   :  { %v539_v42 = vsub.f32 %v6182_v23, %v525_v10  ;;  %v540_v43 = vsub.f32 %v6184_v24, %v529_v11  ;;  %v541_v13 = vsub.f32 %v6186_v25, %v529_v11  ;;  %v542_v14 = vsub.f32 %v6188_v26, %v529_v11  ;;  %v4898_v26 = vld [vmem:[%s8405_s3] ss:$0 sm:$0xff] }
 0x1d8   :  { %v543_v15 = vsub.f32 %v6190_v27, %v529_v11  ;;  %v544_v21 = vsub.f32 %v6192_v28, %v529_v11  ;;  %v545_v39 = vsub.f32 %v6194_v29, %v529_v11  ;;  %v546_v22 = vsub.f32 %v6196_v30, %v529_v11 }
 0x1d9   :  { %v547_v23 = vsub.f32 %v6198_v31, %v529_v11 }
 0x1eb   :  { %v495_v12 = vpop.f32.mrb[2].mxu1 }
 0x1ec   :  { %v555_v16 = vrot.slane %v495_v12, %v6413_v4  ;;  %v5442_v17 = vpop.f32.mrb[3].mxu1 }
 0x1ee   :  { %v556_v37 = vcombine.high %v555_v16, %v555_v16  ;;  %v563_v38 = vrot.slane %v555_v16, %v6413_v4 }
 0x1f0   :  { %v570_v19 = vrot.slane %v556_v37, %v6413_v4  ;;  %v574_v20 = vrot.slane %v563_v38, %v6417_v8 }
 0x1f2   :  { %v578_v24 = vrot.slane %v570_v19, %v6417_v8  ;;  %v581_v44 = vmul.f32 %v574_v20, %v532_v18  ;;  %v582_v25 = vmul.f32 %v574_v20, %v533_v32  ;;  %v583_v45 = vmul.f32 %v574_v20, %v534_v33 }
 0x1f3   :  { %v584_v27 = vmul.f32 %v574_v20, %v535_v34  ;;  %v585_v46 = vmul.f32 %v574_v20, %v536_v35  ;;  %v586_v47 = vmul.f32 %v574_v20, %v537_v36  ;;  %v587_v48 = vmul.f32 %v574_v20, %v538_v41 }
 0x1f4   :  { %v588_v28 = vmul.f32 %v574_v20, %v539_v42  ;;  %v589_v51 = vmul.f32 %v578_v24, %v540_v43  ;;  %v590_v29 = vmul.f32 %v578_v24, %v541_v13  ;;  %v591_v52 = vmul.f32 %v578_v24, %v542_v14 }
 0x1f5   :  { %v592_v30 = vmul.f32 %v578_v24, %v543_v15  ;;  %v593_v40 = vmul.f32 %v578_v24, %v544_v21  ;;  %v594_v31 = vmul.f32 %v578_v24, %v545_v39  ;;  %v595_v49 = vmul.f32 %v578_v24, %v546_v22 }
 0x1f6   :  { %v596_v53 = vmul.f32 %v578_v24, %v547_v23  ;;  %v603_v54 = vmul.f32 %v4898_v26, %v581_v44  ;;  %v604_v56 = vmul.f32 %v4898_v26, %v582_v25  ;;  %v605_v57 = vmul.f32 %v4898_v26, %v583_v45 }
 0x1f7   :  { %v606_v58 = vmul.f32 %v4898_v26, %v584_v27  ;;  %v607_v59 = vmul.f32 %v4898_v26, %v585_v46  ;;  %v608_v62 = vmul.f32 %v4898_v26, %v586_v47  ;;  %v609_v1 = vmul.f32 %v4898_v26, %v587_v48 }
 0x1f8   :  { %v6449_v50 = vadd.f32 %v4899_v55, %v603_v54  ;;  %v6451_v0 = vadd.f32 %v4899_v55, %v604_v56  ;;  %v6453_v2 = vadd.f32 %v4899_v55, %v605_v57  ;;  %v610_v5 = vmul.f32 %v4898_v26, %v588_v28 }
 0x1f9   :  { %v6455_v6 = vadd.f32 %v4899_v55, %v606_v58  ;;  %v611_v7 = vmul.f32 %v4898_v26, %v589_v51  ;;  %v6457_v63 = vadd.f32 %v4899_v55, %v607_v59  ;;  %v612_v11 = vmul.f32 %v4898_v26, %v590_v29 }
 0x1fa   :  { %v641_v10 = vmul.f32 0.5, %v6449_v50  ;;  %v6460_v12 = vadd.f32 %v4899_v55, %v608_v62  ;;  %v642_v16 = vmul.f32 0.5, %v6451_v0  ;;  %v613_v17 = vmul.f32 %v4898_v26, %v591_v52 }
 0x1fb   :  { %v6463_v18 = vadd.f32 %v4899_v55, %v609_v1  ;;  %v643_v32 = vmul.f32 0.5, %v6453_v2  ;;  %v614_v33 = vmul.f32 %v4898_v26, %v592_v30  ;;  %v6466_v34 = vadd.f32 %v4899_v55, %v610_v5 }
 0x1fc   :  { %v644_v35 = vmul.f32 0.5, %v6455_v6  ;;  %v615_v36 = vmul.f32 %v4898_v26, %v593_v40  ;;  %v6469_v37 = vadd.f32 %v4899_v55, %v611_v7  ;;  %v645_v38 = vmul.f32 0.5, %v6457_v63 }
 0x1fd   :  { %5932 = vtanh.f32 %v641_v10  ;;  %v616_v41 = vmul.f32 %v4898_v26, %v594_v31  ;;  %v6472_v42 = vadd.f32 %v4899_v55, %v612_v11  ;;  %v646_v43 = vmul.f32 0.5, %v6460_v12 }
 0x1fe   :  { %5934 = vtanh.f32 %v642_v16  ;;  %v617_v13 = vmul.f32 %v4898_v26, %v595_v49  ;;  %v6475_v14 = vadd.f32 %v4899_v55, %v613_v17  ;;  %v647_v15 = vmul.f32 0.5, %v6463_v18 }
 0x1ff   :  { %5936 = vtanh.f32 %v643_v32  ;;  %v618_v19 = vmul.f32 %v4898_v26, %v596_v53  ;;  %v6478_v20 = vadd.f32 %v4899_v55, %v614_v33  ;;  %v648_v21 = vmul.f32 0.5, %v6466_v34 }
 0x200   :  { %5938 = vtanh.f32 %v644_v35  ;;  %v6481_v39 = vadd.f32 %v4899_v55, %v615_v36  ;;  %v649_v22 = vmul.f32 0.5, %v6469_v37  ;;  %v6484_v23 = vadd.f32 %v4899_v55, %v616_v41 }
 0x201   :  { %5940 = vtanh.f32 %v645_v38  ;;  %v650_v24 = vmul.f32 0.5, %v6472_v42  ;;  %v6487_v44 = vadd.f32 %v4899_v55, %v617_v13  ;;  %v651_v25 = vmul.f32 0.5, %v6475_v14 }
 0x202   :  { %5942 = vtanh.f32 %v646_v43  ;;  %v6490_v45 = vadd.f32 %v4899_v55, %v618_v19  ;;  %v652_v26 = vmul.f32 0.5, %v6478_v20  ;;  %v653_v27 = vmul.f32 0.5, %v6481_v39 }
 0x203   :  { %5944 = vtanh.f32 %v647_v15  ;;  %v654_v46 = vmul.f32 0.5, %v6484_v23  ;;  %v655_v48 = vmul.f32 0.5, %v6487_v44 }
 0x204   :  { %5946 = vtanh.f32 %v648_v21  ;;  %v656_v51 = vmul.f32 0.5, %v6490_v45 }
 0x205   :  { %5948 = vtanh.f32 %v649_v22 }
 0x206   :  { %5950 = vtanh.f32 %v650_v24 }
 0x207   :  { %v5933_v47 = vpop.eup %5932  ;;  %5952 = vtanh.f32 %v651_v25 }
 0x208   :  { %v5935_v28 = vpop.eup %5934  ;;  %5954 = vtanh.f32 %v652_v26  ;;  %v673_v29 = vmul.f32 0.5, %v5933_v47 }
 0x209   :  { %v5937_v52 = vpop.eup %5936  ;;  %5956 = vtanh.f32 %v653_v27  ;;  %v674_v30 = vmul.f32 0.5, %v5935_v28 }
 0x20a   :  { %v5939_v40 = vpop.eup %5938  ;;  %5958 = vtanh.f32 %v654_v46  ;;  %v675_v31 = vmul.f32 0.5, %v5937_v52  ;;  %v689_v49 = vadd.f32 0.5, %v673_v29 }
 0x20b   :  { %v5941_v53 = vpop.eup %5940  ;;  %5960 = vtanh.f32 %v655_v48  ;;  %v676_v54 = vmul.f32 0.5, %v5939_v40  ;;  %v690_v55 = vadd.f32 0.5, %v674_v30 }
 0x20c   :  { %v5943_v56 = vpop.eup %5942  ;;  %5962 = vtanh.f32 %v656_v51  ;;  %v677_v57 = vmul.f32 0.5, %v5941_v53  ;;  %v691_v58 = vadd.f32 0.5, %v675_v31  ;;  %v705_v10 = vmul.f32 %v689_v49, %v6449_v50 }
 0x20d   :  { %v5945_v59 = vpop.eup %5944  ;;  %v678_v62 = vmul.f32 0.5, %v5943_v56  ;;  %v692_v1 = vadd.f32 0.5, %v676_v54  ;;  %v706_v11 = vmul.f32 %v690_v55, %v6451_v0 }
 0x20e   :  { %v5947_v5 = vpop.eup %5946  ;;  %v679_v7 = vmul.f32 0.5, %v5945_v59  ;;  %v693_v32 = vadd.f32 0.5, %v677_v57  ;;  %v707_v33 = vmul.f32 %v691_v58, %v6453_v2  ;;  %v6501_v50 = vpack.c.bf16 %v705_v10, %v705_v10 }
 0x20f   :  { %v5949_v16 = vpop.eup %5948  ;;  %v680_v17 = vmul.f32 0.5, %v5947_v5  ;;  %v694_v38 = vadd.f32 0.5, %v678_v62  ;;  %v708_v41 = vmul.f32 %v692_v1, %v6455_v6  ;;  %v6503_v0 = vpack.c.bf16 %v706_v11, %v706_v11 }
 0x210   :  { %v5951_v35 = vpop.eup %5950  ;;  %v681_v36 = vmul.f32 0.5, %v5949_v16  ;;  %v695_v15 = vadd.f32 0.5, %v679_v7  ;;  %v709_v2 = vmul.f32 %v693_v32, %v6457_v63  ;;  %v6506_v46 = vpack.c.bf16 %v707_v33, %v707_v33 }
 0x211   :  { %v5953_v43 = vpop.eup %5952  ;;  %v682_v13 = vmul.f32 0.5, %v5951_v35  ;;  %v696_v19 = vadd.f32 0.5, %v680_v17  ;;  %v710_v28 = vmul.f32 %v694_v38, %v6460_v12  ;;  %v6509_v51 = vpack.c.bf16 %v708_v41, %v708_v41 }
 0x212   :  { %v5955_v21 = vpop.eup %5954  ;;  %v683_v22 = vmul.f32 0.5, %v5953_v43  ;;  %v697_v24 = vadd.f32 0.5, %v681_v36  ;;  %v711_v40 = vmul.f32 %v695_v15, %v6463_v18  ;;  %v6516_v58 = vpack.c.bf16 %v709_v2, %v709_v2 }
 0x213   :  { %v5957_v25 = vpop.eup %5956  ;;  %v684_v26 = vmul.f32 0.5, %v5955_v21  ;;  %v698_v27 = vadd.f32 0.5, %v682_v13  ;;  %v712_v31 = vmul.f32 %v696_v19, %v6466_v34  ;;  %v6520_v1 = vpack.c.bf16 %v710_v28, %v710_v28 }
 0x214   :  { %v5959_v47 = vpop.eup %5958  ;;  %v685_v6 = vmul.f32 0.5, %v5957_v25  ;;  %v699_v48 = vadd.f32 0.5, %v683_v22  ;;  %v713_v63 = vmul.f32 %v697_v24, %v6469_v37  ;;  %v6523_v7 = vpack.c.bf16 %v711_v40, %v711_v40 }
 0x215   :  { %v5961_v29 = vpop.eup %5960  ;;  %v686_v52 = vmul.f32 0.5, %v5959_v47  ;;  %v700_v30 = vadd.f32 0.5, %v684_v26  ;;  %v714_v55 = vmul.f32 %v698_v27, %v6472_v42  ;;  %v5274_v37 = vpack.c.bf16 %v712_v31, %v712_v31 }
 0x216   :  { %v5963_v49 = vpop.eup %5962  ;;  %v687_v53 = vmul.f32 0.5, %v5961_v29  ;;  %v701_v54 = vadd.f32 0.5, %v685_v6  ;;  %v715_v12 = vmul.f32 %v699_v48, %v6475_v14  ;;  %v6526_v10 = vpack.c.bf16 %v713_v63, %v713_v63 }
 0x217   :  { %v688_v56 = vmul.f32 0.5, %v5963_v49  ;;  %v702_v57 = vadd.f32 0.5, %v686_v52  ;;  %v716_v62 = vmul.f32 %v700_v30, %v6478_v20  ;;  %v6528_v14 = vpack.c.bf16 %v714_v55, %v714_v55  ;;  %v1066_v55 = vld [vmem:[#allocation2 + $0x10] sm:$0xf] }
 0x218   :  { %v703_v59 = vadd.f32 0.5, %v687_v53  ;;  %v717_v18 = vmul.f32 %v701_v54, %v6481_v39  ;;  %v907_v11 = vshrl.u32 %v6503_v0, 16  ;;  %v6532_v16 = vpack.c.bf16 %v715_v12, %v715_v12 }
 0x219   :  { %v704_v34 = vadd.f32 0.5, %v688_v56  ;;  %v718_v5 = vmul.f32 %v702_v57, %v6484_v23  ;;  %v899_v39 = vshrl.u32 %v6501_v50, 16  ;;  %v915_v17 = vshrl.u32 %v6506_v46, 16 }
 0x21a   :  { %v719_v42 = vmul.f32 %v703_v59, %v6487_v44  ;;  %v6536_v23 = vpack.c.bf16 %v716_v62, %v716_v62  ;;  %v6538_v32 = vpack.c.bf16 %v717_v18, %v717_v18  ;;  %v902_v44 = vshll.u32 %v6501_v50, 16  ;;  %v1069_v18 = vld [vmem:[#allocation2 + $0x14] sm:$0x1] }
 0x21b   :  { %v720_v20 = vmul.f32 %v704_v34, %v6490_v45  ;;  %v923_v33 = vshrl.u32 %v6509_v51, 16  ;;  %v5280_v35 = vpack.c.bf16 %v718_v5, %v718_v5  ;;  %v910_v36 = vshll.u32 %v6503_v0, 16 }
 0x21c   :  { %v918_v38 = vshll.u32 %v6506_v46, 16  ;;  %v931_v45 = vshrl.u32 %v6516_v58, 16  ;;  %v6545_v41 = vpack.c.bf16 %v719_v42, %v719_v42  ;;  %v909_v43 = vrot.slane %v907_v11, 7  ;;  %v1078_v42 = vld [vmem:[#allocation2 + $0x20] sm:$0xf] }
 0x21d   :  { %v926_v13 = vshll.u32 %v6509_v51, 16  ;;  %v939_v15 = vshrl.u32 %v6520_v1, 16  ;;  %v6549_v19 = vpack.c.bf16 %v720_v20, %v720_v20  ;;  %v6551_v21 = vrot.slane %v915_v17, 7 }
 0x21e   :  { %v947_v22 = vshrl.u32 %v6523_v7, 16  ;;  %v955_v24 = vshrl.u32 %v5274_v37, 16  ;;  %v925_v50 = vrot.slane %v923_v33, 7  ;;  %v934_v0 = vshll.u32 %v6516_v58, 16  ;;  %v1099_v58 = vld [vmem:[#allocation2 + $0x3c] sm:$0x1] }
 0x21f   :  { %v942_v25 = vshll.u32 %v6520_v1, 16  ;;  %v963_v26 = vshrl.u32 %v6526_v10, 16  ;;  %v6557_v27 = vrot.slane %v931_v45, 7  ;;  %v971_v47 = vshrl.u32 %v6528_v14, 16  ;;  %v1081_v45 = vld [vmem:[#allocation2 + $0x24] sm:$0x1] }
 0x220   :  { %v6559_v2 = vrot.slane %v955_v24, 7  ;;  %v979_v6 = vshrl.u32 %v6532_v16, 16  ;;  %v6563_v48 = vrot.slane %v939_v15, 7  ;;  %v950_v28 = vshll.u32 %v6523_v7, 16  ;;  %v1060_v24 = vld [vmem:[#allocation2 + $0x8] sm:$0xf] }
 0x221   :  { %v958_v51 = vshll.u32 %v5274_v37, 16  ;;  %v987_v29 = vshrl.u32 %v6536_v23, 16  ;;  %v6567_v52 = vrot.slane %v947_v22, 7  ;;  %v6569_v30 = vrot.slane %v963_v26, 7  ;;  %v1063_v26 = vld [vmem:[#allocation2 + $0xc] sm:$0x1] }
 0x222   :  { %v966_v40 = vshll.u32 %v6526_v10, 16  ;;  %v974_v31 = vshll.u32 %v6528_v14, 16  ;;  %v982_v49 = vshll.u32 %v6532_v16, 16  ;;  %v990_v53 = vshll.u32 %v6536_v23, 16  ;;  %v1108_v7 = vld [vmem:[#allocation2 + $0x58] sm:$0xf] }
 0x223   :  { %v995_v54 = vshrl.u32 %v6538_v32, 16  ;;  %v1003_v63 = vshrl.u32 %v5280_v35, 16  ;;  %v6577_v56 = vor.u32 %v958_v51, %v6559_v2  ;;  %v6579_v57 = vrot.slane %v971_v47, 7  ;;  %v1126_v10 = vld [vmem:[#allocation2 + $0x70] sm:$0xf] }
 0x224   :  { %v6581_v12 = vrot.slane %v979_v6, 7  ;;  %v1011_v59 = vshrl.u32 %v6545_v41, 16  ;;  %v6590_v1 = vrot.slane %v987_v29, 7  ;;  %v998_v34 = vshll.u32 %v6538_v32, 16  ;;  %v1075_v29 = vld [vmem:[#allocation2 + $0x1c] sm:$0x1] }
 0x225   :  { %v6593_v5 = vrot.slane %v1003_v63, 7  ;;  %v912_v37 = vor.u32 %v910_v36, %v909_v43  ;;  %v1006_v11 = vshll.u32 %v5280_v35, 16  ;;  %v1019_v20 = vshrl.u32 %v6549_v19, 16 }
 0x226   :  { %v913_v17 = vrot.slane %v909_v43, 4  ;;  %v901_v33 = vrot.slane %v899_v39, 7  ;;  %v6596_v15 = vrot.slane %v995_v54, 7  ;;  %v928_v47 = vor.u32 %v926_v13, %v925_v50  ;;  %v1072_v43 = vld [vmem:[#allocation2 + $0x18] sm:$0xf] }
 0x227   :  { %v1067_v22 = vsel %vm6586_vm10, %v912_v37, %v1066_v55  ;;  %v929_v6 = vrot.slane %v925_v50, 4  ;;  %v6601_v51 = vor.u32 %v1006_v11, %v6593_v5  ;;  %v6603_v36 = vrot.slane %v1011_v59, 7  ;;  %v1090_v55 = vld [vmem:[#allocation2 + $0x30] sm:$0xf]  ;;  %v1093_v59 = vld [vmem:[#allocation2 + $0x34] sm:$0x1] }
 0x228   :  { %1068 = vst [vmem:[#allocation2 + $0x10] sm:$0xf] %v1067_v22  ;;  %v1070_v35 = vsel %vm6327_vm7, %v913_v17, %v1069_v18  ;;  %v904_v39 = vor.u32 %v902_v44, %v901_v33  ;;  %v905_v54 = vrot.slane %v901_v33, 4  ;;  %v1079_v63 = vsel %vm6586_vm10, %v928_v47, %v1078_v42  ;;  %v1084_v11 = vld [vmem:[#allocation2 + $0x28] sm:$0xf] }
 0x229   :  { %1071 = vst [vmem:[#allocation2 + $0x14] sm:$0x1] %v1070_v35  ;;  %v1082_v13 = vsel %vm6327_vm7, %v929_v6, %v1081_v45  ;;  %v920_v50 = vor.u32 %v918_v38, %v6551_v21  ;;  %1080 = vst [vmem:[#allocation2 + $0x20] sm:$0xf] %v1079_v63  ;;  %v921_v44 = vrot.slane %v6551_v21, 4  ;;  %v944_v37 = vor.u32 %v942_v25, %v6563_v48 }
 0x22a   :  { %v1061_v18 = vsel %vm6586_vm10, %v904_v39, %v1060_v24  ;;  %1083 = vst [vmem:[#allocation2 + $0x24] sm:$0x1] %v1082_v13  ;;  %v945_v42 = vrot.slane %v6563_v48, 4  ;;  %v1087_v17 = vld [vmem:[#allocation2 + $0x2c] sm:$0x1]  ;;  %v1064_v46 = vsel %vm6327_vm7, %v905_v54, %v1063_v26  ;;  %v936_v33 = vor.u32 %v934_v0, %v6557_v27 }
 0x22b   :  { %1062 = vst [vmem:[#allocation2 + $0x8] sm:$0xf] %v1061_v18  ;;  %v1073_v38 = vsel %vm6586_vm10, %v920_v50, %v1072_v43  ;;  %v937_v45 = vrot.slane %v6557_v27, 4  ;;  %v1096_v21 = vld [vmem:[#allocation2 + $0x38] sm:$0xf]  ;;  %v1076_v25 = vsel %vm6327_vm7, %v921_v44, %v1075_v29  ;;  %v1091_v48 = vsel %vm6586_vm10, %v944_v37, %v1090_v55 }
 0x22c   :  { %1065 = vst [vmem:[#allocation2 + $0xc] sm:$0x1] %v1064_v46  ;;  %1074 = vst [vmem:[#allocation2 + $0x18] sm:$0xf] %v1073_v38  ;;  %v1094_v22 = vsel %vm6327_vm7, %v945_v42, %v1093_v59  ;;  %v952_v24 = vor.u32 %v950_v28, %v6567_v52  ;;  %v1114_v0 = vld [vmem:[#allocation2 + $0x60] sm:$0xf]  ;;  %v1085_v27 = vsel %vm6586_vm10, %v936_v33, %v1084_v11 }
 0x22d   :  { %v1117_v26 = vld [vmem:[#allocation2 + $0x64] sm:$0x1]  ;;  %1077 = vst [vmem:[#allocation2 + $0x1c] sm:$0x1] %v1076_v25  ;;  %1092 = vst [vmem:[#allocation2 + $0x30] sm:$0xf] %v1091_v48  ;;  %v1088_v47 = vsel %vm6327_vm7, %v937_v45, %v1087_v17  ;;  %v976_v35 = vor.u32 %v974_v31, %v6579_v57  ;;  %v968_v29 = vor.u32 %v966_v40, %v6569_v30 }
 0x22e   :  { %1095 = vst [vmem:[#allocation2 + $0x34] sm:$0x1] %v1094_v22  ;;  %v953_v6 = vrot.slane %v6567_v52, 4  ;;  %v1111_v28 = vld [vmem:[#allocation2 + $0x5c] sm:$0x1]  ;;  %v1097_v39 = vsel %vm6586_vm10, %v952_v24, %v1096_v21  ;;  %v977_v43 = vrot.slane %v6579_v57, 4  ;;  %v984_v57 = vor.u32 %v982_v49, %v6581_v12 }
 0x22f   :  { %1086 = vst [vmem:[#allocation2 + $0x28] sm:$0xf] %v1085_v27  ;;  %1089 = vst [vmem:[#allocation2 + $0x2c] sm:$0x1] %v1088_v47  ;;  %v969_v54 = vrot.slane %v6569_v30, 4  ;;  %v1115_v31 = vsel %vm6586_vm10, %v976_v35, %v1114_v0  ;;  %v985_v50 = vrot.slane %v6581_v12, 4  ;;  %v1109_v55 = vsel %vm6586_vm10, %v968_v29, %v1108_v7 }
 0x230   :  { %v1120_v52 = vld [vmem:[#allocation2 + $0x68] sm:$0xf]  ;;  %v1123_v63 = vld [vmem:[#allocation2 + $0x6c] sm:$0x1]  ;;  %v1199_v13 = vld [vmem:[#allocation2 + $0x10] sm:$0xe]  ;;  %v1100_v14 = vsel %vm6327_vm7, %v953_v6, %v1099_v58  ;;  %v1118_v30 = vsel %vm6327_vm7, %v977_v43, %v1117_v26  ;;  %v992_v16 = vor.u32 %v990_v53, %v6590_v1 }
 0x231   :  { %1098 = vst [vmem:[#allocation2 + $0x38] sm:$0xf] %v1097_v39  ;;  %v6659_v40 = vld [vmem:[#allocation2 + $0x14] sm:$0x1]  ;;  %1101 = vst [vmem:[#allocation2 + $0x3c] sm:$0x1] %v1100_v14  ;;  %v1112_v59 = vsel %vm6327_vm7, %v969_v54, %v1111_v28  ;;  %v1121_v17 = vsel %vm6586_vm10, %v984_v57, %v1120_v52  ;;  %v1124_v23 = vsel %vm6327_vm7, %v985_v50, %v1123_v63 }
 0x232   :  { %1116 = vst [vmem:[#allocation2 + $0x60] sm:$0xf] %v1115_v31  ;;  %v1129_v49 = vld [vmem:[#allocation2 + $0x74] sm:$0x1]  ;;  %v1132_v12 = vld [vmem:[#allocation2 + $0x78] sm:$0xf]  ;;  %v4938_v37 = vcombine.low %v1199_v13, %v6659_v40  ;;  %v1127_v33 = vsel %vm6586_vm10, %v992_v16, %v1126_v10 }
 0x233   :  { %v1138_v18 = vld [vmem:[#allocation2 + $0x80] sm:$0xf]  ;;  %v6672_v44 = vrot.slane %v1019_v20, 7  ;;  %v6675_v42 = vld [vmem:[#allocation2 + $0x24] sm:$0x1]  ;;  %v1014_v53 = vshll.u32 %v6545_v41, 16 }
 0x234   :  { %v1201_v11 = vld [vmem:[#allocation2 + $0x20] sm:$0xe]  ;;  %1119 = vst [vmem:[#allocation2 + $0x64] sm:$0x1] %v1118_v30  ;;  %1110 = vst [vmem:[#allocation2 + $0x58] sm:$0xf] %v1109_v55 }
 0x235   :  { %1113 = vst [vmem:[#allocation2 + $0x5c] sm:$0x1] %v1112_v59  ;;  %v1022_v46 = vshll.u32 %v6549_v19, 16  ;;  %v1198_v20 = vld [vmem:[#allocation2 + $0x8] sm:$0xe]  ;;  %v993_v38 = vrot.slane %v6590_v1, 4  ;;  %v4940_v41 = vcombine.low %v1201_v11, %v6675_v42  ;;  %v1000_v19 = vor.u32 %v998_v34, %v6596_v15 }
 0x236   :  { %1122 = vst [vmem:[#allocation2 + $0x68] sm:$0xf] %v1121_v17  ;;  %1125 = vst [vmem:[#allocation2 + $0x6c] sm:$0x1] %v1124_v23  ;;  %v1102_v45 = vld [vmem:[#allocation2 + $0x40] sm:$0xf]  ;;  %v1139_v1 = vsel %vm6586_vm10, %v6601_v51, %v1138_v18  ;;  %v1016_v27 = vor.u32 %v1014_v53, %v6603_v36 }
 0x237   :  { %v5828_v21 = vld [vmem:[%s8407_s5] sm:$0xff]   ;;  %v1559_v25 = vrot.slane %v4938_v37, 1  ;;  %v1178_v48 = vld [vmem:[#allocation2 + $0xc] sm:$0x1]  ;;  %v6689_v22 = vld [vmem:[#allocation2 + $0x8] sm:$0xf]  ;;  %v1024_v47 = vor.u32 %v1022_v46, %v6672_v44  ;;  %v1130_v6 = vsel %vm6327_vm7, %v993_v38, %v1129_v49  ;;  %v1103_v13 = vsel %vm6586_vm10, %v6577_v56, %v1102_v45 }
 0x238   :  { %1128 = vst [vmem:[#allocation2 + $0x70] sm:$0xf] %v1127_v33  ;;  %v961_v24 = vrot.slane %v6559_v2, 4  ;;  %v4937_v58 = vcombine.low %v1198_v20, %v1178_v48  ;;  %v6699_v0 = vld [vmem:[#allocation2 + $0x1c] sm:$0x1]  ;;  %5443 = vmatprep.subr.bf16.mxu0 %v5828_v21  ;;  %v1133_v2 = vsel %vm6586_vm10, %v1000_v19, %v1132_v12  ;;  %v4917_v7 = vcombine.low %v6689_v22, %v1178_v48  ;;  %v5829_v16 = vld [vmem:[%s8407_s5 + $0x8] sm:$0xff]  }
 0x239   :  { %v1200_v26 = vld [vmem:[#allocation2 + $0x18] sm:$0xe]  ;;  %1140 = vst [vmem:[#allocation2 + $0x80] sm:$0xf] %v1139_v1  ;;  %1581 = vrot.lane.b32.xlu0 %v1559_v25, %s6039_s2  ;;  %v1183_v32 = vld [vmem:[#allocation2 + $0x34] sm:$0x1]  ;;  %5444 = vmatpush3.bf16.msra.mxu0 %v5828_v21 }
 0x23a   :  { %v1203_v34 = vld [vmem:[#allocation2 + $0x30] sm:$0xe]  ;;  %v1105_v51 = vld [vmem:[#allocation2 + $0x44] sm:$0x1]  ;;  %v1558_v35 = vrot.slane %v4937_v58, 1  ;;  %v4939_v28 = vcombine.low %v1200_v26, %v6699_v0  ;;  %v1561_v29 = vrot.slane %v4940_v41, 1  ;;  %5445 = vmatprep.subr.bf16.mxu0 %v5829_v16 }
 0x23b   :  { %1131 = vst [vmem:[#allocation2 + $0x74] sm:$0x1] %v1130_v6  ;;  %1134 = vst [vmem:[#allocation2 + $0x78] sm:$0xf] %v1133_v2  ;;  %v1150_v39 = vld [vmem:[#allocation2 + $0x90] sm:$0xf]  ;;  %v4942_v54 = vcombine.low %v1203_v34, %v1183_v32  ;;  %v1106_v31 = vsel %vm6327_vm7, %v961_v24, %v1105_v51 }
 0x23c   :  { %v1144_v43 = vld [vmem:[#allocation2 + $0x88] sm:$0xf]  ;;  %v6710_v52 = vld [vmem:[#allocation2 + $0x2c] sm:$0x1]  ;;  %1579 = vrot.lane.b32.xlu1 %v1558_v35, %s6039_s2  ;;  %v6716_v14 = vld [vmem:[#allocation2 + $0x20] sm:$0xf]  ;;  %v1151_v10 = vsel %vm6586_vm10, %v1024_v47, %v1150_v39 }
 0x23d   :  { %v1202_v63 = vld [vmem:[#allocation2 + $0x28] sm:$0xe]  ;;  %1104 = vst [vmem:[#allocation2 + $0x40] sm:$0xf] %v1103_v13  ;;  %1585 = vrot.lane.b32.xlu0 %v1561_v29, %s6039_s2  ;;  %v6721_v57 = vld [vmem:[#allocation2 + $0x64] sm:$0x1]  ;;  %v1145_v56 = vsel %vm6586_vm10, %v1016_v27, %v1144_v43  ;;  %v4920_v49 = vcombine.low %v6716_v14, %v6675_v42  ;;  %5446 = vmatpush3.bf16.msra.mxu0 %v5829_v16 }
 0x23e   :  { %v1209_v50 = vld [vmem:[#allocation2 + $0x60] sm:$0xe]  ;;  %1107 = vst [vmem:[#allocation2 + $0x44] sm:$0x1] %v1106_v31  ;;  %v1327_v30 = vshll.u32 %v4917_v7, 16  ;;  %v1560_v55 = vrot.slane %v4939_v28, 1  ;;  %v4941_v59 = vcombine.low %v1202_v63, %v6710_v52 }
 0x23f   :  { %1152 = vst [vmem:[#allocation2 + $0x90] sm:$0xf] %v1151_v10  ;;  %1146 = vst [vmem:[#allocation2 + $0x88] sm:$0xf] %v1145_v56  ;;  %v1563_v12 = vrot.slane %v4942_v54, 1  ;;  %v4948_v62 = vcombine.low %v1209_v50, %v6721_v57  ;;  %v5830_v46 = vld [vmem:[%s8407_s5 + $0x10] sm:$0xff]  }
 0x240   :  { %v6733_v18 = vld [vmem:[#allocation2 + $0x3c] sm:$0x1]  ;;  %v1204_v37 = vld [vmem:[#allocation2 + $0x38] sm:$0xe]  ;;  %1583 = vrot.lane.b32.xlu1 %v1560_v55, %s6039_s2  ;;  %v6737_v11 = vld [vmem:[#allocation2 + $0x30] sm:$0xf]  ;;  %5447 = vmatprep.subr.bf16.mxu0 %v5830_v46 }
 0x241   :  { %1589 = vrot.lane.b32.xlu0 %v1563_v12, %s6039_s2  ;;  %v6740_v17 = vld [vmem:[#allocation2 + $0x10] sm:$0xf]  ;;  %v1562_v23 = vrot.slane %v4941_v59, 1  ;;  %v4943_v53 = vcombine.low %v1204_v37, %v6733_v18  ;;  %v1329_v42 = vrot.slane %v1327_v30, 1  ;;  %v6747_v20 = vcombine.low %v6737_v11, %v1183_v32  ;;  %v6749_v33 = vld [vmem:[#allocation2 + $0x5c] sm:$0x1]  ;;  %5448 = vmatpush3.bf16.msra.mxu0 %v5830_v46 }
 0x242   :  { %v1569_v38 = vrot.slane %v4948_v62, 1  ;;  %v1208_v45 = vld [vmem:[#allocation2 + $0x58] sm:$0xe]  ;;  %v1348_v21 = vshll.u32 %v4920_v49, 16  ;;  %v1325_v25 = vshrl.u32 %v4917_v7, 16  ;;  %v4918_v19 = vcombine.low %v6740_v17, %v6659_v40 }
 0x243   :  { %v1135_v48 = vld [vmem:[#allocation2 + $0x7c] sm:$0x1]  ;;  %v1141_v41 = vld [vmem:[#allocation2 + $0x84] sm:$0x1]  ;;  %v6755_v1 = vld [vmem:[#allocation2 + $0x18] sm:$0xf]  ;;  %v4947_v58 = vcombine.low %v1208_v45, %v6749_v33 }
 0x244   :  { %1587 = vrot.lane.b32.xlu1 %v1562_v23, %s6039_s2  ;;  %v1564_v24 = vrot.slane %v4943_v53, 1  ;;  %v6758_v26 = vld [vmem:[#allocation2 + $0x6c] sm:$0x1]  ;;  %v1330_v27 = vor.u32 %v1329_v42, %v1325_v25  ;;  %v1350_v47 = vrot.slane %v1348_v21, 1  ;;  %v1210_v32 = vld [vmem:[#allocation2 + $0x68] sm:$0xe]  ;;  %v6771_v35 = vcombine.low %v6755_v1, %v6699_v0 }
 0x245   :  { %1601 = vrot.lane.b32.xlu0 %v1569_v38, %s6039_s2  ;;  %v1362_v34 = vshll.u32 %v6747_v20, 16  ;;  %v1001_v6 = vrot.slane %v6596_v15, 4  ;;  %v5831_v2 = vld [vmem:[%s8407_s5 + $0x18] sm:$0xff]   ;;  %v6766_v40 = vld [vmem:[#allocation2 + $0x60] sm:$0xf]  ;;  %v1009_v51 = vrot.slane %v6593_v5, 4  ;;  %v4949_v29 = vcombine.low %v1210_v32, %v6758_v26 }
 0x246   :  { %v1346_v7 = vshrl.u32 %v4920_v49, 16  ;;  %v1153_v28 = vld [vmem:[#allocation2 + $0x94] sm:$0x1]  ;;  %5449 = vmatprep.subr.bf16.mxu0 %v5831_v2  ;;  %v6776_v39 = vld [vmem:[#allocation2 + $0x28] sm:$0xf]  ;;  %v1568_v43 = vrot.slane %v4947_v58, 1  ;;  %v4928_v63 = vcombine.low %v6766_v40, %v6721_v57 }
 0x247   :  { %v1136_v15 = vsel %vm6327_vm7, %v1001_v6, %v1135_v48  ;;  %v1334_v54 = vshll.u32 %v4918_v19, 16  ;;  %v1142_v5 = vsel %vm6327_vm7, %v1009_v51, %v1141_v41  ;;  %5450 = vmatpush3.bf16.msra.mxu0 %v5831_v2  ;;  %v5832_v0 = vld [vmem:[%s8407_s5 + $0x20] sm:$0xff]   ;;  %v1364_v31 = vrot.slane %v1362_v34, 1  ;;  %v6786_v50 = vld [vmem:[#allocation2 + $0x70] sm:$0xf] }
 0x248   :  { %1591 = vrot.lane.b32.xlu1 %v1564_v24, %s6039_s2  ;;  %1137 = vst [vmem:[#allocation2 + $0x7c] sm:$0x1] %v1136_v15  ;;  %v1351_v13 = vor.u32 %v1350_v47, %v1346_v7  ;;  %v1191_v10 = vld [vmem:[#allocation2 + $0x74] sm:$0x1]  ;;  %1143 = vst [vmem:[#allocation2 + $0x84] sm:$0x1] %v1142_v5  ;;  %5451 = vmatprep.subr.bf16.mxu0 %v5832_v0  ;;  %v4921_v59 = vcombine.low %v6776_v39, %v6710_v52 }
 0x249   :  { %1459 = vrot.lane.b32.xlu0 %v1330_v27, %s6040_s18  ;;  %v1025_v56 = vrot.slane %v6672_v44, 4  ;;  %v1211_v30 = vld [vmem:[#allocation2 + $0x70] sm:$0xe]  ;;  %v1147_v55 = vld [vmem:[#allocation2 + $0x8c] sm:$0x1]  ;;  %v1360_v57 = vshrl.u32 %v6747_v20, 16  ;;  %v4930_v62 = vcombine.low %v6786_v50, %v1191_v10 }
 0x24a   :  { %v1017_v49 = vrot.slane %v6603_v36, 4  ;;  %v5833_v44 = vld [vmem:[%s8407_s5 + $0x28] sm:$0xff]   ;;  %v1570_v12 = vrot.slane %v4949_v29, 1  ;;  %v1336_v37 = vrot.slane %v1334_v54, 1  ;;  %v1341_v23 = vshll.u32 %v6771_v35, 16 }
 0x24b   :  { %v1154_v16 = vsel %vm6327_vm7, %v1025_v56, %v1153_v28  ;;  %5452 = vmatpush3.bf16.msra.mxu0 %v5832_v0  ;;  %v1365_v52 = vor.u32 %v1364_v31, %v1360_v57  ;;  %v4950_v53 = vcombine.low %v1211_v30, %v1191_v10  ;;  %v1404_v42 = vshll.u32 %v4928_v63, 16  ;;  %v6805_v20 = vld [vmem:[#allocation2 + $0x80] sm:$0xf]  ;;  %v6810_v48 = vld [vmem:[#allocation2 + $0x38] sm:$0xf] }
 0x24c   :  { %1599 = vrot.lane.b32.xlu1 %v1568_v43, %s6039_s2  ;;  %1155 = vst [vmem:[#allocation2 + $0x94] sm:$0x1] %v1154_v16  ;;  %v1148_v46 = vsel %vm6327_vm7, %v1017_v49, %v1147_v55  ;;  %5453 = vmatprep.subr.bf16.mxu0 %v5833_v44  ;;  %v1332_v36 = vshrl.u32 %v4918_v19, 16  ;;  %v1343_v45 = vrot.slane %v1341_v23, 1  ;;  %v1355_v21 = vshll.u32 %v4921_v59, 16  ;;  %v6817_v19 = vld [vmem:[%s8407_s5 + $0x30] sm:$0xff]  }
 0x24d   :  { %1465 = vrot.lane.b32.xlu0 %v1351_v13, %s6040_s18  ;;  %1149 = vst [vmem:[#allocation2 + $0x8c] sm:$0x1] %v1148_v46  ;;  %v1571_v41 = vrot.slane %v4950_v53, 1  ;;  %v1406_v61 = vrot.slane %v1404_v42, 1  ;;  %v1418_v24 = vshll.u32 %v4930_v62, 16  ;;  %v1339_v27 = vshrl.u32 %v6771_v35, 16 }
 0x24e   :  { %v1337_v38 = vor.u32 %v1336_v37, %v1332_v36  ;;  %v1402_v47 = vshrl.u32 %v4928_v63, 16  ;;  %v4923_v32 = vcombine.low %v6810_v48, %v6733_v18  ;;  %v6825_v34 = vld [vmem:[#allocation2 + $0x58] sm:$0xf]  ;;  %v1357_v2 = vrot.slane %v1355_v21, 1  ;;  %v6828_v29 = vld [vmem:[#allocation2 + $0x40] sm:$0xf] }
 0x24f   :  { %v6808_v25 = vld [vmem:[#allocation2 + $0x84] sm:$0x1]  ;;  %5454 = vmatpush3.bf16.msra.mxu0 %v5833_v44  ;;  %v1344_v6 = vor.u32 %v1343_v45, %v1339_v27  ;;  %v1420_v7 = vrot.slane %v1418_v24, 1  ;;  %v1192_v15 = vld [vmem:[#allocation2 + $0x7c] sm:$0x1]  ;;  %v1353_v35 = vshrl.u32 %v4921_v59, 16  ;;  %v4927_v18 = vcombine.low %v6825_v34, %v6749_v33 }
 0x250   :  { %1603 = vrot.lane.b32.xlu1 %v1570_v12, %s6039_s2  ;;  %v4932_v58 = vcombine.low %v6805_v20, %v6808_v25  ;;  %5471 = vmatprep.subr.bf16.mxu0 %v6817_v19  ;;  %v1407_v51 = vor.u32 %v1406_v61, %v1402_v47  ;;  %v1212_v28 = vld [vmem:[#allocation2 + $0x78] sm:$0xe]  ;;  %v6830_v54 = vld [vmem:[#allocation2 + $0x44] sm:$0x1]  ;;  %v1416_v5 = vshrl.u32 %v4930_v62, 16  ;;  %v1369_v13 = vshll.u32 %v4923_v32, 16 }
 0x251   :  { %1469 = vrot.lane.b32.xlu0 %v1365_v52, %s6040_s18  ;;  %v1358_v0 = vor.u32 %v1357_v2, %v1353_v35  ;;  %v4951_v63 = vcombine.low %v1212_v28, %v1192_v15  ;;  %v6835_v31 = vld [vmem:[#allocation2 + $0x68] sm:$0xf]  ;;  %v4924_v30 = vcombine.low %v6828_v29, %v6830_v54  ;;  %v1213_v55 = vld [vmem:[#allocation2 + $0x80] sm:$0xe]  ;;  %v6840_v59 = vld [vmem:[#allocation2 + $0x90] sm:$0xf] }
 0x252   :  { %v1432_v43 = vshll.u32 %v4932_v58, 16  ;;  %v1421_v10 = vor.u32 %v1420_v7, %v1416_v5  ;;  %v1430_v33 = vshrl.u32 %v4932_v58, 16  ;;  %v6845_v16 = vld [vmem:[#allocation2 + $0x48] sm:$0xf]  ;;  %v4929_v49 = vcombine.low %v6835_v31, %v6758_v26  ;;  %v6849_v62 = vld [vmem:[#allocation2 + $0x4c] sm:$0x1] }
 0x253   :  { %v6842_v57 = vld [vmem:[#allocation2 + $0x94] sm:$0x1]  ;;  %v1572_v44 = vrot.slane %v4951_v63, 1  ;;  %v1371_v12 = vrot.slane %v1369_v13, 1  ;;  %v1397_v37 = vshll.u32 %v4927_v18, 16  ;;  %v4952_v53 = vcombine.low %v1213_v55, %v6808_v25 }
 0x254   :  { %1461 = vrot.lane.b32.xlu1 %v1337_v38, %s6040_s18  ;;  %v1434_v56 = vrot.slane %v1432_v43, 1  ;;  %v6851_v23 = vld [vmem:[#allocation2 + $0x78] sm:$0xf]  ;;  %v1376_v42 = vshll.u32 %v4924_v30, 16  ;;  %v4934_v46 = vcombine.low %v6840_v59, %v6842_v57  ;;  %v1367_v36 = vshrl.u32 %v4923_v32, 16 }
 0x255   :  { %1605 = vrot.lane.b32.xlu0 %v1571_v41, %s6039_s2  ;;  %v4925_v26 = vcombine.low %v6845_v16, %v6849_v62  ;;  %v6860_v38 = vld [vmem:[#allocation2 + $0x98] sm:$0xf]  ;;  %v4931_v45 = vcombine.low %v6851_v23, %v1192_v15  ;;  %v1399_v41 = vrot.slane %v1397_v37, 1  ;;  %v1411_v61 = vshll.u32 %v4929_v49, 16  ;;  %v6863_v25 = vld [vmem:[#allocation2 + $0x88] sm:$0xf] }
 0x256   :  { %v1435_v52 = vor.u32 %v1434_v56, %v1430_v33  ;;  %v1372_v21 = vor.u32 %v1371_v12, %v1367_v36  ;;  %v1196_v24 = vld [vmem:[#allocation2 + $0x9c] sm:$0x1]  ;;  %v1573_v58 = vrot.slane %v4952_v53, 1  ;;  %v1378_v27 = vrot.slane %v1376_v42, 1  ;;  %v1214_v36 = vld [vmem:[#allocation2 + $0x88] sm:$0xe] }
 0x257   :  { %v1446_v47 = vshll.u32 %v4934_v46, 16  ;;  %v1395_v32 = vshrl.u32 %v4927_v18, 16  ;;  %v1374_v2 = vshrl.u32 %v4924_v30, 16  ;;  %v4935_v7 = vcombine.low %v6860_v38, %v1196_v24 }
 0x258   :  { %1463 = vrot.lane.b32.xlu1 %v1344_v6, %s6040_s18  ;;  %v1194_v6 = vld [vmem:[#allocation2 + $0x8c] sm:$0x1]  ;;  %v1413_v28 = vrot.slane %v1411_v61, 1  ;;  %v1425_v43 = vshll.u32 %v4931_v45, 16  ;;  %v1409_v63 = vshrl.u32 %v4929_v49, 16  ;;  %v1444_v13 = vshrl.u32 %v4934_v46, 16 }
 0x259   :  { %1481 = vrot.lane.b32.xlu0 %v1407_v51, %s6040_s18  ;;  %v1383_v51 = vshll.u32 %v4925_v26, 16  ;;  %v1400_v15 = vor.u32 %v1399_v41, %v1395_v32  ;;  %v4933_v35 = vcombine.low %v6863_v25, %v1194_v6  ;;  %v1379_v5 = vor.u32 %v1378_v27, %v1374_v2  ;;  %v1205_v61 = vld [vmem:[#allocation2 + $0x40] sm:$0xe]  ;;  %v1215_v27 = vld [vmem:[#allocation2 + $0x90] sm:$0xe] }
 0x25a   :  { %v1381_v18 = vshrl.u32 %v4925_v26, 16  ;;  %v1453_v56 = vshll.u32 %v4935_v7, 16  ;;  %v1414_v30 = vor.u32 %v1413_v28, %v1409_v63  ;;  %v1427_v55 = vrot.slane %v1425_v43, 1  ;;  %v1578_v43 = vpop.permute.xlu0 %1577 }
 0x25b   :  { %v1439_v33 = vshll.u32 %v4933_v35, 16  ;;  %v1423_v12 = vshrl.u32 %v4931_v45, 16  ;;  %v1437_v46 = vshrl.u32 %v4933_v35, 16  ;;  %v4953_v41 = vcombine.low %v1214_v36, %v1194_v6  ;;  %v1216_v6 = vld [vmem:[#allocation2 + $0x98] sm:$0xe] }
 0x25c   :  { %1467 = vrot.lane.b32.xlu1 %v1358_v0, %s6040_s18  ;;  %v1448_v0 = vrot.slane %v1446_v47, 1  ;;  %v1455_v53 = vrot.slane %v1453_v56, 1  ;;  %v1206_v47 = vld [vmem:[#allocation2 + $0x48] sm:$0xe]  ;;  %v4954_v2 = vcombine.low %v1215_v27, %v6842_v57  ;;  %v4955_v28 = vcombine.low %v1216_v6, %v1196_v24  ;;  %v5998_v24 = vld [vmem:[#allocation2] sm:$0xf] }
 0x25d   :  { %1485 = vrot.lane.b32.xlu0 %v1421_v10, %s6040_s18  ;;  %v1385_v10 = vrot.slane %v1383_v51, 1  ;;  %v1428_v42 = vor.u32 %v1427_v55, %v1423_v12  ;;  %v1441_v49 = vrot.slane %v1439_v33, 1  ;;  %v1574_v45 = vrot.slane %v4953_v41, 1 }
 0x25e   :  { %v4945_v51 = vcombine.low %v1206_v47, %v6849_v62  ;;  %v6885_v35 = vpop.permute.xlu0 %1597 }
 0x25f   :  { %v1386_v37 = vor.u32 %v1385_v10, %v1381_v18 }
 0x260   :  { %1607 = vrot.lane.b32.xlu1 %v1572_v44, %s6039_s2  ;;  %v1449_v44 = vor.u32 %v1448_v0, %v1444_v13 }
 0x261   :  { %1489 = vrot.lane.b32.xlu0 %v1435_v52, %s6040_s18  ;;  %v1451_v52 = vshrl.u32 %v4935_v7, 16  ;;  %v1575_v7 = vrot.slane %v4954_v2, 1 }
 0x263   :  { %v1456_v26 = vor.u32 %v1455_v53, %v1451_v52 }
 0x264   :  { %1471 = vrot.lane.b32.xlu1 %v1372_v21, %s6040_s18  ;;  %v1442_v21 = vor.u32 %v1441_v49, %v1437_v46 }
 0x265   :  { %1609 = vrot.lane.b32.xlu0 %v1573_v58, %s6039_s2  ;;  %v4944_v58 = vcombine.low %v1205_v61, %v6830_v54  ;;  %v1576_v54 = vrot.slane %v4955_v28, 1 }
 0x267   :  { %v1565_v32 = vrot.slane %v4944_v58, 1 }
 0x268   :  { %1479 = vrot.lane.b32.xlu1 %v1400_v15, %s6040_s18  ;;  %v1566_v15 = vrot.slane %v4945_v51, 1 }
 0x269   :  { %1473 = vrot.lane.b32.xlu0 %v1379_v5, %s6040_s18  ;;  %v1458_v5 = vpop.permute.xlu0 %1457 }
 0x26c   :  { %1483 = vrot.lane.b32.xlu1 %v1414_v30, %s6040_s18  ;;  %v1619_v30 = vsel %vm94_vm0, %v5998_v24, %v1458_v5  ;;  %v5999_v5 = vld [vmem:[#allocation2 + $0x50] sm:$0xf] }
 0x26d   :  { %1493 = vrot.lane.b32.xlu0 %v1449_v44, %s6040_s18  ;;  %v1478_v57 = vpop.permute.xlu0 %1477  ;;  %v1679_v12 = vsel %vm1677_vm11, %v1619_v30, %v1578_v43  ;;  %v5839_v30 = vld [vmem:[%s8407_s5 + $0x58] sm:$0xff]  }
 0x270   :  { %1487 = vrot.lane.b32.xlu1 %v1428_v42, %s6040_s18 }
 0x271   :  { %1475 = vrot.lane.b32.xlu0 %v1386_v37, %s6040_s18 }
 0x274   :  { %1491 = vrot.lane.b32.xlu1 %v1442_v21, %s6040_s18 }
 0x275   :  { %1495 = vrot.lane.b32.xlu0 %v1456_v26, %s6040_s18 }
 0x278   :  { %1611 = vrot.lane.b32.xlu1 %v1574_v45, %s6039_s2 }
 0x27c   :  { %1593 = vrot.lane.b32.xlu1 %v1565_v32, %s6039_s2 }
 0x280   :  { %1613 = vrot.lane.b32.xlu1 %v1575_v7, %s6039_s2 }
 0x284   :  { %1595 = vrot.lane.b32.xlu1 %v1566_v15, %s6039_s2 }
 0x288   :  { %1615 = vrot.lane.b32.xlu1 %v1576_v54, %s6039_s2 }
 0x2ab   :  { %v1582_v0 = vpop.permute.xlu0 %1581 }
 0x2ae   :  { %v1580_v63 = vpop.permute.xlu1 %1579 }
 0x2af   :  { %v1586_v13 = vpop.permute.xlu0 %1585 }
 0x2b2   :  { %v1584_v62 = vpop.permute.xlu1 %1583 }
 0x2b3   :  { %v1590_v18 = vpop.permute.xlu0 %1589 }
 0x2b6   :  { %v1588_v10 = vpop.permute.xlu1 %1587 }
 0x2b7   :  { %v6887_v56 = vpop.permute.xlu0 %1601 }
 0x2ba   :  { %v1592_v55 = vpop.permute.xlu1 %1591 }
 0x2bb   :  { %v1460_v33 = vpop.permute.xlu0 %1459 }
 0x2bc   :  { %v1622_v44 = vsel %vm94_vm0, %v6689_v22, %v1460_v33 }
 0x2bd   :  { %v6894_v37 = vsel %vm1677_vm11, %v1622_v44, %v1580_v63  ;;  %v5838_v63 = vld [vmem:[%s8407_s5 + $0x50] sm:$0xff]  }
 0x2be   :  { %v4957_v52 = vcombine.low %v1679_v12, %v6894_v37  ;;  %v1600_v53 = vpop.permute.xlu1 %1599  ;;  %v5840_v12 = vld [vmem:[%s8407_s5 + $0x60] sm:$0xff]  }
 0x2bf   :  { %v1466_v49 = vpop.permute.xlu0 %1465 }
 0x2c0   :  { %5455 = vmatprep.mubr.msk.bf16.mxu0 %vm1812_vm12, %v4957_v52  ;;  %v1631_v45 = vsel %vm94_vm0, %v6716_v14, %v1466_v49 }
 0x2c1   :  { %v6922_v47 = vsel %vm1677_vm11, %v1631_v45, %v1586_v13 }
 0x2c2   :  { %v1604_v42 = vpop.permute.xlu1 %1603 }
 0x2c3   :  { %v1470_v26 = vpop.permute.xlu0 %1469 }
 0x2c4   :  { %v1637_v6 = vsel %vm94_vm0, %v6737_v11, %v1470_v26 }
 0x2c5   :  { %v1691_v54 = vsel %vm1677_vm11, %v1637_v6, %v1590_v18  ;;  %v5845_v6 = vld [vmem:[%s8407_s5 + $0x88] sm:$0xff]  }
 0x2c6   :  { %v1462_v36 = vpop.permute.xlu1 %1461 }
 0x2c7   :  { %v1625_v46 = vsel %vm94_vm0, %v6740_v17, %v1462_v36  ;;  %v5835_v17 = vld [vmem:[%s8407_s5 + $0x38] sm:$0xff]   ;;  %v1606_v32 = vpop.permute.xlu0 %1605 }
 0x2c8   :  { %v6903_v41 = vsel %vm1677_vm11, %v1625_v46, %v1582_v0  ;;  %v1649_v0 = vsel %vm94_vm0, %v5999_v5, %v1478_v57 }
 0x2ca   :  { %v1464_v21 = vpop.permute.xlu1 %1463 }
 0x2cb   :  { %v1628_v22 = vsel %vm94_vm0, %v6755_v1, %v1464_v21  ;;  %v1482_v7 = vpop.permute.xlu0 %1481 }
 0x2cc   :  { %v6906_v61 = vsel %vm1677_vm11, %v1628_v22, %v1584_v62  ;;  %v1699_v62 = vsel %vm1677_vm11, %v1649_v0, %v6885_v35 }
 0x2cd   :  { %v6912_v58 = vcombine.low %v6903_v41, %v6906_v61 }
 0x2ce   :  { %v1468_v27 = vpop.permute.xlu1 %1467 }
 0x2cf   :  { %v1634_v1 = vsel %vm94_vm0, %v6776_v39, %v1468_v27  ;;  %5456 = vmatmul.mubr.msk.bf16.vlgmr.msra.gmra.mrb[4].mxu0 %vm1812_vm12, %v6912_v58  ;;  %v5836_v39 = vld [vmem:[%s8407_s5 + $0x40] sm:$0xff]   ;;  %v1486_v18 = vpop.permute.xlu0 %1485  ;;  %v4992_v27 = vcombine.low %v6906_v61, %v6922_v47 }
 0x2d0   :  { %v6925_v14 = vsel %vm1677_vm11, %v1634_v1, %v1588_v10  ;;  %5472 = vmatpush3.bf16.msra.mxu0 %v6817_v19  ;;  %v5837_v19 = vld [vmem:[%s8407_s5 + $0x48] sm:$0xff]   ;;  %v1655_v10 = vsel %vm94_vm0, %v6766_v40, %v1482_v7  ;;  %v1661_v40 = vsel %vm94_vm0, %v6786_v50, %v1486_v18 }
 0x2d1   :  { %v6930_v2 = vcombine.low %v6922_v47, %v6925_v14  ;;  %5473 = vmatprep.subr.bf16.mxu0 %v5835_v17  ;;  %v1703_v35 = vsel %vm1677_vm11, %v1655_v10, %v6887_v56  ;;  %v1707_v56 = vsel %vm1677_vm11, %v1661_v40, %v1606_v32  ;;  %v2309_v18 = vld [vmem:[%s8409_s7 + $0x8] sm:$0xff]  ;;  %v2311_v10 = vld [vmem:[%s8409_s7 + $0x18] sm:$0xff] }
 0x2d2   :  { %v1608_v51 = vpop.permute.xlu1 %1607 }
 0x2d3   :  { %5459 = vmatprep.mubr.msk.bf16.mxu0 %vm1812_vm12, %v6930_v2  ;;  %v1490_v52 = vpop.permute.xlu0 %1489 }
 0x2d4   :  { %5474 = vmatpush3.bf16.msra.mxu0 %v5835_v17  ;;  %v1667_v46 = vsel %vm94_vm0, %v6805_v20, %v1490_v52  ;;  %v4991_v17 = vcombine.low %v6894_v37, %v6903_v41  ;;  %v5841_v20 = vld [vmem:[%s8407_s5 + $0x68] sm:$0xff]   ;;  %v5842_v41 = vld [vmem:[%s8407_s5 + $0x70] sm:$0xff]  }
 0x2d5   :  { %5475 = vmatprep.subr.bf16.mxu0 %v5836_v39 }
 0x2d6   :  { %v1472_v15 = vpop.permute.xlu1 %1471 }
 0x2d7   :  { %v1640_v28 = vsel %vm94_vm0, %v6810_v48, %v1472_v15  ;;  %v1610_v36 = vpop.permute.xlu0 %1609 }
 0x2d8   :  { %v6946_v43 = vsel %vm1677_vm11, %v1640_v28, %v1592_v55  ;;  %5476 = vmatpush3.bf16.msra.mxu0 %v5836_v39  ;;  %v1711_v21 = vsel %vm1677_vm11, %v1667_v46, %v1610_v36 }
 0x2d9   :  { %v6950_v11 = vcombine.low %v1691_v54, %v6946_v43  ;;  %5477 = vmatprep.subr.bf16.mxu0 %v5837_v19 }
 0x2da   :  { %v1480_v13 = vpop.permute.xlu1 %1479 }
 0x2db   :  { %v1652_v48 = vsel %vm94_vm0, %v6825_v34, %v1480_v13  ;;  %5460 = vmatmul.mubr.msk.bf16.gmra.mrb[8].mxu0 %vm1812_vm12, %v6950_v11  ;;  %v1474_v1 = vpop.permute.xlu0 %1473 }
 0x2dc   :  { %v1701_v57 = vsel %vm1677_vm11, %v1652_v48, %v1600_v53  ;;  %5478 = vmatpush3.bf16.msra.mxu0 %v5837_v19  ;;  %v1643_v37 = vsel %vm94_vm0, %v6828_v29, %v1474_v1  ;;  %v5844_v29 = vld [vmem:[%s8407_s5 + $0x80] sm:$0xff]  }
 0x2dd   :  { %v4961_v24 = vcombine.low %v1699_v62, %v1701_v57  ;;  %5479 = vmatprep.subr.bf16.mxu0 %v5838_v63  ;;  %v4995_v39 = vcombine.low %v1701_v57, %v1703_v35  ;;  %v2308_v62 = vld [vmem:[%s8409_s7] sm:$0xff] }
 0x2de   :  { %v1484_v34 = vpop.permute.xlu1 %1483  ;;  %v7061_v57 = vpack.c.bf16 %v2309_v18, %v2308_v62 }
 0x2df   :  { %v1658_v55 = vsel %vm94_vm0, %v6835_v31, %v1484_v34  ;;  %5463 = vmatprep.mubr.msk.bf16.mxu0 %vm1812_vm12, %v4961_v24  ;;  %v1494_v19 = vpop.permute.xlu0 %1493  ;;  %v2313_v34 = vld [vmem:[%s8409_s7 + $0x28] sm:$0xff] }
 0x2e0   :  { %v1705_v33 = vsel %vm1677_vm11, %v1658_v55, %v1604_v42  ;;  %5480 = vmatpush3.bf16.msra.mxu0 %v5838_v63  ;;  %v1673_v28 = vsel %vm94_vm0, %v6840_v59, %v1494_v19  ;;  %5633 = vmatpush3.bf16.msra.mxu1 %v7061_v57 }
 0x2e1   :  { %v6975_v44 = vcombine.low %v1703_v35, %v1705_v33  ;;  %5481 = vmatprep.subr.bf16.mxu0 %v5839_v30  ;;  %5634 = vmatprep.subr.bf16.mxu1 %v6035_v3  ;;  %v2314_v35 = vld [vmem:[%s8409_s7 + $0x30] sm:$0xff] }
 0x2e2   :  { %v1488_v31 = vpop.permute.xlu1 %1487 }
 0x2e3   :  { %v1664_v53 = vsel %vm94_vm0, %v6851_v23, %v1488_v31  ;;  %5464 = vmatmul.mubr.msk.bf16.gmra.mrb[12].mxu0 %vm1812_vm12, %v6975_v44  ;;  %v1476_v5 = vpop.permute.xlu0 %1475 }
 0x2e4   :  { %v1709_v42 = vsel %vm1677_vm11, %v1664_v53, %v1608_v51  ;;  %5482 = vmatpush3.bf16.msra.mxu0 %v5839_v30  ;;  %v4996_v51 = vcombine.low %v1705_v33, %v1707_v56  ;;  %v1646_v0 = vsel %vm94_vm0, %v6845_v16, %v1476_v5  ;;  %v2312_v30 = vld [vmem:[%s8409_s7 + $0x20] sm:$0xff]  ;;  %v2315_v33 = vld [vmem:[%s8409_s7 + $0x38] sm:$0xff] }
 0x2e5   :  { %v6986_v50 = vcombine.low %v1707_v56, %v1709_v42  ;;  %5499 = vmatprep.subr.bf16.mxu0 %v5840_v12  ;;  %v4997_v7 = vcombine.low %v1709_v42, %v1711_v21  ;;  %v7077_v55 = vpack.c.bf16 %v2313_v34, %v2312_v30  ;;  %v7087_v40 = vpack.c.bf16 %v2315_v33, %v2314_v35 }
 0x2e6   :  { %v1492_v49 = vpop.permute.xlu1 %1491 }
 0x2e7   :  { %5467 = vmatprep.mubr.msk.bf16.mxu0 %vm1812_vm12, %v6986_v50  ;;  %v1670_v23 = vsel %vm94_vm0, %v6863_v25, %v1492_v49  ;;  %v4993_v25 = vcombine.low %v6925_v14, %v1691_v54  ;;  %v5843_v14 = vld [vmem:[%s8407_s5 + $0x78] sm:$0xff]  }
 0x2ea   :  { %v1612_v26 = vpop.permute.xlu1 %1611 }
 0x2eb   :  { %v1713_v22 = vsel %vm1677_vm11, %v1670_v23, %v1612_v26 }
 0x2ec   :  { %v4964_v45 = vcombine.low %v1711_v21, %v1713_v22 }
 0x2ee   :  { %5468 = vmatmul.mubr.msk.bf16.gmra.mrb[16].mxu0 %vm1812_vm12, %v4964_v45  ;;  %v1594_v32 = vpop.permute.xlu1 %1593 }
 0x2ef   :  { %5483 = vmatprep.mubr.msk.bf16.mxu0 %vm1812_vm12, %v4991_v17  ;;  %v1695_v61 = vsel %vm1677_vm11, %v1643_v37, %v1594_v32 }
 0x2f0   :  { %v4994_v47 = vcombine.low %v6946_v43, %v1695_v61 }
 0x2f2   :  { %v1614_v15 = vpop.permute.xlu1 %1613 }
 0x2f3   :  { %v1715_v54 = vsel %vm1677_vm11, %v1673_v28, %v1614_v15 }
 0x2f4   :  { %v4998_v43 = vcombine.low %v1713_v22, %v1715_v54 }
 0x2f6   :  { %5484 = vmatmul.mubr.msk.bf16.vlgmr.msra.gmra.mrb[4].mxu0 %vm1812_vm12, %v4992_v27  ;;  %v1596_v63 = vpop.permute.xlu1 %1595 }
 0x2f7   :  { %5500 = vmatpush3.bf16.msra.mxu0 %v5840_v12  ;;  %5487 = vmatprep.mubr.msk.bf16.mxu0 %vm1812_vm12, %v4993_v25  ;;  %v1697_v59 = vsel %vm1677_vm11, %v1646_v0, %v1596_v63 }
 0x2f8   :  { %5501 = vmatprep.subr.bf16.mxu0 %v5841_v20  ;;  %v5025_v13 = vcombine.low %v1695_v61, %v1697_v59 }
 0x2fa   :  { %v1616_v16 = vpop.permute.xlu1 %1615 }
 0x2fb   :  { %5502 = vmatpush3.bf16.msra.mxu0 %v5841_v20 }
 0x2fc   :  { %5503 = vmatprep.subr.bf16.mxu0 %v5842_v41 }
 0x2fe   :  { %5488 = vmatmul.mubr.msk.bf16.gmra.mrb[8].mxu0 %vm1812_vm12, %v4994_v47 }
 0x2ff   :  { %5491 = vmatprep.mubr.msk.bf16.mxu0 %vm1812_vm12, %v4995_v39  ;;  %5504 = vmatpush3.bf16.msra.mxu0 %v5842_v41 }
 0x300   :  { %5505 = vmatprep.subr.bf16.mxu0 %v5843_v14 }
 0x303   :  { %5506 = vmatpush3.bf16.msra.mxu0 %v5843_v14 }
 0x304   :  { %5507 = vmatprep.subr.bf16.mxu0 %v5844_v29 }
 0x306   :  { %5492 = vmatmul.mubr.msk.bf16.gmra.mrb[12].mxu0 %vm1812_vm12, %v4996_v51 }
 0x307   :  { %5495 = vmatprep.mubr.msk.bf16.mxu0 %vm1812_vm12, %v4997_v7  ;;  %5508 = vmatpush3.bf16.msra.mxu0 %v5844_v29 }
 0x308   :  { %5509 = vmatprep.subr.bf16.mxu0 %v5845_v6 }
 0x30b   :  { %5510 = vmatpush3.bf16.msra.mxu0 %v5845_v6 }
 0x30c   :  { %4057 = vmatprep.subr.bf16.mxu0 %v8418_v60 }
 0x30e   :  { %5496 = vmatmul.mubr.msk.bf16.gmra.mrb[16].mxu0 %vm1812_vm12, %v4998_v43 }
 0x30f   :  { %5511 = vmatprep.mubr.msk.bf16.mxu0 %vm1812_vm12, %v6912_v58  ;;  %v1496_v58 = vpop.permute.xlu0 %1495 }
 0x310   :  { %v1676_v48 = vsel %vm94_vm0, %v6860_v38, %v1496_v58  ;;  %v2310_v38 = vld [vmem:[%s8409_s7 + $0x10] sm:$0xff] }
 0x311   :  { %v7067_v24 = vpack.c.bf16 %v2311_v10, %v2310_v38 }
 0x313   :  { %5636 = vmatpush3.bf16.msra.mxu1 %v7067_v24 }
 0x314   :  { %5637 = vmatprep.subr.bf16.mxu1 %v6035_v3 }
 0x316   :  { %5512 = vmatmul.mubr.msk.bf16.vlgmr.msra.gmra.mrb[4].mxu0 %vm1812_vm12, %v6930_v2  ;;  %v1717_v2 = vsel %vm1677_vm11, %v1676_v48, %v1616_v16 }
 0x317   :  { %5515 = vmatprep.mubr.msk.bf16.mxu0 %vm1812_vm12, %v6950_v11  ;;  %v5026_v11 = vcombine.low %v1715_v54, %v1717_v2  ;;  %5639 = vmatpush3.bf16.msra.mxu1 %v7077_v55 }
 0x318   :  { %5640 = vmatprep.subr.bf16.mxu1 %v6035_v3 }
 0x31b   :  { %5642 = vmatpush3.bf16.msra.mxu1 %v7087_v40 }
 0x31c   :  { %5643 = vmatprep.subr.bf16.mxu1 %v6035_v3 }
 0x31e   :  { %5516 = vmatmul.mubr.msk.bf16.gmra.mrb[8].mxu0 %vm1812_vm12, %v5025_v13 }
 0x31f   :  { %5519 = vmatprep.mubr.msk.bf16.mxu0 %vm1812_vm12, %v6975_v44  ;;  %v7095_v44 = vld [vmem:[%s8408_s6] ss:$0 sm:$0xff] }
 0x326   :  { %5520 = vmatmul.mubr.msk.bf16.gmra.mrb[12].mxu0 %vm1812_vm12, %v6986_v50 }
 0x327   :  { %5523 = vmatprep.mubr.msk.bf16.mxu0 %vm1812_vm12, %v4964_v45 }
 0x32e   :  { %5524 = vmatmul.mubr.msk.bf16.gmra.mrb[16].mxu0 %vm1812_vm12, %v5026_v11 }
 0x3e9   :  { %v5513_v12 = vpop.f32.mrb[4].mxu0 }
 0x3ea   :  { %v2227_v52 = vpop.f32.mrb[5].mxu0  ;;  %v7101_v42 = vadd.f32 %v5513_v12, %v7095_v44 }
 0x3eb   :  { %v7098_v31 = vadd.f32 %v7095_v44, %v2227_v52  ;;  %v5514_v53 = vpop.f32.mrb[6].mxu0 }
 0x3ec   :  { %v2230_v56 = vpop.f32.mrb[7].mxu0  ;;  %v7109_v36 = vadd.f32 %v5514_v53, %v7095_v44  ;;  %v2323_v21 = vsel %vm1677_vm11, %v7101_v42, 0.0  ;;  %v2364_v37 = vmul.f32 %v7101_v42, %v7101_v42 }
 0x3ed   :  { %v7104_v50 = vadd.f32 %v7095_v44, %v2230_v56  ;;  %v2320_v49 = vsel %vm1677_vm11, %v7098_v31, 0.0  ;;  %v2362_v22 = vmul.f32 %v7098_v31, %v7098_v31 }
 0x3ee   :  { %v2325_v20 = vsel %vm1677_vm11, %v7109_v36, 0.0  ;;  %v2365_v7 = vmul.f32 %v7109_v36, %v7109_v36  ;;  %v2381_v28 = vsel %vm1677_vm11, %v2364_v37, 0.0 }
 0x3ef   :  { %v2321_v46 = vsel %vm1677_vm11, %v7104_v50, 0.0  ;;  %v2363_v23 = vmul.f32 %v7104_v50, %v7104_v50  ;;  %v2378_v47 = vsel %vm1677_vm11, %v2362_v22, 0.0 }
 0x3f0   :  { %v2322_v26 = vadd.f32 %v2321_v46, %v2320_v49  ;;  %v2383_v2 = vsel %vm1677_vm11, %v2365_v7, 0.0 }
 0x3f1   :  { %v5517_v45 = vpop.f32.mrb[8].mxu0  ;;  %v2379_v25 = vsel %vm1677_vm11, %v2363_v23, 0.0 }
 0x3f2   :  { %v2324_v17 = vadd.f32 %v2323_v21, %v2322_v26  ;;  %v2243_v27 = vpop.f32.mrb[9].mxu0  ;;  %v7129_v14 = vadd.f32 %v5517_v45, %v7095_v44  ;;  %v2380_v51 = vadd.f32 %v2379_v25, %v2378_v47 }
 0x3f3   :  { %v7123_v1 = vadd.f32 %v7095_v44, %v2243_v27  ;;  %v5518_v32 = vpop.f32.mrb[10].mxu0 }
 0x3f4   :  { %v2326_v41 = vadd.f32 %v2325_v20, %v2324_v17  ;;  %v2246_v61 = vpop.f32.mrb[11].mxu0  ;;  %v2331_v54 = vsel %vm1677_vm11, %v7129_v14, 0.0  ;;  %v7144_v43 = vadd.f32 %v5518_v32, %v7095_v44  ;;  %v2382_v0 = vadd.f32 %v2381_v28, %v2380_v51 }
 0x3f5   :  { %v2327_v39 = vsel %vm1677_vm11, %v7123_v1, 0.0  ;;  %v7134_v29 = vadd.f32 %v7095_v44, %v2246_v61  ;;  %v2366_v63 = vmul.f32 %v7123_v1, %v7123_v1 }
 0x3f6   :  { %v2328_v6 = vadd.f32 %v2327_v39, %v2326_v41  ;;  %v2333_v62 = vsel %vm1677_vm11, %v7144_v43, 0.0  ;;  %v2384_v30 = vadd.f32 %v2383_v2, %v2382_v0 }
 0x3f7   :  { %v2329_v19 = vsel %vm1677_vm11, %v7134_v29, 0.0  ;;  %v2385_v34 = vsel %vm1677_vm11, %v2366_v63, 0.0  ;;  %v2367_v56 = vmul.f32 %v7134_v29, %v7134_v29 }
 0x3f8   :  { %v2330_v15 = vadd.f32 %v2329_v19, %v2328_v6  ;;  %v2386_v45 = vadd.f32 %v2385_v34, %v2384_v30 }
 0x3f9   :  { %v5521_v5 = vpop.f32.mrb[12].mxu0  ;;  %v2387_v47 = vsel %vm1677_vm11, %v2367_v56, 0.0 }
 0x3fa   :  { %v2332_v59 = vadd.f32 %v2331_v54, %v2330_v15  ;;  %v2259_v13 = vpop.f32.mrb[13].mxu0  ;;  %v7149_v58 = vadd.f32 %v5521_v5, %v7095_v44  ;;  %v2368_v5 = vmul.f32 %v7129_v14, %v7129_v14 }
 0x3fb   :  { %v7152_v48 = vadd.f32 %v7095_v44, %v2259_v13  ;;  %v5522_v16 = vpop.f32.mrb[14].mxu0 }
 0x3fc   :  { %v2262_v11 = vpop.f32.mrb[15].mxu0  ;;  %v7160_v38 = vadd.f32 %v5522_v16, %v7095_v44  ;;  %v2334_v35 = vadd.f32 %v2333_v62, %v2332_v59  ;;  %v2372_v33 = vmul.f32 %v7149_v58, %v7149_v58  ;;  %v2344_v46 = vsel %vm1677_vm11, %v7149_v58, 0.0 }
 0x3fd   :  { %v2370_v18 = vmul.f32 %v7152_v48, %v7152_v48  ;;  %v7163_v10 = vadd.f32 %v7095_v44, %v2262_v11  ;;  %v2341_v12 = vsel %vm1677_vm11, %v7152_v48, 0.0  ;;  %v2388_v16 = vadd.f32 %v2387_v47, %v2386_v45 }
 0x3fe   :  { %v2373_v26 = vmul.f32 %v7160_v38, %v7160_v38  ;;  %v2335_v25 = vrot.slane %v2334_v35, 4  ;;  %v2402_v32 = vsel %vm1677_vm11, %v2372_v33, 0.0  ;;  %v2346_v37 = vsel %vm1677_vm11, %v7160_v38, 0.0 }
 0x3ff   :  { %v2342_v52 = vsel %vm1677_vm11, %v7163_v10, 0.0  ;;  %v2371_v53 = vmul.f32 %v7163_v10, %v7163_v10  ;;  %v2399_v23 = vsel %vm1677_vm11, %v2370_v18, 0.0 }
 0x400   :  { %v2343_v49 = vadd.f32 %v2342_v52, %v2341_v12  ;;  %v2404_v7 = vsel %vm1677_vm11, %v2373_v26, 0.0  ;;  %v2336_v13 = vadd.f32 %v2335_v25, %v2334_v35  ;;  %v2389_v52 = vsel %vm1677_vm11, %v2368_v5, 0.0 }
 0x401   :  { %v2400_v21 = vsel %vm1677_vm11, %v2371_v53, 0.0  ;;  %v5525_v22 = vpop.f32.mrb[16].mxu0  ;;  %v2369_v53 = vmul.f32 %v7144_v43, %v7144_v43 }
 0x402   :  { %v2345_v17 = vadd.f32 %v2344_v46, %v2343_v49  ;;  %v2401_v27 = vadd.f32 %v2400_v21, %v2399_v23  ;;  %v2275_v20 = vpop.f32.mrb[17].mxu0  ;;  %v7190_v51 = vadd.f32 %v5525_v22, %v7095_v44  ;;  %v2337_v46 = vrot.slane %v2336_v13, 2 }
 0x403   :  { %v7186_v41 = vadd.f32 %v7095_v44, %v2275_v20  ;;  %v5526_v61 = vpop.f32.mrb[18].mxu0  ;;  %v2390_v23 = vadd.f32 %v2389_v52, %v2388_v16 }
 0x404   :  { %v2403_v39 = vadd.f32 %v2402_v32, %v2401_v27  ;;  %v2347_v6 = vadd.f32 %v2346_v37, %v2345_v17  ;;  %v2278_v19 = vpop.f32.mrb[19].mxu0  ;;  %v7203_v59 = vadd.f32 %v5526_v61, %v7095_v44  ;;  %v2376_v62 = vmul.f32 %v7190_v51, %v7190_v51 }
 0x405   :  { %v2348_v15 = vsel %vm1677_vm11, %v7186_v41, 0.0  ;;  %v2374_v28 = vmul.f32 %v7186_v41, %v7186_v41  ;;  %v7198_v54 = vadd.f32 %v7095_v44, %v2278_v19  ;;  %v2352_v33 = vsel %vm1677_vm11, %v7190_v51, 0.0 }
 0x406   :  { %v2349_v0 = vadd.f32 %v2348_v15, %v2347_v6  ;;  %v2405_v63 = vadd.f32 %v2404_v7, %v2403_v39  ;;  %v2377_v44 = vmul.f32 %v7203_v59, %v7203_v59  ;;  %v2354_v56 = vsel %vm1677_vm11, %v7203_v59, 0.0 }
 0x407   :  { %v2406_v2 = vsel %vm1677_vm11, %v2374_v28, 0.0  ;;  %v2350_v11 = vsel %vm1677_vm11, %v7198_v54, 0.0  ;;  %v2375_v34 = vmul.f32 %v7198_v54, %v7198_v54  ;;  %v2410_v26 = vsel %vm1677_vm11, %v2376_v62, 0.0 }
 0x408   :  { %v2407_v18 = vadd.f32 %v2406_v2, %v2405_v63  ;;  %v2351_v30 = vadd.f32 %v2350_v11, %v2349_v0  ;;  %v2412_v45 = vsel %vm1677_vm11, %v2377_v44, 0.0  ;;  %v2391_v27 = vsel %vm1677_vm11, %v2369_v53, 0.0  ;;  %v2318_v44 = vld [vmem:[%s8410_s8 + $0x10] sm:$0xff] }
 0x409   :  { %v2408_v12 = vsel %vm1677_vm11, %v2375_v34, 0.0  ;;  %v2392_v25 = vadd.f32 %v2391_v27, %v2390_v23  ;;  %v2338_v37 = vadd.f32 %v2337_v46, %v2336_v13 }
 0x40a   :  { %v2353_v35 = vadd.f32 %v2352_v33, %v2351_v30  ;;  %v2409_v49 = vadd.f32 %v2408_v12, %v2407_v18  ;;  %v2317_v30 = vld [vmem:[%s8410_s8 + $0x8] sm:$0xff] }
 0x40b   :  { %v2393_v39 = vrot.slane %v2392_v25, 4  ;;  %v2339_v6 = vrot.slane %v2338_v37, 1 }
 0x40c   :  { %v2355_v21 = vadd.f32 %v2354_v56, %v2353_v35  ;;  %v2411_v22 = vadd.f32 %v2410_v26, %v2409_v49 }
 0x40d   :  { %v2394_v28 = vadd.f32 %v2393_v39, %v2392_v25  ;;  %v2340_v5 = vadd.f32 %v2339_v6, %v2338_v37  ;;  %v2978_v25 = vld [vmem:[#allocation3 + $0x10] sm:$0x1]  ;;  %v2984_v39 = vld [vmem:[#allocation3 + $0x20] sm:$0x1] }
 0x40e   :  { %v2356_v17 = vrot.slane %v2355_v21, 4  ;;  %v2413_v20 = vadd.f32 %v2412_v45, %v2411_v22  ;;  %v2985_v6 = vsel %vm7263_vm14, 0, %v2984_v39 }
 0x40f   :  { %v2395_v13 = vrot.slane %v2394_v28, 2  ;;  %2986 = vst [vmem:[#allocation3 + $0x20] sm:$0x1] %v2985_v6  ;;  %v3014_v6 = vld [vmem:[#allocation3 + $0x80] sm:$0x1] }
 0x410   :  { %v2357_v32 = vadd.f32 %v2356_v17, %v2355_v21  ;;  %v2414_v47 = vrot.slane %v2413_v20, 4  ;;  %v3024_v17 = vld [vmem:[#allocation3 + $0xc] sm:$0x1] }
 0x411   :  { %v2396_v11 = vadd.f32 %v2395_v13, %v2394_v28  ;;  %v3025_v37 = vsel %vm7273_vm15, 0, %v3024_v17  ;;  %v3039_v13 = vld [vmem:[#allocation3 + $0x34] sm:$0x1]  ;;  %v3008_v17 = vld [vmem:[#allocation3 + $0x70] sm:$0x1] }
 0x412   :  { %v2358_v61 = vrot.slane %v2357_v32, 2  ;;  %v2415_v7 = vadd.f32 %v2414_v47, %v2413_v20  ;;  %3026 = vst [vmem:[#allocation3 + $0xc] sm:$0x1] %v3025_v37  ;;  %v5868_v20 = vld [vmem:[%s8413_s11 + $0x68] sm:$0xff]  }
 0x413   :  { %v2397_v18 = vrot.slane %v2396_v11, 1 }
 0x414   :  { %v2359_v19 = vadd.f32 %v2358_v61, %v2357_v32  ;;  %v2416_v16 = vrot.slane %v2415_v7, 2  ;;  %v3027_v32 = vld [vmem:[#allocation3 + $0x14] sm:$0x1]  ;;  %v2979_v61 = vsel %vm7263_vm14, 0, %v2978_v25 }
 0x415   :  { %v3028_v47 = vsel %vm7273_vm15, 0, %v3027_v32  ;;  %2980 = vst [vmem:[#allocation3 + $0x10] sm:$0x1] %v2979_v61  ;;  %v3057_v25 = vld [vmem:[#allocation3 + $0x74] sm:$0x1] }
 0x416   :  { %v2360_v15 = vrot.slane %v2359_v19, 1  ;;  %v2417_v2 = vadd.f32 %v2416_v16, %v2415_v7  ;;  %3029 = vst [vmem:[#allocation3 + $0x14] sm:$0x1] %v3028_v47  ;;  %v2981_v7 = vld [vmem:[#allocation3 + $0x18] sm:$0x1]  ;;  %v3058_v37 = vsel %vm7273_vm15, 0, %v3057_v25 }
 0x417   :  { %v2982_v28 = vsel %vm7263_vm14, 0, %v2981_v7  ;;  %v3011_v32 = vld [vmem:[#allocation3 + $0x78] sm:$0x1]  ;;  %v3060_v47 = vld [vmem:[#allocation3 + $0x7c] sm:$0x1]  ;;  %v3015_v7 = vsel %vm7263_vm14, 0, %v3014_v6 }
 0x418   :  { %v2361_v0 = vadd.f32 %v2360_v15, %v2359_v19  ;;  %v2418_v62 = vrot.slane %v2417_v2, 1  ;;  %v3033_v19 = vld [vmem:[#allocation3 + $0x24] sm:$0x1]  ;;  %2983 = vst [vmem:[#allocation3 + $0x18] sm:$0x1] %v2982_v28  ;;  %v3012_v61 = vsel %vm7263_vm14, 0, %v3011_v32 }
 0x419   :  { %v3034_v15 = vsel %vm7273_vm15, 0, %v3033_v19  ;;  %3059 = vst [vmem:[#allocation3 + $0x74] sm:$0x1] %v3058_v37  ;;  %3013 = vst [vmem:[#allocation3 + $0x78] sm:$0x1] %v3012_v61  ;;  %v3061_v39 = vsel %vm7273_vm15, 0, %v3060_v47 }
 0x41a   :  { %v2422_v63 = vsel %vm197_vm2, %v2361_v0, %v2340_v5  ;;  %v2419_v34 = vadd.f32 %v2418_v62, %v2417_v2  ;;  %v3030_v5 = vld [vmem:[#allocation3 + $0x1c] sm:$0x1]  ;;  %v2990_v0 = vld [vmem:[#allocation3 + $0x30] sm:$0x1]  ;;  %3035 = vst [vmem:[#allocation3 + $0x24] sm:$0x1] %v3034_v15 }
 0x41b   :  { %5544 = vmatmul.mubr.msk.f32.vlgmr.msra.gmra.mrb[4].mxu1 %vm1677_vm11, %v2422_v63  ;;  %v3031_v63 = vsel %vm7273_vm15, 0, %v3030_v5  ;;  %v2991_v16 = vsel %vm7263_vm14, 0, %v2990_v0  ;;  %v2987_v2 = vld [vmem:[#allocation3 + $0x28] sm:$0x1]  ;;  %v3063_v19 = vld [vmem:[#allocation3 + $0x84] sm:$0x1] }
 0x41c   :  { %5645 = vmatpush3.bf16.msra.mxu1 %v7061_v57  ;;  %5562 = vmatprep.mubr.msk.f32.mxu1 %vm6036_vm1, %v6037_v9  ;;  %v2316_v57 = vld [vmem:[%s8410_s8] sm:$0xff]  ;;  %3032 = vst [vmem:[#allocation3 + $0x1c] sm:$0x1] %v3031_v63  ;;  %2992 = vst [vmem:[#allocation3 + $0x30] sm:$0x1] %v2991_v16  ;;  %v2988_v62 = vsel %vm7263_vm14, 0, %v2987_v2 }
 0x41d   :  { %5646 = vmatprep.subr.bf16.mxu1 %v6035_v3  ;;  %v5656_v33 = vpack.c.bf16 %v2317_v30, %v2316_v57  ;;  %v2996_v57 = vld [vmem:[#allocation3 + $0x40] sm:$0x1]  ;;  %2989 = vst [vmem:[#allocation3 + $0x28] sm:$0x1] %v2988_v62  ;;  %3062 = vst [vmem:[#allocation3 + $0x7c] sm:$0x1] %v3061_v39 }
 0x41e   :  { %v3064_v15 = vsel %vm7273_vm15, 0, %v3063_v19  ;;  %v3017_v28 = vld [vmem:[#allocation3 + $0x88] sm:$0x1]  ;;  %v3066_v5 = vld [vmem:[#allocation3 + $0x8c] sm:$0x1]  ;;  %v5870_v37 = vld [vmem:[%s8413_s11 + $0x78] sm:$0xff]  }
 0x41f   :  { %3016 = vst [vmem:[#allocation3 + $0x80] sm:$0x1] %v3015_v7  ;;  %3065 = vst [vmem:[#allocation3 + $0x84] sm:$0x1] %v3064_v15  ;;  %v3018_v0 = vsel %vm7263_vm14, 0, %v3017_v28  ;;  %v3067_v63 = vsel %vm7273_vm15, 0, %v3066_v5 }
 0x420   :  { %5648 = vmatpush3.bf16.msra.mxu1 %v7067_v24  ;;  %v2398_v24 = vadd.f32 %v2397_v18, %v2396_v11  ;;  %v3040_v11 = vsel %vm7273_vm15, 0, %v3039_v13  ;;  %v3036_v18 = vld [vmem:[#allocation3 + $0x2c] sm:$0x1]  ;;  %v3020_v16 = vld [vmem:[#allocation3 + $0x90] sm:$0x1]  ;;  %v5878_v19 = vld [vmem:[%s8413_s11 + $0x18] sm:$0xff]  }
 0x421   :  { %5649 = vmatprep.subr.bf16.mxu1 %v6035_v3  ;;  %3041 = vst [vmem:[#allocation3 + $0x34] sm:$0x1] %v3040_v11  ;;  %v3037_v30 = vsel %vm7273_vm15, 0, %v3036_v18  ;;  %3019 = vst [vmem:[#allocation3 + $0x88] sm:$0x1] %v3018_v0  ;;  %v3021_v13 = vsel %vm7263_vm14, 0, %v3020_v16 }
 0x422   :  { %3038 = vst [vmem:[#allocation3 + $0x2c] sm:$0x1] %v3037_v30  ;;  %3068 = vst [vmem:[#allocation3 + $0x8c] sm:$0x1] %v3067_v63  ;;  %v3069_v2 = vld [vmem:[#allocation3 + $0x94] sm:$0x1] }
 0x423   :  { %3022 = vst [vmem:[#allocation3 + $0x90] sm:$0x1] %v3021_v13  ;;  %v3070_v11 = vsel %vm7273_vm15, 0, %v3069_v2  ;;  %v5871_v16 = vld [vmem:[%s8413_s11 + $0x80] sm:$0xff]  }
 0x424   :  { %5651 = vmatpush3.bf16.msra.mxu1 %v7077_v55  ;;  %v2498_v55 = vsel %vm197_vm2, %v2419_v34, %v2398_v24  ;;  %v2997_v34 = vsel %vm7263_vm14, 0, %v2996_v57  ;;  %v3045_v24 = vld [vmem:[#allocation3 + $0x44] sm:$0x1]  ;;  %3071 = vst [vmem:[#allocation3 + $0x94] sm:$0x1] %v3070_v11 }
 0x425   :  { %5652 = vmatprep.subr.bf16.mxu1 %v6035_v3  ;;  %2998 = vst [vmem:[#allocation3 + $0x40] sm:$0x1] %v2997_v34  ;;  %v7409_v13 = vld [vmem:[%s8412_s10] ss:$0 sm:$0xff] }
 0x428   :  { %5654 = vmatpush3.bf16.msra.mxu1 %v7087_v40  ;;  %v2319_v40 = vld [vmem:[%s8410_s8 + $0x18] sm:$0xff] }
 0x429   :  { %5655 = vmatprep.subr.bf16.mxu1 %v6035_v3  ;;  %v5659_v35 = vpack.c.bf16 %v2319_v40, %v2318_v44  ;;  %v3042_v40 = vld [vmem:[#allocation3 + $0x3c] sm:$0x1] }
 0x42b   :  { %5563 = vmatmul.mubr.msk.f32.vlgmr.msra.gmra.mrb[6].mxu1 %vm1677_vm11, %v2498_v55  ;;  %v3046_v55 = vsel %vm7273_vm15, 0, %v3045_v24 }
 0x42c   :  { %5657 = vmatpush3.bf16.msra.mxu1 %v5656_v33  ;;  %5573 = vmatprep.mubr.msk.f32.mxu1 %vm6036_vm1, %v6037_v9  ;;  %3047 = vst [vmem:[#allocation3 + $0x44] sm:$0x1] %v3046_v55 }
 0x42d   :  { %5658 = vmatprep.subr.bf16.mxu1 %v6035_v3 }
 0x430   :  { %5660 = vmatpush3.bf16.msra.mxu1 %v5659_v35 }
 0x431   :  { %5661 = vmatprep.subr.bf16.mxu1 %v6035_v3 }
 0x4ee   :  { %v2491_v12 = vpop.f32.mrb[4].mxu1 }
 0x4ef   :  { %v2495_v52 = vmul.f32 0.0078125, %v2491_v12  ;;  %v5545_v53 = vpop.f32.mrb[5].mxu1  ;;  %v2999_v12 = vld [vmem:[#allocation3 + $0x58] sm:$0x1] }
 0x4f0   :  { %v3048_v53 = vld [vmem:[#allocation3 + $0x5c] sm:$0x1] }
 0x4f1   :  { %5574 = vmatmul.mubr.msk.f32.vlgmr.msra.gmra.mrb[8].mxu1 %vm94_vm0, %v2495_v52  ;;  %v2572_v49 = vmul.f32 %v2495_v52, %v2495_v52  ;;  %v3000_v52 = vsel %vm7263_vm14, 0, %v2999_v12 }
 0x4f2   :  { %5663 = vmatpush3.bf16.msra.mxu1 %v5656_v33  ;;  %5584 = vmatprep.mubr.msk.f32.mxu1 %vm6036_vm1, %v6037_v9  ;;  %v2975_v9 = vld [vmem:[#allocation3 + $0x8] sm:$0x1]  ;;  %v2993_v33 = vld [vmem:[#allocation3 + $0x38] sm:$0x1]  ;;  %3001 = vst [vmem:[#allocation3 + $0x58] sm:$0x1] %v3000_v52  ;;  %vm7701_vm1 = vmand %vm2961_vm9, %vm800_vm6 }
 0x4f3   :  { %5664 = vmatprep.subr.bf16.mxu1 %v6035_v3  ;;  %v2976_v27 = vsel %vm7263_vm14, 0, %v2975_v9  ;;  %v2994_v44 = vsel %vm7263_vm14, 0, %v2993_v33  ;;  %v5867_v33 = vld [vmem:[%s8413_s11 + $0x60] sm:$0xff]  }
 0x4f4   :  { %2977 = vst [vmem:[#allocation3 + $0x8] sm:$0x1] %v2976_v27  ;;  %2995 = vst [vmem:[#allocation3 + $0x38] sm:$0x1] %v2994_v44  ;;  %v3009_v27 = vsel %vm7263_vm14, 0, %v3008_v17  ;;  %v5872_v44 = vld [vmem:[%s8413_s11] sm:$0xff]  }
 0x4f5   :  { %3010 = vst [vmem:[#allocation3 + $0x70] sm:$0x1] %v3009_v27  ;;  %4058 = vmatpush1.bf16.msra.mxu0 %v5872_v44  ;;  %v5882_v44 = vld [vmem:[%s8413_s11 + $0x28] sm:$0xff]  }
 0x4f6   :  { %5666 = vmatpush3.bf16.msra.mxu1 %v5659_v35  ;;  %v3043_v35 = vsel %vm7273_vm15, 0, %v3042_v40  ;;  %4059 = vmatprep.subr.bf16.mxu0 %v8418_v60 }
 0x4f7   :  { %4305 = vmatprep.subr.bf16.mxu1 %v8418_v60  ;;  %3044 = vst [vmem:[#allocation3 + $0x3c] sm:$0x1] %v3043_v35 }
 0x4fe   :  { %v2567_v56 = vpop.f32.mrb[6].mxu1 }
 0x4ff   :  { %v2571_v46 = vmul.f32 0.0078125, %v2567_v56  ;;  %v5564_v23 = vpop.f32.mrb[7].mxu1  ;;  %v3049_v56 = vsel %vm7273_vm15, 0, %v3048_v53  ;;  %v5874_v53 = vld [vmem:[%s8413_s11 + $0x8] sm:$0xff]  }
 0x500   :  { %3050 = vst [vmem:[#allocation3 + $0x5c] sm:$0x1] %v3049_v56  ;;  %v3051_v23 = vld [vmem:[#allocation3 + $0x64] sm:$0x1]  ;;  %4060 = vmatpush1.bf16.msra.mxu0 %v5874_v53 }
 0x501   :  { %v2573_v26 = vsub.f32 %v2571_v46, %v2572_v49  ;;  %v3002_v49 = vld [vmem:[#allocation3 + $0x60] sm:$0x1]  ;;  %4061 = vmatprep.subr.bf16.mxu0 %v8418_v60 }
 0x502   :  { %v3003_v46 = vsel %vm7263_vm14, 0, %v3002_v49 }
 0x503   :  { %v2574_v21 = vmax.f32 %v2573_v26, 0.0  ;;  %3004 = vst [vmem:[#allocation3 + $0x60] sm:$0x1] %v3003_v46  ;;  %v3005_v26 = vld [vmem:[#allocation3 + $0x68] sm:$0x1] }
 0x505   :  { %v2575_v22 = vadd.f32 1e-05, %v2574_v21  ;;  %v3052_v21 = vsel %vm7273_vm15, 0, %v3051_v23 }
 0x506   :  { %3053 = vst [vmem:[#allocation3 + $0x64] sm:$0x1] %v3052_v21 }
 0x507   :  { %5964 = vrsqrt.f32 %v2575_v22  ;;  %v3006_v22 = vsel %vm7263_vm14, 0, %v3005_v26 }
 0x508   :  { %3007 = vst [vmem:[#allocation3 + $0x68] sm:$0x1] %v3006_v22 }
 0x511   :  { %v5965_v45 = vpop.eup %5964 }
 0x512   :  { %5585 = vmatmul.mubr.msk.f32.vlgmr.msra.gmra.mrb[10].mxu1 %vm94_vm0, %v5965_v45  ;;  %v3054_v45 = vld [vmem:[#allocation3 + $0x6c] sm:$0x1] }
 0x513   :  { %v3055_v9 = vsel %vm7273_vm15, 0, %v3054_v45  ;;  %4306 = vmatpush1.bf16.msra.mxu1 %v5867_v33 }
 0x514   :  { %3056 = vst [vmem:[#allocation3 + $0x6c] sm:$0x1] %v3055_v9  ;;  %4307 = vmatprep.subr.bf16.mxu1 %v8418_v60 }
 0x517   :  { %4308 = vmatpush1.bf16.msra.mxu1 %v5868_v20 }
 0x518   :  { %4309 = vmatprep.subr.bf16.mxu1 %v8418_v60 }
 0x5c4   :  { %v2646_v62 = vpop.f32.mrb[8].mxu1 }
 0x5c5   :  { %v5575_v18 = vpop.f32.mrb[9].mxu1  ;;  %v2730_v57 = vrot.slane %v2646_v62, %v6413_v4  ;;  %v5880_v62 = vld [vmem:[%s8413_s11 + $0x20] sm:$0xff]  }
 0x5c7   :  { %v2731_v30 = vcombine.high %v2730_v57, %v2730_v57  ;;  %v2738_v34 = vrot.slane %v2730_v57, %v6413_v4 }
 0x5c9   :  { %v2745_v24 = vrot.slane %v2731_v30, %v6413_v4  ;;  %v2749_v55 = vrot.slane %v2738_v34, %v6417_v8  ;;  %v5873_v34 = vld [vmem:[%s8413_s11 + $0x88] sm:$0xff]  }
 0x5cb   :  { %v2753_v40 = vrot.slane %v2745_v24, %v6417_v8  ;;  %v2756_v56 = vsub.f32 %v7098_v31, %v2749_v55  ;;  %v2757_v49 = vsub.f32 %v7104_v50, %v2749_v55  ;;  %v2758_v46 = vsub.f32 %v7101_v42, %v2749_v55  ;;  %v5869_v31 = vld [vmem:[%s8413_s11 + $0x70] sm:$0xff]  }
 0x5cc   :  { %v2759_v23 = vsub.f32 %v7109_v36, %v2749_v55  ;;  %v2760_v26 = vsub.f32 %v7123_v1, %v2749_v55  ;;  %v2761_v21 = vsub.f32 %v7134_v29, %v2749_v55  ;;  %v2762_v50 = vsub.f32 %v7129_v14, %v2749_v55  ;;  %v5876_v14 = vld [vmem:[%s8413_s11 + $0x10] sm:$0xff]   ;;  %4310 = vmatpush1.bf16.msra.mxu1 %v5869_v31  ;;  %v7462_v31 = vld [vmem:[#allocation3 + $0x4] sm:$0x1] }
 0x5cd   :  { %v2763_v42 = vsub.f32 %v7144_v43, %v2749_v55  ;;  %v2764_v36 = vsub.f32 %v7152_v48, %v2753_v40  ;;  %v2765_v9 = vsub.f32 %v7163_v10, %v2753_v40  ;;  %v2766_v1 = vsub.f32 %v7149_v58, %v2753_v40  ;;  %4311 = vmatprep.subr.bf16.mxu1 %v8418_v60 }
 0x5ce   :  { %v2767_v29 = vsub.f32 %v7160_v38, %v2753_v40  ;;  %v2768_v43 = vsub.f32 %v7186_v41, %v2753_v40  ;;  %v2769_v48 = vsub.f32 %v7198_v54, %v2753_v40  ;;  %v2770_v10 = vsub.f32 %v7190_v51, %v2753_v40  ;;  %v7393_v41 = vld [vmem:[%s8411_s9] ss:$0 sm:$0xff]  ;;  %4062 = vmatpush1.bf16.msra.mxu0 %v5876_v14  ;;  %v5877_v14 = vld [vmem:[%s8413_s11 + $0x98] sm:$0xff]  }
 0x5cf   :  { %v2771_v25 = vsub.f32 %v7203_v59, %v2753_v40  ;;  %4063 = vmatprep.subr.bf16.mxu0 %v8418_v60 }
 0x5d0   :  { %4312 = vmatpush1.bf16.msra.mxu1 %v5870_v37 }
 0x5d1   :  { %4313 = vmatprep.subr.bf16.mxu1 %v8418_v60 }
 0x5d2   :  { %4064 = vmatpush1.bf16.msra.mxu0 %v5878_v19 }
 0x5d3   :  { %4065 = vmatprep.subr.bf16.mxu0 %v8418_v60 }
 0x5d4   :  { %4314 = vmatpush1.bf16.msra.mxu1 %v5871_v16 }
 0x5d5   :  { %4315 = vmatprep.subr.bf16.mxu1 %v8418_v60 }
 0x5d6   :  { %4066 = vmatpush1.bf16.msra.mxu0 %v5880_v62 }
 0x5d7   :  { %4067 = vmatprep.subr.bf16.mxu0 %v8418_v60 }
 0x5d8   :  { %4316 = vmatpush1.bf16.msra.mxu1 %v5873_v34 }
 0x5d9   :  { %4317 = vmatprep.subr.bf16.mxu1 %v8418_v60 }
 0x5da   :  { %4068 = vmatpush1.bf16.msra.mxu0 %v5882_v44 }
 0x5db   :  { %4069 = vmatprep.subr.bf16.mxu0 %v8418_v60 }
 0x5e5   :  { %v2719_v35 = vpop.f32.mrb[10].mxu1 }
 0x5e6   :  { %v2779_v12 = vrot.slane %v2719_v35, %v6413_v4  ;;  %v5586_v52 = vpop.f32.mrb[11].mxu1 }
 0x5e8   :  { %v2780_v22 = vcombine.high %v2779_v12, %v2779_v12  ;;  %v2787_v45 = vrot.slane %v2779_v12, %v6413_v4 }
 0x5ea   :  { %v2794_v17 = vrot.slane %v2780_v22, %v6413_v4  ;;  %v2798_v27 = vrot.slane %v2787_v45, %v6417_v8 }
 0x5ec   :  { %v2802_v58 = vrot.slane %v2794_v17, %v6417_v8  ;;  %v2805_v4 = vmul.f32 %v2798_v27, %v2756_v56  ;;  %v2806_v38 = vmul.f32 %v2798_v27, %v2757_v49  ;;  %v2807_v32 = vmul.f32 %v2798_v27, %v2758_v46  ;;  %v3379_v56 = vld [vmem:[#allocation3] sm:$0xf]  ;;  %v5875_v49 = vld [vmem:[%s8413_s11 + $0x90] sm:$0xff]  }
 0x5ed   :  { %v2808_v51 = vmul.f32 %v2798_v27, %v2759_v23  ;;  %v2809_v54 = vmul.f32 %v2798_v27, %v2760_v26  ;;  %v2810_v59 = vmul.f32 %v2798_v27, %v2761_v21  ;;  %v2811_v61 = vmul.f32 %v2798_v27, %v2762_v50  ;;  %v5884_v50 = vld [vmem:[%s8413_s11 + $0x30] sm:$0xff]   ;;  %4318 = vmatpush1.bf16.msra.mxu1 %v5875_v49 }
 0x5ee   :  { %v2812_v8 = vmul.f32 %v2798_v27, %v2763_v42  ;;  %v2813_v47 = vmul.f32 %v2802_v58, %v2764_v36  ;;  %v2814_v39 = vmul.f32 %v2802_v58, %v2765_v9  ;;  %v2815_v6 = vmul.f32 %v2802_v58, %v2766_v1  ;;  %4319 = vmatprep.subr.bf16.mxu1 %v8418_v60 }
 0x5ef   :  { %v2816_v7 = vmul.f32 %v2802_v58, %v2767_v29  ;;  %v2817_v15 = vmul.f32 %v2802_v58, %v2768_v43  ;;  %v2818_v28 = vmul.f32 %v2802_v58, %v2769_v48  ;;  %v2819_v5 = vmul.f32 %v2802_v58, %v2770_v10  ;;  %4070 = vmatpush1.bf16.msra.mxu0 %v5884_v50  ;;  %v5883_v50 = vld [vmem:[%s8413_s11 + $0xb0] sm:$0xff]  }
 0x5f0   :  { %v7400_v0 = vmul.f32 %v2802_v58, %v2771_v25  ;;  %v2827_v63 = vmul.f32 %v7393_v41, %v2805_v4  ;;  %v2828_v2 = vmul.f32 %v7393_v41, %v2806_v38  ;;  %v2829_v11 = vmul.f32 %v7393_v41, %v2807_v32  ;;  %v3419_v38 = vld [vmem:[#allocation3] sm:$0xe]  ;;  %4071 = vmatprep.subr.bf16.mxu0 %v8418_v60 }
 0x5f1   :  { %v2830_v18 = vmul.f32 %v7393_v41, %v2808_v51  ;;  %v2831_v57 = vmul.f32 %v7393_v41, %v2809_v54  ;;  %v2832_v24 = vmul.f32 %v7393_v41, %v2810_v59  ;;  %v2833_v55 = vmul.f32 %v7393_v41, %v2811_v61  ;;  %v7501_v54 = vld [vmem:[#allocation3 + $0x4c] sm:$0x1]  ;;  %v3428_v59 = vld [vmem:[#allocation3 + $0x48] sm:$0xe]  ;;  %4320 = vmatpush1.bf16.msra.mxu1 %v5877_v14 }
 0x5f2   :  { %v7421_v30 = vadd.f32 %v7409_v13, %v2827_v63  ;;  %v7428_v33 = vadd.f32 %v7409_v13, %v2828_v2  ;;  %v7433_v20 = vadd.f32 %v7409_v13, %v2829_v11  ;;  %v2834_v40 = vmul.f32 %v7393_v41, %v2812_v8  ;;  %4321 = vmatprep.subr.bf16.mxu1 %v8418_v60  ;;  %v3389_v11 = vld [vmem:[#allocation3 + $0x50] sm:$0xf] }
 0x5f3   :  { %v7440_v35 = vadd.f32 %v7409_v13, %v2830_v18  ;;  %v2835_v12 = vmul.f32 %v7393_v41, %v2813_v47  ;;  %v7445_v52 = vadd.f32 %v7409_v13, %v2831_v57  ;;  %v2836_v46 = vmul.f32 %v7393_v41, %v2814_v39  ;;  %v3409_v47 = vld [vmem:[#allocation3 + $0x54] sm:$0x1]  ;;  %v7508_v39 = vld [vmem:[#allocation3 + $0x9c] sm:$0x1]  ;;  %v5881_v57 = vld [vmem:[%s8413_s11 + $0xa8] sm:$0xff]  }
 0x5f4   :  { %v2865_v53 = vmul.f32 0.5, %v7421_v30  ;;  %v7453_v23 = vadd.f32 %v7409_v13, %v2832_v24  ;;  %v2866_v26 = vmul.f32 0.5, %v7428_v33  ;;  %v2837_v21 = vmul.f32 %v7393_v41, %v2815_v6 }
 0x5f5   :  { %v7459_v22 = vadd.f32 %v7409_v13, %v2833_v55  ;;  %v2867_v45 = vmul.f32 0.5, %v7433_v20  ;;  %v2838_v42 = vmul.f32 %v7393_v41, %v2816_v7  ;;  %v7469_v36 = vadd.f32 %v7409_v13, %v2834_v40 }
 0x5f6   :  { %v2868_v9 = vmul.f32 0.5, %v7440_v35  ;;  %v7473_v1 = vcombine.low %v3379_v56, %v7462_v31  ;;  %v2839_v29 = vmul.f32 %v7393_v41, %v2817_v15  ;;  %v7478_v17 = vadd.f32 %v7409_v13, %v2835_v12  ;;  %v3429_v15 = vld [vmem:[#allocation3 + $0x50] sm:$0xe] }
 0x5f7   :  { %v2869_v27 = vmul.f32 0.5, %v7445_v52  ;;  %5966 = vtanh.f32 %v2865_v53  ;;  %v2840_v43 = vmul.f32 %v7393_v41, %v2818_v28  ;;  %v7486_v48 = vadd.f32 %v7409_v13, %v2836_v46  ;;  %v3438_v28 = vld [vmem:[#allocation3 + $0x98] sm:$0xe] }
 0x5f8   :  { %v2870_v10 = vmul.f32 0.5, %v7453_v23  ;;  %5968 = vtanh.f32 %v2866_v26  ;;  %v2841_v25 = vmul.f32 %v7393_v41, %v2819_v5  ;;  %v7492_v58 = vadd.f32 %v7409_v13, %v2837_v21 }
 0x5f9   :  { %v2871_v4 = vmul.f32 0.5, %v7459_v22  ;;  %5970 = vtanh.f32 %v2867_v45  ;;  %v2842_v32 = vmul.f32 %v7393_v41, %v7400_v0  ;;  %v7498_v37 = vadd.f32 %v7409_v13, %v2838_v42  ;;  %v5879_v41 = vld [vmem:[%s8413_s11 + $0xa0] sm:$0xff]  }
 0x5fa   :  { %v2872_v51 = vmul.f32 0.5, %v7469_v36  ;;  %5972 = vtanh.f32 %v2868_v9  ;;  %v7505_v61 = vadd.f32 %v7409_v13, %v2839_v29  ;;  %v2873_v8 = vmul.f32 0.5, %v7478_v17  ;;  %4322 = vmatpush1.bf16.msra.mxu1 %v5879_v41 }
 0x5fb   :  { %5974 = vtanh.f32 %v2869_v27  ;;  %v7514_v6 = vadd.f32 %v7409_v13, %v2840_v43  ;;  %v2874_v19 = vmul.f32 0.5, %v7486_v48  ;;  %v5083_v7 = vcombine.low %v3419_v38, %v7462_v31  ;;  %4323 = vmatprep.subr.bf16.mxu1 %v8418_v60  ;;  %v3297_v43 = vld [vmem:[#allocation3 + $0x1c] sm:$0x1] }
 0x5fc   :  { %5976 = vtanh.f32 %v2870_v10  ;;  %v7520_v5 = vadd.f32 %v7409_v13, %v2841_v25  ;;  %v2875_v0 = vmul.f32 0.5, %v7492_v58  ;;  %v3542_v63 = vshll.u32 %v7473_v1, 16  ;;  %v3398_v10 = vld [vmem:[#allocation3 + $0x98] sm:$0xf] }
 0x5fd   :  { %5978 = vtanh.f32 %v2871_v4  ;;  %v7525_v16 = vadd.f32 %v7409_v13, %v2842_v32  ;;  %v2876_v2 = vmul.f32 0.5, %v7498_v37  ;;  %v5092_v62 = vcombine.low %v3428_v59, %v7501_v54 }
 0x5fe   :  { %5980 = vtanh.f32 %v2872_v51  ;;  %v2877_v18 = vmul.f32 0.5, %v7505_v61  ;;  %v5093_v34 = vcombine.low %v3429_v15, %v3409_v47  ;;  %v5102_v24 = vcombine.low %v3438_v28, %v7508_v39  ;;  %4324 = vmatpush1.bf16.msra.mxu1 %v5881_v57 }
 0x5ff   :  { %5982 = vtanh.f32 %v2873_v8  ;;  %v2878_v13 = vmul.f32 0.5, %v7514_v6  ;;  %v7535_v55 = vrot.slane %v5083_v7, 1  ;;  %v2879_v12 = vmul.f32 0.5, %v7520_v5  ;;  %4325 = vmatprep.subr.bf16.mxu1 %v8418_v60 }
 0x600   :  { %5984 = vtanh.f32 %v2874_v19  ;;  %v7540_v53 = vrot.slane %v3542_v63, 1  ;;  %v7542_v56 = vcombine.low %v3389_v11, %v3409_v47  ;;  %v2880_v46 = vmul.f32 0.5, %v7525_v16 }
 0x601   :  { %v5967_v40 = vpop.eup %5966  ;;  %5986 = vtanh.f32 %v2875_v0  ;;  %v7545_v21 = vrot.slane %v5092_v62, 1  ;;  %v7550_v42 = vrot.slane %v5093_v34, 1  ;;  %v7552_v9 = vrot.slane %v5102_v24, 1  ;;  %v5885_v0 = vld [vmem:[%s8413_s11 + $0xb8] sm:$0xff]  }
 0x602   :  { %v5969_v49 = vpop.eup %5968  ;;  %5988 = vtanh.f32 %v2876_v2  ;;  %v2897_v26 = vmul.f32 0.5, %v5967_v40  ;;  %v7560_v28 = vcombine.low %v3398_v10, %v7508_v39  ;;  %4326 = vmatpush1.bf16.msra.mxu1 %v5883_v50 }
 0x603   :  { %v5971_v45 = vpop.eup %5970  ;;  %5990 = vtanh.f32 %v2877_v18  ;;  %v2898_v31 = vmul.f32 0.5, %v5969_v49  ;;  %4327 = vmatprep.subr.bf16.mxu1 %v8418_v60 }
 0x604   :  { %v5973_v29 = vpop.eup %5972  ;;  %5992 = vtanh.f32 %v2878_v13  ;;  %v2899_v27 = vmul.f32 0.5, %v5971_v45  ;;  %v2913_v14 = vadd.f32 0.5, %v2897_v26 }
 0x605   :  { %v5975_v25 = vpop.eup %5974  ;;  %5994 = vtanh.f32 %v2879_v12  ;;  %v2900_v4 = vmul.f32 0.5, %v5973_v29  ;;  %v2914_v38 = vadd.f32 0.5, %v2898_v31 }
 0x606   :  { %v5977_v51 = vpop.eup %5976  ;;  %5996 = vtanh.f32 %v2880_v46  ;;  %v2901_v59 = vmul.f32 0.5, %v5975_v25  ;;  %v2915_v8 = vadd.f32 0.5, %v2899_v27  ;;  %v2929_v47 = vmul.f32 %v2913_v14, %v7421_v30  ;;  %4328 = vmatpush1.bf16.msra.mxu1 %v5885_v0 }
 0x607   :  { %v5979_v41 = vpop.eup %5978  ;;  %v2902_v19 = vmul.f32 0.5, %v5977_v51  ;;  %v2916_v7 = vadd.f32 0.5, %v2900_v4  ;;  %v2930_v15 = vmul.f32 %v2914_v38, %v7428_v33  ;;  %4533 = vmatprep.subr.bf16.mxu1 %v8418_v60 }
 0x608   :  { %v5981_v63 = vpop.eup %5980  ;;  %v2903_v2 = vmul.f32 0.5, %v5979_v41  ;;  %v2917_v11 = vadd.f32 0.5, %v2901_v59  ;;  %v2931_v62 = vmul.f32 %v2915_v8, %v7433_v20  ;;  %v7566_v18 = vpack.c.bf16 %v2929_v47, %v2929_v47 }
 0x609   :  { %v5983_v30 = vpop.eup %5982  ;;  %v2904_v57 = vmul.f32 0.5, %v5981_v63  ;;  %v2918_v33 = vadd.f32 0.5, %v2902_v19  ;;  %v2932_v39 = vmul.f32 %v2916_v7, %v7440_v35  ;;  %v7570_v34 = vpack.c.bf16 %v2930_v15, %v2930_v15 }
 0x60a   :  { %v5985_v24 = vpop.eup %5984  ;;  %v2905_v13 = vmul.f32 0.5, %v5983_v30  ;;  %v2919_v40 = vadd.f32 0.5, %v2903_v2  ;;  %v2933_v12 = vmul.f32 %v2917_v11, %v7445_v52  ;;  %v7573_v49 = vpack.c.bf16 %v2931_v62, %v2931_v62 }
 0x60b   :  { %v5987_v46 = vpop.eup %5986  ;;  %v2906_v20 = vmul.f32 0.5, %v5985_v24  ;;  %v2920_v26 = vadd.f32 0.5, %v2904_v57  ;;  %v2934_v45 = vmul.f32 %v2918_v33, %v7453_v23  ;;  %v7576_v31 = vpack.c.bf16 %v2932_v39, %v2932_v39 }
 0x60c   :  { %v5989_v50 = vpop.eup %5988  ;;  %v2907_v29 = vmul.f32 0.5, %v5987_v46  ;;  %v2921_v35 = vadd.f32 0.5, %v2905_v13  ;;  %v2935_v27 = vmul.f32 %v2919_v40, %v7459_v22  ;;  %v7579_v14 = vpack.c.bf16 %v2933_v12, %v2933_v12 }
 0x60d   :  { %v5991_v52 = vpop.eup %5990  ;;  %v2908_v10 = vmul.f32 0.5, %v5989_v50  ;;  %v2922_v25 = vadd.f32 0.5, %v2906_v20  ;;  %v2936_v4 = vmul.f32 %v2920_v26, %v7469_v36  ;;  %v7583_v38 = vpack.c.bf16 %v2934_v45, %v2934_v45 }
 0x60e   :  { %v5993_v23 = vpop.eup %5992  ;;  %v2909_v51 = vmul.f32 0.5, %v5991_v52  ;;  %v2923_v59 = vadd.f32 0.5, %v2907_v29  ;;  %v2937_v8 = vmul.f32 %v2921_v35, %v7478_v17  ;;  %v7586_v47 = vpack.c.bf16 %v2935_v27, %v2935_v27 }
 0x60f   :  { %v5995_v41 = vpop.eup %5994  ;;  %v2910_v22 = vmul.f32 0.5, %v5993_v23  ;;  %v2924_v19 = vadd.f32 0.5, %v2908_v10  ;;  %v2938_v7 = vmul.f32 %v2922_v25, %v7486_v48  ;;  %v7589_v15 = vpack.c.bf16 %v2936_v4, %v2936_v4 }
 0x610   :  { %v5997_v0 = vpop.eup %5996  ;;  %v2911_v63 = vmul.f32 0.5, %v5995_v41  ;;  %v2925_v2 = vadd.f32 0.5, %v2909_v51  ;;  %v2939_v36 = vmul.f32 %v2923_v59, %v7492_v58  ;;  %v7592_v11 = vpack.c.bf16 %v2937_v8, %v2937_v8 }
 0x611   :  { %v2912_v62 = vmul.f32 0.5, %v5997_v0  ;;  %v2926_v30 = vadd.f32 0.5, %v2910_v22  ;;  %v2940_v17 = vmul.f32 %v2924_v19, %v7498_v37  ;;  %v7595_v57 = vpack.c.bf16 %v2938_v7, %v2938_v7 }
 0x612   :  { %v2927_v33 = vadd.f32 0.5, %v2911_v63  ;;  %v2941_v39 = vmul.f32 %v2925_v2, %v7505_v61  ;;  %v7598_v24 = vpack.c.bf16 %v2939_v36, %v2939_v36  ;;  %v3121_v48 = vshrl.u32 %v7566_v18, 16 }
 0x613   :  { %v2928_v13 = vadd.f32 0.5, %v2912_v62  ;;  %v2942_v40 = vmul.f32 %v2926_v30, %v7514_v6  ;;  %v7602_v12 = vpack.c.bf16 %v2940_v17, %v2940_v17  ;;  %v3124_v58 = vshll.u32 %v7566_v18, 16 }
 0x614   :  { %v2943_v46 = vmul.f32 %v2927_v33, %v7520_v5  ;;  %v7606_v20 = vpack.c.bf16 %v2941_v39, %v2941_v39  ;;  %v7608_v37 = vrot.slane %v3121_v48, 7  ;;  %v3129_v26 = vshrl.u32 %v7570_v34, 16 }
 0x615   :  { %v2944_v61 = vmul.f32 %v2928_v13, %v7525_v16  ;;  %v7612_v45 = vpack.c.bf16 %v2942_v40, %v2942_v40  ;;  %v3132_v50 = vshll.u32 %v7570_v34, 16  ;;  %v3137_v6 = vshrl.u32 %v7573_v49, 16  ;;  %v3312_v40 = vld [vmem:[#allocation3 + $0x30] sm:$0xf] }
 0x616   :  { %v7616_v29 = vpack.c.bf16 %v2943_v46, %v2943_v46  ;;  %v7619_v18 = vor.u32 %v3124_v58, %v7608_v37  ;;  %v3127_v5 = vrot.slane %v7608_v37, 4  ;;  %v7622_v35 = vrot.slane %v3129_v26, 7 }
 0x617   :  { %v7624_v27 = vpack.c.bf16 %v2944_v61, %v2944_v61  ;;  %v7626_v52 = vrot.slane %v3137_v6, 7  ;;  %v3140_v16 = vshll.u32 %v7573_v49, 16  ;;  %v3145_v10 = vshrl.u32 %v7576_v31, 16 }
 0x618   :  { %v7631_v34 = vor.u32 %v3132_v50, %v7622_v35  ;;  %v3135_v25 = vrot.slane %v7622_v35, 4  ;;  %v3148_v4 = vshll.u32 %v7576_v31, 16  ;;  %v3153_v23 = vshrl.u32 %v7579_v14, 16 }
 0x619   :  { %v7637_v51 = vor.u32 %v3140_v16, %v7626_v52  ;;  %v7640_v8 = vrot.slane %v3145_v10, 7  ;;  %v3156_v49 = vshll.u32 %v7579_v14, 16  ;;  %v3161_v22 = vshrl.u32 %v7583_v38, 16 }
 0x61a   :  { %v7643_v41 = vrot.slane %v3153_v23, 7  ;;  %v3164_v19 = vshll.u32 %v7583_v38, 16  ;;  %v3169_v7 = vshrl.u32 %v7586_v47, 16  ;;  %v3172_v63 = vshll.u32 %v7586_v47, 16 }
 0x61b   :  { %v7649_v31 = vor.u32 %v3148_v4, %v7640_v8  ;;  %v3177_v2 = vshrl.u32 %v7589_v15, 16  ;;  %v7658_v62 = vrot.slane %v3161_v22, 7  ;;  %v3180_v17 = vshll.u32 %v7589_v15, 16  ;;  %v3285_v22 = vld [vmem:[#allocation3 + $0xc] sm:$0x1] }
 0x61c   :  { %v7655_v36 = vor.u32 %v3156_v49, %v7643_v41  ;;  %v7660_v30 = vrot.slane %v3169_v7, 7  ;;  %v3185_v33 = vshrl.u32 %v7592_v11, 16  ;;  %v3188_v39 = vshll.u32 %v7592_v11, 16  ;;  %v3282_v49 = vld [vmem:[#allocation3 + $0x8] sm:$0xf] }
 0x61d   :  { %v7662_v38 = vrot.slane %v3177_v2, 7  ;;  %v7668_v47 = vor.u32 %v3164_v19, %v7658_v62  ;;  %v3193_v26 = vshrl.u32 %v7595_v57, 16  ;;  %v3196_v11 = vshll.u32 %v7595_v57, 16  ;;  %v3288_v19 = vld [vmem:[#allocation3 + $0x10] sm:$0xf] }
 0x61e   :  { %v7672_v13 = vor.u32 %v3172_v63, %v7660_v30  ;;  %v7679_v15 = vrot.slane %v3185_v33, 7  ;;  %v3201_v61 = vshrl.u32 %v7598_v24, 16  ;;  %v3204_v50 = vshll.u32 %v7598_v24, 16  ;;  %v3291_v2 = vld [vmem:[#allocation3 + $0x14] sm:$0x1] }
 0x61f   :  { %v7676_v58 = vor.u32 %v3180_v17, %v7662_v38  ;;  %v3209_v6 = vshrl.u32 %v7602_v12, 16  ;;  %v7689_v10 = vrot.slane %v3193_v26, 7  ;;  %v3212_v4 = vshll.u32 %v7602_v12, 16  ;;  %v3300_v17 = vld [vmem:[#allocation3 + $0x20] sm:$0xf] }
 0x620   :  { %v7687_v16 = vor.u32 %v3188_v39, %v7679_v15  ;;  %v3217_v23 = vshrl.u32 %v7606_v20, 16  ;;  %v7693_v7 = vrot.slane %v3201_v61, 7  ;;  %v3220_v24 = vshll.u32 %v7606_v20, 16  ;;  %v3303_v20 = vld [vmem:[#allocation3 + $0x24] sm:$0x1] }
 0x621   :  { %v7695_v57 = vrot.slane %v3209_v6, 7  ;;  %v3225_v63 = vshrl.u32 %v7612_v45, 16  ;;  %v7706_v12 = vor.u32 %v3196_v11, %v7689_v10  ;;  %v3228_v26 = vshll.u32 %v7612_v45, 16  ;;  %v3294_v6 = vld [vmem:[#allocation3 + $0x18] sm:$0xf] }
 0x622   :  { %v7708_v39 = vrot.slane %v3217_v23, 7  ;;  %v3233_v61 = vshrl.u32 %v7616_v29, 16  ;;  %v7713_v44 = vor.u32 %v3204_v50, %v7693_v7  ;;  %v3236_v11 = vshll.u32 %v7616_v29, 16  ;;  %v3315_v23 = vld [vmem:[#allocation3 + $0x34] sm:$0x1] }
 0x623   :  { %v7716_v32 = vor.u32 %v3212_v4, %v7695_v57  ;;  %v7718_v60 = vrot.slane %v3225_v63, 7  ;;  %v3241_v14 = vshrl.u32 %v7624_v27, 16  ;;  %v3244_v48 = vshll.u32 %v7624_v27, 16  ;;  %v3306_v50 = vld [vmem:[#allocation3 + $0x28] sm:$0xf] }
 0x624   :  { %v7722_v46 = vor.u32 %v3220_v24, %v7708_v39  ;;  %v7724_v45 = vrot.slane %v3233_v61, 7  ;;  %v3283_v4 = vsel %vm7701_vm1, %v7619_v18, %v3282_v49  ;;  %v3286_v29 = vsel %vm7263_vm14, %v3127_v5, %v3285_v22  ;;  %v3309_v63 = vld [vmem:[#allocation3 + $0x2c] sm:$0x1]  ;;  %v3324_v61 = vld [vmem:[#allocation3 + $0x40] sm:$0xf] }
 0x625   :  { %v7729_v59 = vor.u32 %v3228_v26, %v7718_v60  ;;  %v3289_v24 = vsel %vm7701_vm1, %v7631_v34, %v3288_v19  ;;  %v3327_v27 = vld [vmem:[#allocation3 + $0x44] sm:$0x1]  ;;  %v7744_v26 = vrot.slane %v3241_v14, 7  ;;  %3284 = vst [vmem:[#allocation3 + $0x8] sm:$0xf] %v3283_v4  ;;  %v3292_v37 = vsel %vm7263_vm14, %v3135_v25, %v3291_v2 }
 0x626   :  { %v7742_v0 = vor.u32 %v3236_v11, %v7724_v45  ;;  %3287 = vst [vmem:[#allocation3 + $0xc] sm:$0x1] %v3286_v29  ;;  %3290 = vst [vmem:[#allocation3 + $0x10] sm:$0xf] %v3289_v24  ;;  %v3301_v18 = vsel %vm7701_vm1, %v7649_v31, %v3300_v17  ;;  %v3318_v5 = vld [vmem:[#allocation3 + $0x38] sm:$0xf]  ;;  %v3295_v35 = vsel %vm7701_vm1, %v7637_v51, %v3294_v6 }
 0x627   :  { %v3321_v34 = vld [vmem:[#allocation3 + $0x3c] sm:$0x1]  ;;  %3293 = vst [vmem:[#allocation3 + $0x14] sm:$0x1] %v3292_v37  ;;  %3302 = vst [vmem:[#allocation3 + $0x20] sm:$0xf] %v3301_v18  ;;  %v3313_v31 = vsel %vm7701_vm1, %v7668_v47, %v3312_v40 }
 0x628   :  { %v8437_v49 = vrot.slane %v7640_v8, 4  ;;  %v8438_v22 = vrot.slane %v7626_v52, 4  ;;  %v3330_v19 = vld [vmem:[#allocation3 + $0x58] sm:$0xf]  ;;  %v3333_v2 = vld [vmem:[#allocation3 + $0x5c] sm:$0x1]  ;;  %v7768_v8 = vor.u32 %v3244_v48, %v7744_v26 }
 0x629   :  { %v3336_v17 = vld [vmem:[#allocation3 + $0x60] sm:$0xf]  ;;  %3296 = vst [vmem:[#allocation3 + $0x18] sm:$0xf] %v3295_v35  ;;  %3314 = vst [vmem:[#allocation3 + $0x30] sm:$0xf] %v3313_v31 }
 0x62a   :  { %v3304_v14 = vsel %vm7263_vm14, %v8437_v49, %v3303_v20  ;;  %v3298_v25 = vsel %vm7263_vm14, %v8438_v22, %v3297_v43  ;;  %v8439_v51 = vrot.slane %v7658_v62, 4  ;;  %v3307_v43 = vsel %vm7701_vm1, %v7655_v36, %v3306_v50  ;;  %v3339_v48 = vld [vmem:[#allocation3 + $0x64] sm:$0x1]  ;;  %v3342_v20 = vld [vmem:[#allocation3 + $0x68] sm:$0xf] }
 0x62b   :  { %3305 = vst [vmem:[#allocation3 + $0x24] sm:$0x1] %v3304_v14  ;;  %3299 = vst [vmem:[#allocation3 + $0x1c] sm:$0x1] %v3298_v25  ;;  %v8440_v47 = vrot.slane %v7643_v41, 4  ;;  %v3325_v62 = vsel %vm7701_vm1, %v7676_v58, %v3324_v61  ;;  %v8441_v11 = vrot.slane %v7662_v38, 4  ;;  %v3319_v41 = vsel %vm7701_vm1, %v7672_v13, %v3318_v5 }
 0x62c   :  { %v3316_v52 = vsel %vm7263_vm14, %v8439_v51, %v3315_v23  ;;  %v3348_v6 = vld [vmem:[#allocation3 + $0x70] sm:$0xf]  ;;  %3308 = vst [vmem:[#allocation3 + $0x28] sm:$0xf] %v3307_v43  ;;  %v8442_v23 = vrot.slane %v7660_v30, 4  ;;  %v3191_v38 = vrot.slane %v7679_v15, 4  ;;  %v3331_v58 = vsel %vm7701_vm1, %v7687_v16, %v3330_v19 }
 0x62d   :  { %v3310_v40 = vsel %vm7263_vm14, %v8440_v47, %v3309_v63  ;;  %3317 = vst [vmem:[#allocation3 + $0x34] sm:$0x1] %v3316_v52  ;;  %v3328_v36 = vsel %vm7263_vm14, %v8441_v11, %v3327_v27  ;;  %v3345_v4 = vld [vmem:[#allocation3 + $0x6c] sm:$0x1]  ;;  %v3351_v29 = vld [vmem:[#allocation3 + $0x74] sm:$0x1]  ;;  %v3337_v30 = vsel %vm7701_vm1, %v7706_v12, %v3336_v17  ;;  %v3343_v15 = vsel %vm7701_vm1, %v7713_v44, %v3342_v20 }
 0x62e   :  { %3311 = vst [vmem:[#allocation3 + $0x2c] sm:$0x1] %v3310_v40  ;;  %v3322_v50 = vsel %vm7263_vm14, %v8442_v23, %v3321_v34  ;;  %v3354_v24 = vld [vmem:[#allocation3 + $0x78] sm:$0xf]  ;;  %3326 = vst [vmem:[#allocation3 + $0x40] sm:$0xf] %v3325_v62  ;;  %v3349_v16 = vsel %vm7701_vm1, %v7716_v32, %v3348_v6  ;;  %v3334_v12 = vsel %vm7263_vm14, %v3191_v38, %v3333_v2 }
 0x62f   :  { %3329 = vst [vmem:[#allocation3 + $0x44] sm:$0x1] %v3328_v36  ;;  %3320 = vst [vmem:[#allocation3 + $0x38] sm:$0xf] %v3319_v41  ;;  %v3199_v13 = vrot.slane %v7689_v10, 4  ;;  %v3207_v27 = vrot.slane %v7693_v7, 4  ;;  %v3355_v44 = vsel %vm7701_vm1, %v7722_v46, %v3354_v24 }
 0x630   :  { %3323 = vst [vmem:[#allocation3 + $0x3c] sm:$0x1] %v3322_v50  ;;  %v3360_v63 = vld [vmem:[#allocation3 + $0x80] sm:$0xf]  ;;  %v3366_v61 = vld [vmem:[#allocation3 + $0x88] sm:$0xf] }
 0x631   :  { %3332 = vst [vmem:[#allocation3 + $0x58] sm:$0xf] %v3331_v58  ;;  %3338 = vst [vmem:[#allocation3 + $0x60] sm:$0xf] %v3337_v30  ;;  %v3215_v37 = vrot.slane %v7695_v57, 4  ;;  %v3340_v5 = vsel %vm7263_vm14, %v3199_v13, %v3339_v48  ;;  %v3223_v7 = vrot.slane %v7708_v39, 4  ;;  %v3346_v14 = vsel %vm7263_vm14, %v3207_v27, %v3345_v4 }
 0x632   :  { %v3357_v10 = vld [vmem:[#allocation3 + $0x7c] sm:$0x1]  ;;  %v3372_v18 = vld [vmem:[#allocation3 + $0x90] sm:$0xf]  ;;  %3344 = vst [vmem:[#allocation3 + $0x68] sm:$0xf] %v3343_v15  ;;  %v3361_v46 = vsel %vm7701_vm1, %v7729_v59, %v3360_v63  ;;  %v3367_v39 = vsel %vm7701_vm1, %v7742_v0, %v3366_v61 }
 0x633   :  { %3350 = vst [vmem:[#allocation3 + $0x70] sm:$0xf] %v3349_v16  ;;  %v5886_v32 = vld [vmem:[%s8413_s11 + $0x38] sm:$0xff]   ;;  %v3400_v57 = vld [vmem:[#allocation3 + $0xc] sm:$0x1]  ;;  %v3352_v35 = vsel %vm7263_vm14, %v3215_v37, %v3351_v29  ;;  %v3358_v2 = vsel %vm7263_vm14, %v3223_v7, %v3357_v10  ;;  %v3373_v59 = vsel %vm7701_vm1, %v7768_v8, %v3372_v18  ;;  %v8443_v48 = vmov 0  }
 0x634   :  { %v3420_v34 = vld [vmem:[#allocation3 + $0x8] sm:$0xe]  ;;  %v3421_v49 = vld [vmem:[#allocation3 + $0x10] sm:$0xe]  ;;  %3335 = vst [vmem:[#allocation3 + $0x5c] sm:$0x1] %v3334_v12  ;;  %4072 = vmatpush1.bf16.msra.mxu0 %v5886_v32 }
 0x635   :  { %3341 = vst [vmem:[#allocation3 + $0x64] sm:$0x1] %v3340_v5  ;;  %3356 = vst [vmem:[#allocation3 + $0x78] sm:$0xf] %v3355_v44  ;;  %v5084_v22 = vcombine.low %v3420_v34, %v3400_v57  ;;  %v3401_v25 = vld [vmem:[#allocation3 + $0x14] sm:$0x1]  ;;  %4073 = vmatprep.subr.bf16.mxu0 %v8443_v48 }
 0x636   :  { %v7832_v31 = vld [vmem:[#allocation3 + $0x10] sm:$0xf]  ;;  %v7834_v19 = vld [vmem:[#allocation3 + $0x8] sm:$0xf]  ;;  %3347 = vst [vmem:[#allocation3 + $0x6c] sm:$0x1] %v3346_v14  ;;  %v5085_v17 = vcombine.low %v3421_v49, %v3401_v25 }
 0x637   :  { %3353 = vst [vmem:[#allocation3 + $0x74] sm:$0x1] %v3352_v35  ;;  %3362 = vst [vmem:[#allocation3 + $0x80] sm:$0xf] %v3361_v46  ;;  %v5065_v0 = vcombine.low %v7832_v31, %v3401_v25  ;;  %v5064_v51 = vcombine.low %v7834_v19, %v3400_v57  ;;  %v7843_v52 = vld [vmem:[#allocation3 + $0x20] sm:$0xf] }
 0x638   :  { %3368 = vst [vmem:[#allocation3 + $0x88] sm:$0xf] %v3367_v39  ;;  %v7845_v43 = vld [vmem:[#allocation3 + $0x24] sm:$0x1]  ;;  %v7847_v47 = vld [vmem:[#allocation3 + $0x18] sm:$0xf] }
 0x639   :  { %3359 = vst [vmem:[#allocation3 + $0x7c] sm:$0x1] %v3358_v2  ;;  %v3363_v40 = vld [vmem:[#allocation3 + $0x84] sm:$0x1]  ;;  %3374 = vst [vmem:[#allocation3 + $0x90] sm:$0xf] %v3373_v59  ;;  %v5067_v33 = vcombine.low %v7843_v52, %v7845_v43 }
 0x63a   :  { %v3780_v20 = vrot.slane %v5084_v22, 1  ;;  %v7852_v8 = vld [vmem:[#allocation3 + $0x1c] sm:$0x1]  ;;  %v7854_v6 = vld [vmem:[#allocation3 + $0x30] sm:$0xf]  ;;  %v3231_v62 = vrot.slane %v7718_v60, 4 }
 0x63b   :  { %v7857_v11 = vrot.slane %v5085_v17, 1  ;;  %v3556_v36 = vshll.u32 %v5065_v0, 16  ;;  %v7859_v41 = vld [vmem:[#allocation3 + $0x34] sm:$0x1]  ;;  %v8444_v23 = vshll.u32 %v7542_v56, 16  ;;  %v3554_v24 = vshrl.u32 %v5065_v0, 16 }
 0x63c   :  { %v5105_v29 = vcombine.low %v7535_v55, %v3780_v20  ;;  %v3549_v38 = vshll.u32 %v5064_v51, 16  ;;  %v3570_v58 = vshll.u32 %v5067_v33, 16  ;;  %v7867_v13 = vld [vmem:[#allocation3 + $0x28] sm:$0xf]  ;;  %v5066_v63 = vcombine.low %v7847_v47, %v7852_v8  ;;  %v7876_v27 = vld [vmem:[#allocation3 + $0x2c] sm:$0x1] }
 0x63d   :  { %v7863_v50 = vrot.slane %v8444_v23, 1  ;;  %v5165_v60 = vcombine.low %v3780_v20, %v7857_v11  ;;  %v3558_v30 = vrot.slane %v3556_v36, 1  ;;  %v7874_v61 = vcombine.low %v7854_v6, %v7859_v41  ;;  %v7878_v15 = vld [vmem:[#allocation3 + $0x40] sm:$0xf]  ;;  %v7888_v18 = vld [vmem:[#allocation3 + $0x44] sm:$0x1] }
 0x63e   :  { %v5888_v55 = vld [vmem:[%s8413_s11 + $0x40] sm:$0xff]   ;;  %5132 = vmatprep.mubr.msk.bf16.mxu0 %vm1677_vm11, %v5105_v29  ;;  %v3547_v37 = vshrl.u32 %v5064_v51, 16  ;;  %v3551_v16 = vrot.slane %v3549_v38, 1  ;;  %v7886_v10 = vcombine.low %v7867_v13, %v7876_v27  ;;  %v7890_v12 = vld [vmem:[#allocation3 + $0x38] sm:$0xf]  ;;  %v3364_v5 = vsel %vm7263_vm14, %v3231_v62, %v3363_v40  ;;  %v5891_v14 = vld [vmem:[%s8413_s11 + $0x48] sm:$0xff]  }
 0x63f   :  { %v7894_v7 = vld [vmem:[#allocation3 + $0x48] sm:$0xf]  ;;  %5192 = vmatprep.mubr.msk.bf16.mxu1 %vm1677_vm11, %v5165_v60  ;;  %v3559_v44 = vor.u32 %v3558_v30, %v3554_v24  ;;  %v3568_v32 = vshrl.u32 %v5067_v33, 16  ;;  %v3572_v57 = vrot.slane %v3570_v58, 1  ;;  %v3563_v34 = vshll.u32 %v5066_v63, 16  ;;  %4074 = vmatpush1.bf16.msra.mxu0 %v5888_v55 }
 0x640   :  { %8445 = vst [vmem:[#allocation7_spill] sm:$0xff] %v7894_v7  ;;  %v7897_v49 = vld [vmem:[#allocation3 + $0x3c] sm:$0x1]  ;;  %3365 = vst [vmem:[#allocation3 + $0x84] sm:$0x1] %v3364_v5  ;;  %v3552_v35 = vor.u32 %v3551_v16, %v3547_v37  ;;  %v3561_v46 = vshrl.u32 %v5066_v63, 16  ;;  %4075 = vmatprep.subr.bf16.mxu0 %v8443_v48  ;;  %v5071_v51 = vcombine.low %v7878_v15, %v7888_v18 }
 0x641   :  { %v3584_v39 = vshll.u32 %v7874_v61, 16  ;;  %v8446_v22 = vshrl.u32 %v7473_v1, 16  ;;  %v7908_v2 = vld [vmem:[#allocation3 + $0x58] sm:$0xf]  ;;  %v7910_v59 = vld [vmem:[#allocation3 + $0x5c] sm:$0x1]  ;;  %3683 = vrot.lane.b32.xlu1 %v3559_v44, %s6039_s2  ;;  %v5070_v1 = vcombine.low %v7890_v12, %v7897_v49  ;;  %v3573_v24 = vor.u32 %v3572_v57, %v3568_v32 }
 0x642   :  { %v3565_v17 = vrot.slane %v3563_v34, 1  ;;  %v3577_v0 = vshll.u32 %v7886_v10, 16  ;;  %v7919_v40 = vld [vmem:[#allocation3 + $0x60] sm:$0xf]  ;;  %3681 = vrot.lane.b32.xlu0 %v3552_v35, %s6039_s2  ;;  %v3582_v20 = vshrl.u32 %v7874_v61, 16  ;;  %v7927_v62 = vcombine.low %v7908_v2, %v7910_v59  ;;  %v5893_v44 = vld [vmem:[%s8413_s11 + $0x50] sm:$0xff]  }
 0x643   :  { %v7906_v25 = vor.u32 %v7540_v53, %v8446_v22  ;;  %v7921_v53 = vld [vmem:[#allocation3 + $0x64] sm:$0x1]  ;;  %v3586_v33 = vrot.slane %v3584_v39, 1  ;;  %v7933_v23 = vld [vmem:[#allocation3 + $0x68] sm:$0xf]  ;;  %v3598_v38 = vshll.u32 %v5071_v51, 16  ;;  %v7942_v63 = vcombine.low %v7894_v7, %v7501_v54  ;;  %4076 = vmatpush1.bf16.msra.mxu0 %v5891_v14 }
 0x644   :  { %v7931_v36 = vcombine.low %v7919_v40, %v7921_v53  ;;  %8447 = vst [vmem:[#allocation8_spill] sm:$0xff] %v7933_v23  ;;  %v3369_v29 = vld [vmem:[#allocation3 + $0x8c] sm:$0x1]  ;;  %v7937_v60 = vld [vmem:[#allocation3 + $0x70] sm:$0xf]  ;;  %v3239_v30 = vrot.slane %v7724_v45, 4  ;;  %v3566_v61 = vor.u32 %v3565_v17, %v3561_v46  ;;  %4077 = vmatprep.subr.bf16.mxu0 %v8443_v48 }
 0x645   :  { %v7935_v58 = vld [vmem:[#allocation3 + $0x6c] sm:$0x1]  ;;  %8448 = vst [vmem:[#allocation9_spill] sm:$0xff] %v7937_v60  ;;  %v3575_v55 = vshrl.u32 %v7886_v10, 16  ;;  %v3579_v37 = vrot.slane %v3577_v0, 1  ;;  %v3591_v16 = vshll.u32 %v5070_v1, 16  ;;  %3687 = vrot.lane.b32.xlu1 %v3573_v24, %s6039_s2  ;;  %v3587_v22 = vor.u32 %v3586_v33, %v3582_v20 }
 0x646   :  { %v7945_v5 = vld [vmem:[#allocation3 + $0x74] sm:$0x1]  ;;  %v3596_v45 = vshrl.u32 %v5071_v51, 16  ;;  %v3600_v32 = vrot.slane %v3598_v38, 1  ;;  %v3589_v54 = vshrl.u32 %v5070_v1, 16  ;;  %v3619_v57 = vshll.u32 %v7927_v62, 16  ;;  %3685 = vrot.lane.b32.xlu0 %v3566_v61, %s6039_s2 }
 0x647   :  { %v7953_v34 = vld [vmem:[#allocation3 + $0x78] sm:$0xf]  ;;  %v3593_v10 = vrot.slane %v3591_v16, 1  ;;  %v3626_v14 = vshll.u32 %v7931_v36, 16  ;;  %v5076_v35 = vcombine.low %v7933_v23, %v7935_v58  ;;  %v5077_v46 = vcombine.low %v7937_v60, %v7945_v5  ;;  %v7961_v39 = vld [vmem:[#allocation3 + $0x7c] sm:$0x1]  ;;  %4078 = vmatpush1.bf16.msra.mxu0 %v5893_v44 }
 0x648   :  { %8449 = vst [vmem:[#allocation10_spill] sm:$0xff] %v7953_v34  ;;  %v3617_v17 = vshrl.u32 %v7927_v62, 16  ;;  %v7966_v0 = vcombine.low %v7953_v34, %v7961_v39  ;;  %v7968_v51 = vld [vmem:[#allocation3 + $0x80] sm:$0xf]  ;;  %v7970_v1 = vld [vmem:[#allocation3 + $0x84] sm:$0x1]  ;;  %v3370_v24 = vsel %vm7263_vm14, %v3239_v30, %v3369_v29  ;;  %v3580_v61 = vor.u32 %v3579_v37, %v3575_v55  ;;  %4079 = vmatprep.subr.bf16.mxu0 %v8443_v48 }
 0x649   :  { %8450 = vst [vmem:[#allocation11_spill] sm:$0xff] %v7968_v51  ;;  %v5897_v38 = vld [vmem:[%s8413_s11 + $0x58] sm:$0xff]   ;;  %v3621_v20 = vrot.slane %v3619_v57, 1  ;;  %v3628_v33 = vrot.slane %v3626_v14, 1  ;;  %v3633_v62 = vshll.u32 %v5076_v35, 16  ;;  %3691 = vrot.lane.b32.xlu1 %v3587_v22, %s6039_s2  ;;  %v3601_v16 = vor.u32 %v3600_v32, %v3596_v45 }
 0x64a   :  { %3371 = vst [vmem:[#allocation3 + $0x8c] sm:$0x1] %v3370_v24  ;;  %v3594_v4 = vor.u32 %v3593_v10, %v3589_v54  ;;  %v3624_v7 = vshrl.u32 %v7931_v36, 16  ;;  %v3640_v34 = vshll.u32 %v5077_v46, 16  ;;  %v3375_v29 = vld [vmem:[#allocation3 + $0x94] sm:$0x1]  ;;  %3689 = vrot.lane.b32.xlu0 %v3580_v61, %s6039_s2  ;;  %v7984_v37 = vcombine.low %v7968_v51, %v7970_v1 }
 0x64b   :  { %v3422_v30 = vld [vmem:[#allocation3 + $0x18] sm:$0xe]  ;;  %v3631_v44 = vshrl.u32 %v5076_v35, 16  ;;  %v3635_v23 = vrot.slane %v3633_v62, 1  ;;  %v3647_v55 = vshll.u32 %v7966_v0, 16  ;;  %v3638_v14 = vshrl.u32 %v5077_v46, 16  ;;  %4080 = vmatpush1.bf16.msra.mxu0 %v5897_v38 }
 0x64c   :  { %v3423_v57 = vld [vmem:[#allocation3 + $0x20] sm:$0xe]  ;;  %v3247_v45 = vrot.slane %v7744_v26, 4  ;;  %v5086_v32 = vcombine.low %v3422_v30, %v7852_v8  ;;  %v3424_v54 = vld [vmem:[#allocation3 + $0x28] sm:$0xe]  ;;  %v3622_v22 = vor.u32 %v3621_v20, %v3617_v17  ;;  %v3629_v35 = vor.u32 %v3628_v33, %v3624_v7 }
 0x64d   :  { %v5087_v36 = vcombine.low %v3423_v57, %v7845_v43  ;;  %v3425_v10 = vld [vmem:[#allocation3 + $0x30] sm:$0xe]  ;;  %v3642_v24 = vrot.slane %v3640_v34, 1  ;;  %v3645_v61 = vshrl.u32 %v7966_v0, 16  ;;  %v3426_v62 = vld [vmem:[#allocation3 + $0x38] sm:$0xe]  ;;  %3695 = vrot.lane.b32.xlu1 %v3601_v16, %s6039_s2  ;;  %v3636_v51 = vor.u32 %v3635_v23, %v3631_v44 }
 0x64e   :  { %v3427_v60 = vld [vmem:[#allocation3 + $0x40] sm:$0xe]  ;;  %v7991_v46 = vld [vmem:[#allocation3 + $0x88] sm:$0xf]  ;;  %v3376_v26 = vsel %vm7263_vm14, %v3247_v45, %v3375_v29  ;;  %v7995_v8 = vrot.slane %v5086_v32, 1  ;;  %3693 = vrot.lane.b32.xlu0 %v3594_v4, %s6039_s2  ;;  %v3649_v7 = vrot.slane %v3647_v55, 1  ;;  %v5088_v17 = vcombine.low %v3424_v54, %v7876_v27 }
 0x64f   :  { %v7997_v43 = vrot.slane %v5087_v36, 1  ;;  %v3654_v34 = vshll.u32 %v7984_v37, 16  ;;  %3377 = vst [vmem:[#allocation3 + $0x94] sm:$0x1] %v3376_v26  ;;  %v5089_v0 = vcombine.low %v3425_v10, %v7859_v41  ;;  %v3430_v23 = vld [vmem:[#allocation3 + $0x58] sm:$0xe]  ;;  %v5090_v4 = vcombine.low %v3426_v62, %v7897_v49 }
 0x650   :  { %v3431_v38 = vld [vmem:[#allocation3 + $0x60] sm:$0xe]  ;;  %v8007_v33 = vcombine.low %v7857_v11, %v7995_v8  ;;  %v5091_v16 = vcombine.low %v3427_v60, %v7888_v18  ;;  %v3643_v29 = vor.u32 %v3642_v24, %v3638_v14  ;;  %v8012_v27 = vrot.slane %v5088_v17, 1  ;;  %v3432_v44 = vld [vmem:[#allocation3 + $0x68] sm:$0xe] }
 0x651   :  { %v3416_v20 = vld [vmem:[#allocation3 + $0x8c] sm:$0x1]  ;;  %v5167_v3 = vcombine.low %v7995_v8, %v7997_v43  ;;  %v8014_v41 = vrot.slane %v5089_v0, 1  ;;  %3701 = vrot.lane.b32.xlu1 %v3622_v22, %s6039_s2  ;;  %v8017_v55 = vrot.slane %v5090_v4, 1  ;;  %v5094_v11 = vcombine.low %v3430_v23, %v7910_v59  ;;  %v3433_v45 = vld [vmem:[#allocation3 + $0x70] sm:$0xe] }
 0x652   :  { %v5080_v30 = vcombine.low %v7991_v46, %v3416_v20  ;;  %v8019_v57 = vrot.slane %v5091_v16, 1  ;;  %v5095_v49 = vcombine.low %v3431_v38, %v7921_v53  ;;  %v3434_v18 = vld [vmem:[#allocation3 + $0x78] sm:$0xe]  ;;  %3679 = vrot.lane.b32.xlu0 %v7906_v25, %s6039_s2  ;;  %v3650_v60 = vor.u32 %v3649_v7, %v3645_v61  ;;  %v3435_v54 = vld [vmem:[#allocation3 + $0x80] sm:$0xe]  ;;  %v5896_v8 = vld [vmem:[%s8413_s11 + $0xd0] sm:$0xff]  }
 0x653   :  { %v5169_v32 = vcombine.low %v8012_v27, %v8014_v41  ;;  %v8029_v36 = vcombine.low %v7997_v43, %v8012_v27  ;;  %v3436_v10 = vld [vmem:[#allocation3 + $0x88] sm:$0xe]  ;;  %v8031_v22 = vld [vmem:[#allocation3 + $0x90] sm:$0xf]  ;;  %v8035_v53 = vrot.slane %v5094_v11, 1  ;;  %v8041_v25 = vcombine.low %v8014_v41, %v8017_v55 }
 0x654   :  { %v3661_v14 = vshll.u32 %v5080_v30, 16  ;;  %v5171_v59 = vcombine.low %v8017_v55, %v8019_v57  ;;  %v8037_v24 = vrot.slane %v5095_v49, 1  ;;  %v3656_v61 = vrot.slane %v3654_v34, 1  ;;  %v3437_v17 = vld [vmem:[#allocation3 + $0x90] sm:$0xe] }
 0x655   :  { %v5096_v62 = vcombine.low %v3432_v44, %v7935_v58  ;;  %v5097_v26 = vcombine.low %v3433_v45, %v7945_v5  ;;  %v5098_v7 = vcombine.low %v3434_v18, %v7961_v39  ;;  %3705 = vrot.lane.b32.xlu1 %v3636_v51, %s6039_s2  ;;  %v5113_v38 = vcombine.low %v7550_v42, %v8035_v53  ;;  %v8057_v39 = vld [vmem:[%s8415_s13] sm:$0xff]   ;;  %v8457_v42 = vld [vmem:[#allocation10_spill] sm:$0xff] }
 0x656   :  { %v3417_v0 = vld [vmem:[#allocation3 + $0x94] sm:$0x1]  ;;  %v5173_v23 = vcombine.low %v8035_v53, %v8037_v24  ;;  %v5099_v4 = vcombine.low %v3435_v54, %v7970_v1  ;;  %v5100_v16 = vcombine.low %v3436_v10, %v3416_v20  ;;  %3703 = vrot.lane.b32.xlu0 %v3629_v35, %s6039_s2  ;;  %v3663_v58 = vrot.slane %v3661_v14, 1  ;;  %5587 = vmatprep.subr.bf16.mxu0 %v8057_v39 }
 0x657   :  { %v5081_v5 = vcombine.low %v8031_v22, %v3417_v0  ;;  %v8059_v51 = vrot.slane %v5096_v62, 1  ;;  %v8061_v34 = vrot.slane %v5097_v26, 1  ;;  %v8063_v44 = vrot.slane %v5098_v7, 1 }
 0x658   :  { %v8065_v11 = vrot.slane %v5099_v4, 1  ;;  %v5101_v1 = vcombine.low %v3437_v17, %v3417_v0  ;;  %v8067_v20 = vrot.slane %v5100_v16, 1  ;;  %v3659_v35 = vshrl.u32 %v5080_v30, 16 }
 0x659   :  { %v3668_v49 = vshll.u32 %v5081_v5, 16  ;;  %v5175_v45 = vcombine.low %v8059_v51, %v8061_v34  ;;  %v8074_v18 = vcombine.low %v8037_v24, %v8059_v51  ;;  %3709 = vrot.lane.b32.xlu1 %v3650_v60, %s6039_s2  ;;  %v8083_v30 = vcombine.low %v8061_v34, %v8063_v44  ;;  %v5913_v24 = vld [vmem:[%s8413_s11 + $0x100] sm:$0xff]   ;;  %v5917_v51 = vld [vmem:[%s8413_s11 + $0x110] sm:$0xff]  }
 0x65a   :  { %v8079_v54 = vrot.slane %v5101_v1, 1  ;;  %v8087_v10 = vcombine.low %v8065_v11, %v8067_v20  ;;  %3707 = vrot.lane.b32.xlu0 %v3643_v29, %s6039_s2  ;;  %v3652_v62 = vshrl.u32 %v7984_v37, 16  ;;  %v3605_v26 = vshll.u32 %v7942_v63, 16 }
 0x65b   :  { %v3664_v7 = vor.u32 %v3663_v58, %v3659_v35  ;;  %v3670_v16 = vrot.slane %v3668_v49, 1  ;;  %v8451_v29 = vshrl.u32 %v7542_v56, 16  ;;  %v3673_v1 = vshrl.u32 %v7560_v28, 16 }
 0x65c   :  { %v3657_v4 = vor.u32 %v3656_v61, %v3652_v62  ;;  %v8452_v14 = vshll.u32 %v7560_v28, 16  ;;  %v3666_v58 = vshrl.u32 %v5081_v5, 16  ;;  %v3603_v35 = vshrl.u32 %v7942_v63, 16  ;;  %v5887_v5 = vld [vmem:[%s8413_s11 + $0xc0] sm:$0xff]  }
 0x65d   :  { %3713 = vrot.lane.b32.xlu1 %v3664_v7, %s6039_s2  ;;  %v3615_v37 = vor.u32 %v7863_v50, %v8451_v29  ;;  %v3607_v17 = vrot.slane %v3605_v26, 1  ;;  %v6000_v29 = vld [vmem:[#allocation3] sm:$0xf] }
 0x65e   :  { %v3677_v60 = vrot.slane %v8452_v14, 1  ;;  %3711 = vrot.lane.b32.xlu0 %v3657_v4, %s6039_s2  ;;  %v3671_v0 = vor.u32 %v3670_v16, %v3666_v58 }
 0x65f   :  { %v3608_v56 = vor.u32 %v3607_v17, %v3603_v35 }
 0x660   :  { %v3678_v61 = vor.u32 %v3677_v60, %v3673_v1 }
 0x661   :  { %3699 = vrot.lane.b32.xlu1 %v3615_v37, %s6039_s2  ;;  %v5901_v37 = vld [vmem:[%s8413_s11 + $0xe0] sm:$0xff]  }
 0x662   :  { %3715 = vrot.lane.b32.xlu0 %v3671_v0, %s6039_s2 }
 0x665   :  { %3717 = vrot.lane.b32.xlu1 %v3678_v61, %s6039_s2 }
 0x666   :  { %3697 = vrot.lane.b32.xlu0 %v3608_v56, %s6039_s2 }
 0x6b3   :  { %v3684_v50 = vpop.permute.xlu1 %3683 }
 0x6b4   :  { %v3807_v28 = vsel %vm1677_vm11, %v7832_v31, %v3684_v50  ;;  %v3682_v49 = vpop.permute.xlu0 %3681  ;;  %v5892_v31 = vld [vmem:[%s8413_s11 + $0xc8] sm:$0xff]  }
 0x6b5   :  { %v3804_v63 = vsel %vm1677_vm11, %v7834_v19, %v3682_v49 }
 0x6b6   :  { %v5164_v14 = vcombine.low %v3804_v63, %v3807_v28 }
 0x6b7   :  { %v3688_v62 = vpop.permute.xlu1 %3687 }
 0x6b8   :  { %4338 = vmatmul.mubr.bf16.vlgmr.msra.gmra.mrb[12].mxu1 %v5164_v14  ;;  %v3686_v26 = vpop.permute.xlu0 %3685  ;;  %v3813_v19 = vsel %vm1677_vm11, %v7843_v52, %v3688_v62  ;;  %v5898_v52 = vld [vmem:[%s8413_s11 + $0xd8] sm:$0xff]   ;;  %v8454_v62 = vld [vmem:[#allocation8_spill] sm:$0xff] }
 0x6b9   :  { %4534 = vmatpush1.bf16.msra.mxu1 %v5887_v5  ;;  %5193 = vmatprep.mubr.msk.bf16.mxu1 %vm1677_vm11, %v5167_v3  ;;  %v3810_v60 = vsel %vm1677_vm11, %v7847_v47, %v3686_v26  ;;  %v8453_v5 = vld [vmem:[#allocation9_spill] sm:$0xff] }
 0x6ba   :  { %4535 = vmatprep.subr.bf16.mxu1 %v8443_v48  ;;  %v5166_v43 = vcombine.low %v3810_v60, %v3813_v19  ;;  %v8171_v55 = vcombine.low %v3807_v28, %v3810_v60  ;;  %v8455_v60 = vcombine.low %v8063_v44, %v8065_v11 }
 0x6bb   :  { %v3692_v7 = vpop.permute.xlu1 %3691 }
 0x6bc   :  { %v3690_v17 = vpop.permute.xlu0 %3689  ;;  %v3819_v0 = vsel %vm1677_vm11, %v7854_v6, %v3692_v7  ;;  %v5919_v6 = vld [vmem:[%s8415_s13 + $0x8] sm:$0xff]   ;;  %v5918_v7 = vld [vmem:[%s8413_s11 + $0x118] sm:$0xff]  }
 0x6bd   :  { %4536 = vmatpush1.bf16.msra.mxu1 %v5892_v31  ;;  %v3816_v4 = vsel %vm1677_vm11, %v7867_v13, %v3690_v17  ;;  %v5904_v13 = vld [vmem:[%s8413_s11 + $0xe8] sm:$0xff]   ;;  %v8456_v17 = vld [vmem:[#allocation11_spill] sm:$0xff] }
 0x6be   :  { %4537 = vmatprep.subr.bf16.mxu1 %v8443_v48  ;;  %v5168_v41 = vcombine.low %v3816_v4, %v3819_v0  ;;  %v5108_v49 = vcombine.low %v3813_v19, %v3816_v4 }
 0x6bf   :  { %v3696_v47 = vpop.permute.xlu1 %3695 }
 0x6c0   :  { %4346 = vmatmul.mubr.bf16.gmra.mrb[16].mxu1 %v5166_v43  ;;  %v3694_v3 = vpop.permute.xlu0 %3693  ;;  %v8166_v58 = vsel %vm1677_vm11, %v7878_v15, %v3696_v47  ;;  %v6001_v43 = vld [vmem:[#allocation3 + $0x50] sm:$0xf] }
 0x6c1   :  { %5194 = vmatprep.mubr.msk.bf16.mxu1 %vm1677_vm11, %v5169_v32  ;;  %4538 = vmatpush1.bf16.msra.mxu1 %v5896_v8  ;;  %v3822_v35 = vsel %vm1677_vm11, %v7890_v12, %v3694_v3  ;;  %v5909_v12 = vld [vmem:[%s8413_s11 + $0xf8] sm:$0xff]  }
 0x6c2   :  { %4539 = vmatprep.subr.bf16.mxu1 %v8443_v48  ;;  %v5110_v31 = vcombine.low %v3819_v0, %v3822_v35 }
 0x6c3   :  { %v3702_v1 = vpop.permute.xlu1 %3701 }
 0x6c4   :  { %v3680_v16 = vpop.permute.xlu0 %3679  ;;  %v3834_v28 = vsel %vm1677_vm11, %v7908_v2, %v3702_v1  ;;  %v8461_v1 = vcombine.low %v8079_v54, %v7552_v9 }
 0x6c5   :  { %v3801_v27 = vsel %vm1677_vm11, %v6000_v29, %v3680_v16  ;;  %4540 = vmatpush1.bf16.msra.mxu1 %v5898_v52  ;;  %v8458_v52 = vcombine.low %v8067_v20, %v8079_v54  ;;  %v8459_v29 = vcombine.low %v8019_v57, %v7545_v21  ;;  %v6007_v21 = vld [vmem:[%s8402_s0 + $0x28] sm:$0xff]   ;;  %v6008_v57 = vld [vmem:[%s8402_s0 + $0x30] sm:$0xff]  }
 0x6c6   :  { %v5104_v32 = vcombine.low %v3801_v27, %v3804_v63  ;;  %4541 = vmatprep.subr.bf16.mxu1 %v8443_v48 }
 0x6c7   :  { %v3706_v61 = vpop.permute.xlu1 %3705 }
 0x6c8   :  { %4090 = vmatmul.mubr.bf16.vlgmr.msra.gmra.mrb[20].mxu0 %v5104_v32  ;;  %4354 = vmatmul.mubr.bf16.gmra.mrb[20].mxu1 %v5168_v41  ;;  %v3704_v15 = vpop.permute.xlu0 %3703  ;;  %v3840_v26 = vsel %vm1677_vm11, %v8454_v62, %v3706_v61  ;;  %v6005_v41 = vld [vmem:[%s8402_s0 + $0x18] sm:$0xff]   ;;  %v6006_v32 = vld [vmem:[%s8402_s0 + $0x20] sm:$0xff]  }
 0x6c9   :  { %5133 = vmatprep.mubr.msk.bf16.mxu0 %vm1677_vm11, %v8007_v33  ;;  %5195 = vmatprep.mubr.msk.bf16.mxu1 %vm1677_vm11, %v5171_v59  ;;  %v5170_v59 = vcombine.low %v3822_v35, %v8166_v58  ;;  %v3837_v56 = vsel %vm1677_vm11, %v7919_v40, %v3704_v15  ;;  %v5914_v40 = vld [vmem:[%s8413_s11 + $0x108] sm:$0xff]  }
 0x6ca   :  { %4542 = vmatpush1.bf16.msra.mxu1 %v5901_v37  ;;  %5588 = vmatpush3.bf16.msra.mxu0 %v8057_v39  ;;  %v5906_v39 = vld [vmem:[%s8413_s11 + $0xf0] sm:$0xff]   ;;  %v5172_v63 = vcombine.low %v3834_v28, %v3837_v56  ;;  %v5114_v0 = vcombine.low %v3837_v56, %v3840_v26 }
 0x6cb   :  { %4543 = vmatprep.subr.bf16.mxu1 %v8443_v48  ;;  %5589 = vmatprep.subr.bf16.mxu0 %v5919_v6  ;;  %v3710_v50 = vpop.permute.xlu1 %3709 }
 0x6cc   :  { %v3846_v53 = vsel %vm1677_vm11, %v8457_v42, %v3710_v50 }
 0x6ce   :  { %4544 = vmatpush1.bf16.msra.mxu1 %v5904_v13  ;;  %5590 = vmatpush3.bf16.msra.mxu0 %v5919_v6 }
 0x6cf   :  { %4545 = vmatprep.subr.bf16.mxu1 %v8443_v48  ;;  %v3714_v2 = vpop.permute.xlu1 %3713 }
 0x6d0   :  { %4098 = vmatmul.mubr.bf16.gmra.mrb[24].mxu0 %v8171_v55  ;;  %4362 = vmatmul.mubr.bf16.gmra.mrb[24].mxu1 %v5170_v59  ;;  %v3852_v47 = vsel %vm1677_vm11, %v7991_v46, %v3714_v2  ;;  %v6002_v46 = vld [vmem:[%s8402_s0] sm:$0xff]  }
 0x6d1   :  { %5134 = vmatprep.mubr.msk.bf16.mxu0 %vm1677_vm11, %v8029_v36  ;;  %5196 = vmatprep.mubr.msk.bf16.mxu1 %vm1677_vm11, %v5173_v23  ;;  %v3708_v23 = vpop.permute.xlu0 %3707 }
 0x6d2   :  { %4546 = vmatpush1.bf16.msra.mxu1 %v5906_v39  ;;  %v3843_v14 = vsel %vm1677_vm11, %v8453_v5, %v3708_v23 }
 0x6d3   :  { %4547 = vmatprep.subr.bf16.mxu1 %v8443_v48  ;;  %v5174_v19 = vcombine.low %v3840_v26, %v3843_v14  ;;  %v5116_v16 = vcombine.low %v3843_v14, %v3846_v53 }
 0x6d5   :  { %v3712_v34 = vpop.permute.xlu0 %3711 }
 0x6d6   :  { %4548 = vmatpush1.bf16.msra.mxu1 %v5909_v12  ;;  %v3849_v8 = vsel %vm1677_vm11, %v8456_v17, %v3712_v34 }
 0x6d7   :  { %4549 = vmatprep.subr.bf16.mxu1 %v8443_v48 }
 0x6d8   :  { %4106 = vmatmul.mubr.bf16.gmra.mrb[28].mxu0 %v5108_v49  ;;  %4370 = vmatmul.mubr.bf16.gmra.mrb[28].mxu1 %v5172_v63 }
 0x6d9   :  { %5135 = vmatprep.mubr.msk.bf16.mxu0 %vm1677_vm11, %v8041_v25  ;;  %5197 = vmatprep.mubr.msk.bf16.mxu1 %vm1677_vm11, %v5175_v45  ;;  %v3700_v45 = vpop.permute.xlu1 %3699  ;;  %v3716_v11 = vpop.permute.xlu0 %3715 }
 0x6da   :  { %4550 = vmatpush1.bf16.msra.mxu1 %v5913_v24  ;;  %v3831_v3 = vsel %vm1677_vm11, %v6001_v43, %v3700_v45 }
 0x6db   :  { %4551 = vmatprep.subr.bf16.mxu1 %v8443_v48  ;;  %v5112_v44 = vcombine.low %v3831_v3, %v3834_v28 }
 0x6dd   :  { %v3698_v20 = vpop.permute.xlu0 %3697  ;;  %v3718_v6 = vpop.permute.xlu1 %3717 }
 0x6de   :  { %4552 = vmatpush1.bf16.msra.mxu1 %v5914_v40 }
 0x6df   :  { %4553 = vmatprep.subr.bf16.mxu1 %v8443_v48 }
 0x6e0   :  { %4114 = vmatmul.mubr.bf16.gmra.mrb[32].mxu0 %v5110_v31  ;;  %4378 = vmatmul.mubr.bf16.gmra.mrb[32].mxu1 %v5174_v19  ;;  %v8316_v19 = vld [vmem:[%s8414_s12] ss:$0 sm:$0xff] }
 0x6e1   :  { %5136 = vmatprep.mubr.msk.bf16.mxu0 %vm1677_vm11, %v5113_v38  ;;  %5198 = vmatprep.mubr.msk.bf16.mxu1 %vm1677_vm11, %v8455_v60  ;;  %v5176_v38 = vcombine.low %v3846_v53, %v3849_v8 }
 0x6e2   :  { %4554 = vmatpush1.bf16.msra.mxu1 %v5917_v51 }
 0x6e3   :  { %4555 = vmatprep.subr.bf16.mxu1 %v8443_v48  ;;  %v3855_v48 = vsel %vm1677_vm11, %v8031_v22, %v3716_v11  ;;  %v5118_v22 = vcombine.low %v3849_v8, %v3852_v47 }
 0x6e4   :  { %v5178_v4 = vcombine.low %v3852_v47, %v3855_v48 }
 0x6e6   :  { %4556 = vmatpush1.bf16.msra.mxu1 %v5918_v7 }
 0x6e8   :  { %4122 = vmatmul.mubr.bf16.gmra.mrb[36].mxu0 %v5112_v44  ;;  %4386 = vmatmul.mubr.bf16.gmra.mrb[36].mxu1 %v5176_v38 }
 0x6e9   :  { %5137 = vmatprep.mubr.msk.bf16.mxu0 %vm1677_vm11, %v8074_v18  ;;  %5199 = vmatprep.mubr.msk.bf16.mxu1 %vm1677_vm11, %v8458_v52 }
 0x6f0   :  { %4130 = vmatmul.mubr.bf16.gmra.mrb[40].mxu0 %v5114_v0  ;;  %4394 = vmatmul.mubr.bf16.gmra.mrb[40].mxu1 %v5178_v4 }
 0x6f1   :  { %5138 = vmatprep.mubr.msk.bf16.mxu0 %vm1677_vm11, %v8083_v30  ;;  %5240 = vmatprep.mubr.msk.bf16.mxu1 %vm1677_vm11, %v8007_v33  ;;  %v6003_v33 = vld [vmem:[%s8402_s0 + $0x8] sm:$0xff]  }
 0x6f8   :  { %4138 = vmatmul.mubr.bf16.gmra.mrb[44].mxu0 %v5116_v16  ;;  %4566 = vmatmul.mubr.bf16.vlgmr.msra.gmra.mrb[12].mxu1 %v8171_v55 }
 0x6f9   :  { %5139 = vmatprep.mubr.msk.bf16.mxu0 %vm1677_vm11, %v8087_v10  ;;  %5241 = vmatprep.mubr.msk.bf16.mxu1 %vm1677_vm11, %v8029_v36  ;;  %v6004_v36 = vld [vmem:[%s8402_s0 + $0x10] sm:$0xff]  }
 0x700   :  { %4146 = vmatmul.mubr.bf16.gmra.mrb[48].mxu0 %v5118_v22  ;;  %4574 = vmatmul.mubr.bf16.gmra.mrb[16].mxu1 %v5108_v49 }
 0x701   :  { %5242 = vmatprep.mubr.msk.bf16.mxu1 %vm1677_vm11, %v8041_v25  ;;  %5591 = vmatprep.mubr.msk.bf16.mxu0 %vm94_vm0, %v6002_v46  ;;  %v8460_v25 = vld [vmem:[#allocation7_spill] sm:$0xff] }
 0x702   :  { %v3828_v27 = vsel %vm1677_vm11, %v8460_v25, %v3698_v20  ;;  %v8333_v20 = vld [vmem:[%s8416_s14] ss:$0 sm:$0xff]  ;;  %s6042_s14 = smov [#allocation4]  }
 0x703   :  { %v5224_v37 = vcombine.low %v8166_v58, %v3828_v27  ;;  %s4883_s8 = sshll.u32 %s6042_s14, 4  ;;  %s4884_s8 = int_to_ptr.vmem [resolvable:$true] %s4883_s8 }
 0x704   :  { %s6011_s10 = scalar_lea.vmem %s4884_s8, 1024  ;;  %p6016_p1 = scmp.lt.s32.totalorder %s4884_s8, %s4884_s8 }
 0x705   :  { %p6012_p0 = scmp.ne.s32.totalorder %s4884_s8, %s6011_s10  ;;  %p6017_p2 = scmp.lt.s32.totalorder %s6011_s10, %s6011_s10 }
 0x707   :  { %p6018_p3 = por %p6017_p2, %p6016_p1 }
 0x708   :  { %4582 = vmatmul.mubr.bf16.gmra.mrb[20].mxu1 %v5110_v31  ;;  %5592 = vmatmul.mubr.msk.bf16.vlgmr.msra.gmra.mrb[52].mxu0 %vm94_vm0, %v6003_v33 }
 0x709   :  { %5243 = vmatprep.mubr.msk.bf16.mxu1 %vm1677_vm11, %v8459_v29  ;;  %5595 = vmatprep.mubr.msk.bf16.mxu0 %vm94_vm0, %v6004_v36  ;;  %p6019_p4 = pnand %p6018_p3, %p6012_p0 }
 0x710   :  { %4590 = vmatmul.mubr.bf16.gmra.mrb[24].mxu1 %v5224_v37  ;;  %5596 = vmatmul.mubr.msk.bf16.gmra.mrb[56].mxu0 %vm94_vm0, %v6005_v41 }
 0x711   :  { %5244 = vmatprep.mubr.msk.bf16.mxu1 %vm1677_vm11, %v8074_v18  ;;  %5599 = vmatprep.mubr.msk.bf16.mxu0 %vm94_vm0, %v6006_v32  ;;  %v6009_v18 = vld [vmem:[%s8402_s0 + $0x38] sm:$0xff]  }
 0x718   :  { %4598 = vmatmul.mubr.bf16.gmra.mrb[28].mxu1 %v5114_v0  ;;  %5600 = vmatmul.mubr.msk.bf16.gmra.mrb[60].mxu0 %vm94_vm0, %v6007_v21 }
 0x719   :  { %5245 = vmatprep.mubr.msk.bf16.mxu1 %vm1677_vm11, %v8083_v30  ;;  %5603 = vmatprep.mubr.msk.bf16.mxu0 %vm94_vm0, %v6008_v57  ;;  %v6010_v30 = vld [vmem:[#allocation3 + $0x98] sm:$0xf] }
 0x71a   :  { %v3858_v13 = vsel %vm1677_vm11, %v6010_v30, %v3718_v6 }
 0x71b   :  { %v5226_v58 = vcombine.low %v3855_v48, %v3858_v13 }
 0x720   :  { %4606 = vmatmul.mubr.bf16.gmra.mrb[32].mxu1 %v5116_v16  ;;  %5604 = vmatmul.mubr.msk.bf16.gmra.mrb[64].mxu0 %vm94_vm0, %v6009_v18 }
 0x721   :  { %5246 = vmatprep.mubr.msk.bf16.mxu1 %vm1677_vm11, %v8087_v10 }
 0x728   :  { %4614 = vmatmul.mubr.bf16.gmra.mrb[36].mxu1 %v5118_v22 }
 0x729   :  { %5247 = vmatprep.mubr.msk.bf16.mxu1 %vm1677_vm11, %v8461_v1 }
 0x730   :  { %4622 = vmatmul.mubr.bf16.gmra.mrb[40].mxu1 %v5226_v58 }
 0x79b   :  { %v4091_v35 = vpop.f32.mrb[20].mxu0 }
 0x79c   :  { %v4093_v55 = vpop.f32.mrb[21].mxu0  ;;  %v4092_v51 = vadd.f32 %v8316_v19, %v4091_v35 }
 0x79d   :  { %v4094_v59 = vpop.f32.mrb[22].mxu0 }
 0x79e   :  { %v4096_v61 = vpop.f32.mrb[23].mxu0  ;;  %v4095_v60 = vadd.f32 %v8316_v19, %v4094_v59 }
 0x7a3   :  { %v4099_v39 = vpop.f32.mrb[24].mxu0 }
 0x7a4   :  { %v4101_v15 = vpop.f32.mrb[25].mxu0  ;;  %v4100_v44 = vadd.f32 %v8316_v19, %v4099_v39 }
 0x7a5   :  { %v4102_v12 = vpop.f32.mrb[26].mxu0 }
 0x7a6   :  { %v4104_v10 = vpop.f32.mrb[27].mxu0  ;;  %v4103_v48 = vadd.f32 %v8316_v19, %v4102_v12 }
 0x7ab   :  { %v4107_v56 = vpop.f32.mrb[28].mxu0 }
 0x7ac   :  { %v4109_v50 = vpop.f32.mrb[29].mxu0  ;;  %v4108_v29 = vadd.f32 %v8316_v19, %v4107_v56 }
 0x7ad   :  { %v4110_v28 = vpop.f32.mrb[30].mxu0 }
 0x7ae   :  { %v4112_v49 = vpop.f32.mrb[31].mxu0  ;;  %v4111_v41 = vadd.f32 %v8316_v19, %v4110_v28 }
 0x7b3   :  { %v4115_v9 = vpop.f32.mrb[32].mxu0 }
 0x7b4   :  { %v4117_v54 = vpop.f32.mrb[33].mxu0  ;;  %v4116_v56 = vadd.f32 %v8316_v19, %v4115_v9 }
 0x7b5   :  { %v8303_v63 = vpop.f32.mrb[34].mxu0 }
 0x7b6   :  { %v4120_v24 = vpop.f32.mrb[35].mxu0 }
 0x7b7   :  { %v4119_v24 = vadd.f32 %v8316_v19, %v8303_v63 }
 0x7bb   :  { %v8305_v23 = vpop.f32.mrb[36].mxu0 }
 0x7bc   :  { %v4125_v2 = vpop.f32.mrb[37].mxu0 }
 0x7bd   :  { %v8307_v40 = vpop.f32.mrb[38].mxu0 }
 0x7be   :  { %v4128_v5 = vpop.f32.mrb[39].mxu0 }
 0x7c3   :  { %v8309_v14 = vpop.f32.mrb[40].mxu0 }
 0x7c4   :  { %v4133_v62 = vpop.f32.mrb[41].mxu0 }
 0x7c5   :  { %v8311_v26 = vpop.f32.mrb[42].mxu0 }
 0x7c6   :  { %v4136_v31 = vpop.f32.mrb[43].mxu0 }
 0x7cb   :  { %v8319_v34 = vpop.f32.mrb[44].mxu0  ;;  %v4567_v45 = vpop.f32.mrb[12].mxu1 }
 0x7cc   :  { %v5684_v7 = vadd.f32 %v4567_v45, %v4092_v51  ;;  %v4141_v17 = vpop.f32.mrb[45].mxu0  ;;  %v4569_v8 = vpop.f32.mrb[13].mxu1 }
 0x7cd   :  { %v8322_v43 = vpop.f32.mrb[46].mxu0  ;;  %v4570_v3 = vpop.f32.mrb[14].mxu1 }
 0x7ce   :  { %v5686_v42 = vadd.f32 %v4570_v3, %v4095_v60  ;;  %v4144_v53 = vpop.f32.mrb[47].mxu0  ;;  %v4572_v38 = vpop.f32.mrb[15].mxu1 }
 0x7d3   :  { %v8325_v11 = vpop.f32.mrb[48].mxu0  ;;  %v4575_v52 = vpop.f32.mrb[16].mxu1 }
 0x7d4   :  { %v5688_v47 = vadd.f32 %v4575_v52, %v4100_v44  ;;  %v4149_v0 = vpop.f32.mrb[49].mxu0  ;;  %v4577_v4 = vpop.f32.mrb[17].mxu1 }
 0x7d5   :  { %v8328_v16 = vpop.f32.mrb[50].mxu0  ;;  %v4578_v46 = vpop.f32.mrb[18].mxu1 }
 0x7d6   :  { %v5690_v22 = vadd.f32 %v4578_v46, %v4103_v48  ;;  %v4152_v33 = vpop.f32.mrb[51].mxu0  ;;  %v4580_v36 = vpop.f32.mrb[19].mxu1  ;;  %v4124_v48 = vadd.f32 %v8316_v19, %v8305_v23 }
 0x7db   :  { %v4583_v25 = vpop.f32.mrb[20].mxu1  ;;  %v5593_v27 = vpop.f32.mrb[52].mxu0 }
 0x7dc   :  { %v5692_v32 = vadd.f32 %v4583_v25, %v4108_v29  ;;  %v4776_v37 = vadd.f32 %v5593_v27, %v8333_v20  ;;  %v4585_v21 = vpop.f32.mrb[21].mxu1  ;;  %v4767_v57 = vpop.f32.mrb[53].mxu0 }
 0x7dd   :  { %v4768_v18 = vadd.f32 %v8333_v20, %v4767_v57  ;;  %v4586_v6 = vpop.f32.mrb[22].mxu1  ;;  %v5594_v1 = vpop.f32.mrb[54].mxu0 }
 0x7de   :  { %v4832_v30 = vadd.f32 %v5688_v47, %v4776_v37  ;;  %v5694_v13 = vadd.f32 %v4586_v6, %v4111_v41  ;;  %v4779_v58 = vadd.f32 %v5594_v1, %v8333_v20  ;;  %v4588_v35 = vpop.f32.mrb[23].mxu1  ;;  %v4770_v55 = vpop.f32.mrb[55].mxu0 }
 0x7df   :  { %v4830_v59 = vadd.f32 %v5684_v7, %v4768_v18  ;;  %v4771_v61 = vadd.f32 %v8333_v20, %v4770_v55  ;;  %v4135_v35 = vadd.f32 %v8316_v19, %v8311_v26 }
 0x7e0   :  { %v4848_v39 = vpack.c.bf16 %v4832_v30, %v4832_v30  ;;  %v4833_v15 = vadd.f32 %v5690_v22, %v4779_v58  ;;  %v4127_v22 = vadd.f32 %v8316_v19, %v8307_v40  ;;  %v4132_v40 = vadd.f32 %v8316_v19, %v8309_v14 }
 0x7e1   :  { %v4846_v12 = vpack.c.bf16 %v4830_v59, %v4830_v59  ;;  %v4831_v10 = vadd.f32 %v5686_v42, %v4771_v61 }
 0x7e2   :  { %4864 = vst.msk [vmem:[#allocation4 + $0x8] sm:$0xf] %vm2961_vm9, %v4848_v39  ;;  %v4849_v50 = vpack.c.bf16 %v4833_v15, %v4833_v15 }
 0x7e3   :  { %4862 = vst.msk [vmem:[#allocation4] sm:$0xf] %vm2961_vm9, %v4846_v12  ;;  %v4847_v28 = vpack.c.bf16 %v4831_v10, %v4831_v10  ;;  %v4591_v49 = vpop.f32.mrb[24].mxu1  ;;  %v5597_v54 = vpop.f32.mrb[56].mxu0 }
 0x7e4   :  { %4865 = vst.msk [vmem:[#allocation4 + $0xc] sm:$0xf] %vm2961_vm9, %v4849_v50  ;;  %v5696_v2 = vadd.f32 %v4591_v49, %v4116_v56  ;;  %v4792_v5 = vadd.f32 %v5597_v54, %v8333_v20  ;;  %v4593_v62 = vpop.f32.mrb[25].mxu1  ;;  %v4783_v31 = vpop.f32.mrb[57].mxu0  ;;  %v4140_v54 = vadd.f32 %v8316_v19, %v8319_v34 }
 0x7e5   :  { %4863 = vst.msk [vmem:[#allocation4 + $0x4] sm:$0xf] %vm2961_vm9, %v4847_v28  ;;  %v4784_v9 = vadd.f32 %v8333_v20, %v4783_v31  ;;  %v4594_v51 = vpop.f32.mrb[26].mxu1  ;;  %v5598_v45 = vpop.f32.mrb[58].mxu0 }
 0x7e6   :  { %v4836_v60 = vadd.f32 %v5696_v2, %v4792_v5  ;;  %v5698_v7 = vadd.f32 %v4594_v51, %v4119_v24  ;;  %v4795_v17 = vadd.f32 %v5598_v45, %v8333_v20  ;;  %v4596_v8 = vpop.f32.mrb[27].mxu1  ;;  %v4786_v3 = vpop.f32.mrb[59].mxu0  ;;  %v4143_v5 = vadd.f32 %v8316_v19, %v8322_v43 }
 0x7e7   :  { %v4834_v63 = vadd.f32 %v5692_v32, %v4784_v9  ;;  %v4787_v42 = vadd.f32 %v8333_v20, %v4786_v3  ;;  %v4148_v8 = vadd.f32 %v8316_v19, %v8325_v11 }
 0x7e8   :  { %v4852_v53 = vpack.c.bf16 %v4836_v60, %v4836_v60  ;;  %v4837_v38 = vadd.f32 %v5698_v7, %v4795_v17 }
 0x7e9   :  { %v4850_v44 = vpack.c.bf16 %v4834_v63, %v4834_v63  ;;  %v4835_v52 = vadd.f32 %v5694_v13, %v4787_v42  ;;  %v4151_v42 = vadd.f32 %v8316_v19, %v8328_v16 }
 0x7ea   :  { %4868 = vst.msk [vmem:[#allocation4 + $0x18] sm:$0xf] %vm2961_vm9, %v4852_v53  ;;  %v4853_v47 = vpack.c.bf16 %v4837_v38, %v4837_v38 }
 0x7eb   :  { %4866 = vst.msk [vmem:[#allocation4 + $0x10] sm:$0xf] %vm2961_vm9, %v4850_v44  ;;  %v4851_v0 = vpack.c.bf16 %v4835_v52, %v4835_v52  ;;  %v4599_v4 = vpop.f32.mrb[28].mxu1  ;;  %v5601_v46 = vpop.f32.mrb[60].mxu0 }
 0x7ec   :  { %4869 = vst.msk [vmem:[#allocation4 + $0x1c] sm:$0xf] %vm2961_vm9, %v4853_v47  ;;  %v5700_v33 = vadd.f32 %v4599_v4, %v4124_v48  ;;  %v4601_v36 = vpop.f32.mrb[29].mxu1  ;;  %v4799_v29 = vpop.f32.mrb[61].mxu0  ;;  %v4808_v1 = vadd.f32 %v5601_v46, %v8333_v20 }
 0x7ed   :  { %4867 = vst.msk [vmem:[#allocation4 + $0x14] sm:$0xf] %vm2961_vm9, %v4851_v0  ;;  %v4800_v23 = vadd.f32 %v8333_v20, %v4799_v29  ;;  %v4602_v25 = vpop.f32.mrb[30].mxu1  ;;  %v5602_v27 = vpop.f32.mrb[62].mxu0 }
 0x7ee   :  { %v5702_v41 = vadd.f32 %v4602_v25, %v4127_v22  ;;  %v4604_v32 = vpop.f32.mrb[31].mxu1  ;;  %v4802_v37 = vpop.f32.mrb[63].mxu0  ;;  %v4811_v55 = vadd.f32 %v5602_v27, %v8333_v20 }
 0x7ef   :  { %v4838_v21 = vadd.f32 %v5700_v33, %v4800_v23  ;;  %v4803_v57 = vadd.f32 %v8333_v20, %v4802_v37 }
 0x7f1   :  { %v4854_v18 = vpack.c.bf16 %v4838_v21, %v4838_v21  ;;  %v4839_v6 = vadd.f32 %v5702_v41, %v4803_v57 }
 0x7f3   :  { %4870 = vst.msk [vmem:[#allocation4 + $0x20] sm:$0xf] %vm2961_vm9, %v4854_v18  ;;  %v4855_v30 = vpack.c.bf16 %v4839_v6, %v4839_v6  ;;  %v4607_v13 = vpop.f32.mrb[32].mxu1  ;;  %v5605_v58 = vpop.f32.mrb[64].mxu0 }
 0x7f4   :  { %v5704_v59 = vadd.f32 %v4607_v13, %v4132_v40  ;;  %v4609_v61 = vpop.f32.mrb[33].mxu1  ;;  %v4815_v39 = vpop.f32.mrb[65].mxu0  ;;  %v4824_v3 = vadd.f32 %v5605_v58, %v8333_v20 }
 0x7f5   :  { %4871 = vst.msk [vmem:[#allocation4 + $0x24] sm:$0xf] %vm2961_vm9, %v4855_v30  ;;  %v4610_v15 = vpop.f32.mrb[34].mxu1  ;;  %v5606_v12 = vpop.f32.mrb[66].mxu0  ;;  %v4816_v24 = vadd.f32 %v8333_v20, %v4815_v39 }
 0x7f6   :  { %v4840_v14 = vadd.f32 %v5704_v59, %v4808_v1  ;;  %v5706_v10 = vadd.f32 %v4610_v15, %v4135_v35  ;;  %v4612_v56 = vpop.f32.mrb[35].mxu1  ;;  %v4818_v50 = vpop.f32.mrb[67].mxu0  ;;  %v4827_v52 = vadd.f32 %v5606_v12, %v8333_v20 }
 0x7f7   :  { %v4819_v9 = vadd.f32 %v8333_v20, %v4818_v50 }
 0x7f8   :  { %v4856_v28 = vpack.c.bf16 %v4840_v14, %v4840_v14  ;;  %v4841_v49 = vadd.f32 %v5706_v10, %v4811_v55 }
 0x7fa   :  { %4872 = vst.msk [vmem:[#allocation4 + $0x28] sm:$0xf] %vm2961_vm9, %v4856_v28  ;;  %v4857_v26 = vpack.c.bf16 %v4841_v49, %v4841_v49 }
 0x7fb   :  { %v4615_v2 = vpop.f32.mrb[36].mxu1 }
 0x7fc   :  { %4873 = vst.msk [vmem:[#allocation4 + $0x2c] sm:$0xf] %vm2961_vm9, %v4857_v26  ;;  %v5708_v62 = vadd.f32 %v4615_v2, %v4140_v54  ;;  %v4617_v31 = vpop.f32.mrb[37].mxu1 }
 0x7fd   :  { %v4618_v51 = vpop.f32.mrb[38].mxu1 }
 0x7fe   :  { %v4842_v45 = vadd.f32 %v5708_v62, %v4816_v24  ;;  %v5710_v60 = vadd.f32 %v4618_v51, %v4143_v5  ;;  %v4620_v7 = vpop.f32.mrb[39].mxu1 }
 0x800   :  { %v4858_v34 = vpack.c.bf16 %v4842_v45, %v4842_v45  ;;  %v4843_v17 = vadd.f32 %v5710_v60, %v4819_v9 }
 0x802   :  { %4874 = vst.msk [vmem:[#allocation4 + $0x30] sm:$0xf] %vm2961_vm9, %v4858_v34  ;;  %v4859_v43 = vpack.c.bf16 %v4843_v17, %v4843_v17 }
 0x803   :  { %v4623_v63 = vpop.f32.mrb[40].mxu1 }
 0x804   :  { %4875 = vst.msk [vmem:[#allocation4 + $0x34] sm:$0xf] %vm2961_vm9, %v4859_v43  ;;  %v5712_v53 = vadd.f32 %v4623_v63, %v4148_v8  ;;  %v4625_v38 = vpop.f32.mrb[41].mxu1 }
 0x805   :  { %v4626_v44 = vpop.f32.mrb[42].mxu1 }
 0x806   :  { %v4844_v48 = vadd.f32 %v5712_v53, %v4824_v3  ;;  %v5714_v47 = vadd.f32 %v4626_v44, %v4151_v42  ;;  %v4628_v0 = vpop.f32.mrb[43].mxu1 }
 0x808   :  { %v4860_v11 = vpack.c.bf16 %v4844_v48, %v4844_v48  ;;  %v4845_v4 = vadd.f32 %v5714_v47, %v4827_v52 }
 0x80a   :  { %4876 = vst.msk [vmem:[#allocation4 + $0x38] sm:$0xf] %vm2961_vm9, %v4860_v11  ;;  %v4861_v46 = vpack.c.bf16 %v4845_v4, %v4845_v4 }
 0x80c   :  { %4877 = vst.msk [vmem:[#allocation4 + $0x3c] sm:$0xf] %vm2961_vm9, %v4861_v46 }
 0x80d   :  { %6022 = shalt.err (!%p6019_p4)
}
 0x80e   :  { %s6023_s27 = scalar_lea.hbm %s8417_s15, 1024 }
 0x80f   :  { %p6024_p5 = scmp.ne.s32.totalorder %s8417_s15, %s6023_s27  ;;  %p6027_p6 = scmp.lt.u32.totalorder %s6023_s27, %s8417_s15 }
 0x811   :  { %p6029_p7 = pnand %p6027_p6, %p6024_p5 }
 0x813   :  { %6032 = shalt.err (!%p6029_p7)
}
 0x814   :  { %s6043_s16 = smov 4  }
 0x815   :  { %4889 = dma.vmem_to_hbm [thread:$0]  %s4884_s8, 1024, %s8417_s15, [#allocation5], %s6039_s2, %s6039_s2, %s6043_s16  }
 0x816   :  { %6033 = dma.done.wait [#allocation5], 1024  }
 0x817   :  { %6034 = vsyncadd [#allocation5], 4294966272 }
 0x818   :  { %4893 = vsyncpa [#allocation5], 1 }

</bundles_post_ra>
